<compile_context>
chip_gen: v6e
topology: v6e:2x2x1
jax: 0.10.0
libtpu: 0.0.40
codegen_flags: <defaults>
</compile_context>

<pallas_src>
import functools

import jax
import jax.numpy as jnp
from jax.experimental import pallas as pl
from jax.experimental.pallas import tpu as pltpu

LN_EPS = 1e-5  # torch.nn.LayerNorm default eps


def _round_up(n, m):
    return -(-n // m) * m


# ------------------------------ in-kernel helpers -----------------------------

def _layernorm(x, gamma, beta):
    # single-pass LN: mean + mean-of-squares (halves cross-lane reductions)
    mu = jnp.mean(x, axis=-1, keepdims=True)
    ex2 = jnp.mean(x * x, axis=-1, keepdims=True)
    var = jnp.maximum(ex2 - mu * mu, 0.0)
    return (x - mu) * jax.lax.rsqrt(var + LN_EPS) * gamma + beta


# ----------------------------------- kernel -----------------------------------

def fused_forward_kernel(*refs, G, compute_dtype):
    # refs layout:
    #   x_0..x_{G-1}          [B, din_g_pad]   (per-group padded inputs)
    #   w1_0..w1_{G-1}        [din_g_pad, D]   (per-group padded mapper-1 W)
    #   mapper stacks (7), attention stacks (6), head params (6)
    #   outputs: fused [B,D], logits [B,Cpad], attn [L,GB,GB]
    #   scratch: feats_sc [GB, D]
    xs = refs[:G]
    mw1s = refs[G:2 * G]
    (mb1_ref, mg1_ref, mbe1_ref, mw2_ref, mb2_ref, mg2_ref, mbe2_ref,
     wqkv_ref, bqkv_ref, wo_ref, bo_ref, gln_ref, beln_ref,
     hw1_ref, hb1_ref, hg_ref, hbe_ref, hw2_ref, hb2_ref,
     fused_ref, logits_ref, attn_ref, feats_sc) = refs[2 * G:]

    B = xs[0].shape[0]
    D = mw2_ref.shape[-1]
    L = wqkv_ref.shape[0]
    GB = G * B

    def mm(a, b):
        return jnp.dot(a.astype(compute_dtype), b.astype(compute_dtype),
                       preferred_element_type=jnp.float32)

    # --- feature mappers: Linear -> LN -> ReLU -> Linear -> LN -> ReLU --------
    for g in range(G):
        h = mm(xs[g][...], mw1s[g][...]) + mb1_ref[g]
        h = jnp.maximum(_layernorm(h, mg1_ref[g], mbe1_ref[g]), 0.0)
        h = mm(h, mw2_ref[g]) + mb2_ref[g]
        h = jnp.maximum(_layernorm(h, mg2_ref[g], mbe2_ref[g]), 0.0)
        feats_sc[g * B:(g + 1) * B, :] = h          # flat row index = g*B + b

    feats = feats_sc[...]                            # [GB, D]

    # block-diagonal mask: flat rows/cols belong to the same batch element
    # iff (row % B) == (col % B)
    rb = jax.lax.broadcasted_iota(jnp.int32, (GB, GB), 0) % B
    cb = jax.lax.broadcasted_iota(jnp.int32, (GB, GB), 1) % B
    same_batch = rb == cb

    scale = jnp.float32(1.0 / (D ** 0.5))
    for l in range(L):
        # fused Q/K/V projection: one [GB, D] x [D, 3D] MXU push
        qkv = mm(feats, wqkv_ref[l]) + bqkv_ref[l]
        q = qkv[:, :D]
        k = qkv[:, D:2 * D]
        v = qkv[:, 2 * D:]

        # flat scores [GB, GB]; contract on the feature dim (no explicit k.T)
        s = jax.lax.dot_general(
            q.astype(compute_dtype), k.astype(compute_dtype),
            (((1,), (1,)), ((), ())),
            preferred_element_type=jnp.float32) * scale
        s = jnp.where(same_batch, s, jnp.float32(-1e30))
        s = s - jnp.max(s, axis=-1, keepdims=True)
        p = jnp.where(same_batch, jnp.exp(s), 0.0)   # off-block entries exactly 0
        p = p * pl.reciprocal(jnp.sum(p, axis=-1, keepdims=True), approx=True)

        att = mm(p, v)                               # [GB, D]
        o = mm(att, wo_ref[l]) + bo_ref[l]
        feats = _layernorm(feats + o, gln_ref[l], beln_ref[l])
        attn_ref[l] = p                              # flat masked weights per layer

    # --- fused features: mean over the G groups (static sublane-aligned slices) -
    acc = feats[0:B, :]
    for g in range(1, G):
        acc = acc + feats[g * B:(g + 1) * B, :]
    fused = acc * jnp.float32(1.0 / G)
    fused_ref[...] = fused

    # --- classifier head: Linear -> ReLU -> LN -> Linear (lane-dense, padded) --
    h = jnp.maximum(mm(fused, hw1_ref[...]) + hb1_ref[...], 0.0)
    h = _layernorm(h, hg_ref[...], hbe_ref[...])
    logits_ref[...] = mm(h, hw2_ref[...]) + hb2_ref[...]


# ---------------------------------- wrappers -----------------------------------

def forward(params, feature_groups, num_classes, compute_dtype=jnp.float32):
    G = len(feature_groups)
    B = feature_groups[0].shape[0]
    D = params['head']['w1'].shape[0]
    L = len(params['attn'])
    GB = G * B
    cpad = _round_up(max(num_classes, 1), 128)

    mappers = params['mappers']
    attn = params['attn']
    head = params['head']

    # per-group inputs / mapper-1 weights, padded only to their OWN 128-multiple
    xs, w1s = [], []
    for x, m in zip(feature_groups, mappers):
        dpad = _round_up(x.shape[1], 128)
        xs.append(jnp.pad(x, ((0, 0), (0, dpad - x.shape[1]))))
        w1s.append(jnp.pad(m['w1'], ((0, dpad - m['w1'].shape[0]), (0, 0))))

    stacks = (
        jnp.stack([m['b1'] for m in mappers]),
        jnp.stack([m['g1'] for m in mappers]),
        jnp.stack([m['be1'] for m in mappers]),
        jnp.stack([m['w2'] for m in mappers]),
        jnp.stack([m['b2'] for m in mappers]),
        jnp.stack([m['g2'] for m in mappers]),
        jnp.stack([m['be2'] for m in mappers]),
        jnp.stack([jnp.concatenate([l['wq'], l['wk'], l['wv']], axis=1)
                   for l in attn]),
        jnp.stack([jnp.concatenate([l['bq'], l['bk'], l['bv']], axis=1)
                   for l in attn]),
        jnp.stack([l['wo'] for l in attn]),
        jnp.stack([l['bo'] for l in attn]),
        jnp.stack([l['g'] for l in attn]),
        jnp.stack([l['be'] for l in attn]),
        head['w1'], head['b1'], head['g'], head['be'],
        jnp.pad(head['w2'], ((0, 0), (0, cpad - head['w2'].shape[1]))),
        jnp.pad(head['b2'], ((0, 0), (0, cpad - head['b2'].shape[1]))),
    )
    args = (*xs, *w1s, *stacks)

    vmem = pl.BlockSpec(memory_space=pltpu.MemorySpace.VMEM)
    fused, logits_pad, attn_flat = pl.pallas_call(
        functools.partial(fused_forward_kernel, G=G, compute_dtype=compute_dtype),
        out_shape=(jax.ShapeDtypeStruct((B, D), jnp.float32),
                   jax.ShapeDtypeStruct((B, cpad), jnp.float32),
                   jax.ShapeDtypeStruct((L, GB, GB), jnp.float32)),
        in_specs=[vmem] * len(args),
        out_specs=(vmem, vmem, vmem),
        scratch_shapes=[pltpu.VMEM((GB, D), jnp.float32)],
    )(*args)

    logits = logits_pad[:, :num_classes]
    # Recover per-layer [B, G, G] attention weights from the flat masked
    # weights: off-block entries are exactly 0, so summing out the key-batch
    # axis is an exact extraction of the diagonal blocks.
    p5 = attn_flat.reshape(L, G, B, G, B)
    attn_bgg = jnp.transpose(jnp.sum(p5, axis=4), (0, 2, 1, 3))   # [L, B, G, G]
    return fused, logits, [attn_bgg[l] for l in range(L)]


# ------------------------ deterministic parameter init -------------------------

def _linear_init(key, fan_in, fan_out):
    kw, kb = jax.random.split(key)
    bound = 1.0 / (fan_in ** 0.5)
    w = jax.random.uniform(kw, (fan_in, fan_out), jnp.float32, -bound, bound)
    b = jax.random.uniform(kb, (1, fan_out), jnp.float32, -bound, bound)
    return w, b


def init_params(key, input_dims, d_model, num_classes, num_layers):
    keys = iter(jax.random.split(key, 64))
    ones = jnp.ones((1, d_model), jnp.float32)
    zeros = jnp.zeros((1, d_model), jnp.float32)

    mappers = []
    for dim in input_dims:
        w1, b1 = _linear_init(next(keys), dim, d_model)
        w2, b2 = _linear_init(next(keys), d_model, d_model)
        mappers.append(dict(w1=w1, b1=b1, g1=ones, be1=zeros,
                            w2=w2, b2=b2, g2=ones, be2=zeros))

    attn = []
    for _ in range(num_layers):
        wq, bq = _linear_init(next(keys), d_model, d_model)
        wk, bk = _linear_init(next(keys), d_model, d_model)
        wv, bv = _linear_init(next(keys), d_model, d_model)
        wo, bo = _linear_init(next(keys), d_model, d_model)
        attn.append(dict(wq=wq, bq=bq, wk=wk, bk=bk, wv=wv, bv=bv,
                         wo=wo, bo=bo, g=ones, be=zeros))

    w1, b1 = _linear_init(next(keys), d_model, d_model)
    w2, b2 = _linear_init(next(keys), d_model, num_classes)
    head = dict(w1=w1, b1=b1, g=ones, be=zeros, w2=w2, b2=b2)

    return dict(mappers=mappers, attn=attn, head=head)


# ------------------------------ pure-JAX reference ------------------------------

def _ref_ln(x, g, b):
    mu = x.mean(-1, keepdims=True)
    var = ((x - mu) ** 2).mean(-1, keepdims=True)
    return (x - mu) / jnp.sqrt(var + LN_EPS) * g + b


def forward_ref(params, feature_groups):
    mapped = []
    for x, mp in zip(feature_groups, params['mappers']):
        h = x @ mp['w1'] + mp['b1']
        h = jnp.maximum(_ref_ln(h, mp['g1'], mp['be1']), 0.0)
        h = h @ mp['w2'] + mp['b2']
        h = jnp.maximum(_ref_ln(h, mp['g2'], mp['be2']), 0.0)
        mapped.append(h)
    feats = jnp.stack(mapped, 1)
    attn_list = []
    for lp in params['attn']:
        q = feats @ lp['wq'] + lp['bq']
        k = feats @ lp['wk'] + lp['bk']
        v = feats @ lp['wv'] + lp['bv']
        s = jnp.einsum('bqd,bkd->bqk', q, k) / jnp.sqrt(jnp.float32(feats.shape[-1]))
        p = jax.nn.softmax(s, axis=-1)
        att = jnp.einsum('bqk,bkd->bqd', p, v)
        o = att @ lp['wo'] + lp['bo']
        feats = _ref_ln(feats + o, lp['g'], lp['be'])
        attn_list.append(p)
    fused = feats.mean(1)
    hp = params['head']
    h = jnp.maximum(fused @ hp['w1'] + hp['b1'], 0.0)
    h = _ref_ln(h, hp['g'], hp['be'])
    logits = h @ hp['w2'] + hp['b2']
    return fused, logits, attn_list


# ------------------------------------ main --------------------------------------

if __name__ == "__main__":
    B = 8
    input_dims = [160, 128, 128, 192]   # small stand-ins for [1280, 1024, 1024, 1536]
    d_model = 128
    num_classes = 10
    num_layers = 2

    root = jax.random.PRNGKey(0)
    pkey, *xkeys = jax.random.split(root, 1 + len(input_dims))
    params = init_params(pkey, input_dims, d_model, num_classes, num_layers)
    feature_groups = [jax.random.normal(k, (B, d), dtype=jnp.float32)
                      for k, d in zip(xkeys, input_dims)]

    # compute_dtype=jnp.bfloat16 is the v6e/v7x weight-bandwidth option; keep
    # f32 here so the output matches the f32 PyTorch-equivalent reference.
    fused, logits, attn_list = forward(params, feature_groups, num_classes,
                                       compute_dtype=jnp.float32)
    jax.block_until_ready((fused, logits, attn_list))

    fused_r, logits_r, attn_r = forward_ref(params, feature_groups)
    assert jnp.allclose(fused, fused_r, atol=2e-2, rtol=2e-2)
    assert jnp.allclose(logits, logits_r, atol=2e-2, rtol=2e-2)
    for a, ar in zip(attn_list, attn_r):
        assert jnp.allclose(a, ar, atol=2e-2, rtol=2e-2)

    print("KERNEL_OK")
</pallas_src>

<mosaic_0001>
module attributes {stable_mosaic.version = 11 : i64} {
  func.func @fused_forward_kernel(%arg0: memref<8x256xf32, #tpu.memory_space<vmem>>, %arg1: memref<8x128xf32, #tpu.memory_space<vmem>>, %arg2: memref<8x128xf32, #tpu.memory_space<vmem>>, %arg3: memref<8x256xf32, #tpu.memory_space<vmem>>, %arg4: memref<256x128xf32, #tpu.memory_space<vmem>>, %arg5: memref<128x128xf32, #tpu.memory_space<vmem>>, %arg6: memref<128x128xf32, #tpu.memory_space<vmem>>, %arg7: memref<256x128xf32, #tpu.memory_space<vmem>>, %arg8: memref<4x1x128xf32, #tpu.memory_space<vmem>>, %arg9: memref<4x1x128xf32, #tpu.memory_space<vmem>>, %arg10: memref<4x1x128xf32, #tpu.memory_space<vmem>>, %arg11: memref<4x128x128xf32, #tpu.memory_space<vmem>>, %arg12: memref<4x1x128xf32, #tpu.memory_space<vmem>>, %arg13: memref<4x1x128xf32, #tpu.memory_space<vmem>>, %arg14: memref<4x1x128xf32, #tpu.memory_space<vmem>>, %arg15: memref<2x128x384xf32, #tpu.memory_space<vmem>>, %arg16: memref<2x1x384xf32, #tpu.memory_space<vmem>>, %arg17: memref<2x128x128xf32, #tpu.memory_space<vmem>>, %arg18: memref<2x1x128xf32, #tpu.memory_space<vmem>>, %arg19: memref<2x1x128xf32, #tpu.memory_space<vmem>>, %arg20: memref<2x1x128xf32, #tpu.memory_space<vmem>>, %arg21: memref<128x128xf32, #tpu.memory_space<vmem>>, %arg22: memref<1x128xf32, #tpu.memory_space<vmem>>, %arg23: memref<1x128xf32, #tpu.memory_space<vmem>>, %arg24: memref<1x128xf32, #tpu.memory_space<vmem>>, %arg25: memref<128x128xf32, #tpu.memory_space<vmem>>, %arg26: memref<1x128xf32, #tpu.memory_space<vmem>>, %arg27: memref<8x128xf32, #tpu.memory_space<vmem>>, %arg28: memref<8x128xf32, #tpu.memory_space<vmem>>, %arg29: memref<2x32x32xf32, #tpu.memory_space<vmem>>, %arg30: memref<32x128xf32, #tpu.memory_space<vmem>>) attributes {dimension_semantics = [], scalar_prefetch = 0 : i64, scratch_operands = 1 : i64, tpu.core_type = #tpu.core_type<tc>} {
    %c0 = arith.constant 0 : index
    %c0_0 = arith.constant 0 : index
    %0 = vector.load %arg0[%c0, %c0_0] : memref<8x256xf32, #tpu.memory_space<vmem>>, vector<8x256xf32>
    %c0_1 = arith.constant 0 : index
    %c0_2 = arith.constant 0 : index
    %1 = vector.load %arg4[%c0_1, %c0_2] : memref<256x128xf32, #tpu.memory_space<vmem>>, vector<256x128xf32>
    %cst = arith.constant dense<0.000000e+00> : vector<8x128xf32>
    %2 = tpu.matmul %0, %1, %cst {dimension_numbers = #tpu.dot_dimension_numbers<[1], [0], [0], [1], [0, 0, 1, 1], [], []>} : vector<8x256xf32>, vector<256x128xf32>, vector<8x128xf32> -> vector<8x128xf32>
    %c0_3 = arith.constant 0 : index
    %c0_4 = arith.constant 0 : index
    %c0_5 = arith.constant 0 : index
    %3 = vector.load %arg8[%c0_3, %c0_4, %c0_5] : memref<4x1x128xf32, #tpu.memory_space<vmem>>, vector<1x1x128xf32>
    %4 = vector.shape_cast %3 : vector<1x1x128xf32> to vector<1x128xf32>
    %5 = vector.broadcast %4 : vector<1x128xf32> to vector<8x128xf32>
    %6 = arith.addf %2, %5 : vector<8x128xf32>
    %c0_6 = arith.constant 0 : index
    %c0_7 = arith.constant 0 : index
    %c0_8 = arith.constant 0 : index
    %7 = vector.load %arg9[%c0_6, %c0_7, %c0_8] : memref<4x1x128xf32, #tpu.memory_space<vmem>>, vector<1x1x128xf32>
    %8 = vector.shape_cast %7 : vector<1x1x128xf32> to vector<1x128xf32>
    %c0_9 = arith.constant 0 : index
    %c0_10 = arith.constant 0 : index
    %c0_11 = arith.constant 0 : index
    %9 = vector.load %arg10[%c0_9, %c0_10, %c0_11] : memref<4x1x128xf32, #tpu.memory_space<vmem>>, vector<1x1x128xf32>
    %10 = vector.shape_cast %9 : vector<1x1x128xf32> to vector<1x128xf32>
    %cst_12 = arith.constant dense<0.000000e+00> : vector<8xf32>
    %11 = vector.multi_reduction <add>, %6, %cst_12 [1] : vector<8x128xf32> to vector<8xf32>
    %12 = vector.shape_cast %11 : vector<8xf32> to vector<8x1xf32>
    %cst_13 = arith.constant 1.280000e+02 : f32
    %13 = vector.broadcast %cst_13 : f32 to vector<8x1xf32>
    %14 = arith.divf %12, %13 : vector<8x1xf32>
    %15 = arith.mulf %6, %6 : vector<8x128xf32>
    %cst_14 = arith.constant dense<0.000000e+00> : vector<8xf32>
    %16 = vector.multi_reduction <add>, %15, %cst_14 [1] : vector<8x128xf32> to vector<8xf32>
    %17 = vector.shape_cast %16 : vector<8xf32> to vector<8x1xf32>
    %cst_15 = arith.constant 1.280000e+02 : f32
    %18 = vector.broadcast %cst_15 : f32 to vector<8x1xf32>
    %19 = arith.divf %17, %18 : vector<8x1xf32>
    %20 = arith.mulf %14, %14 : vector<8x1xf32>
    %21 = arith.subf %19, %20 : vector<8x1xf32>
    %cst_16 = arith.constant 0.000000e+00 : f32
    %22 = vector.broadcast %cst_16 : f32 to vector<8x1xf32>
    %23 = arith.maximumf %21, %22 : vector<8x1xf32>
    %24 = vector.broadcast %14 : vector<8x1xf32> to vector<8x128xf32>
    %25 = arith.subf %6, %24 : vector<8x128xf32>
    %cst_17 = arith.constant 9.99999974E-6 : f32
    %26 = vector.broadcast %cst_17 : f32 to vector<8x1xf32>
    %27 = arith.addf %23, %26 : vector<8x1xf32>
    %28 = math.rsqrt %27 : vector<8x1xf32>
    %29 = vector.broadcast %28 : vector<8x1xf32> to vector<8x128xf32>
    %30 = arith.mulf %25, %29 : vector<8x128xf32>
    %31 = vector.broadcast %8 : vector<1x128xf32> to vector<8x128xf32>
    %32 = arith.mulf %30, %31 : vector<8x128xf32>
    %33 = vector.broadcast %10 : vector<1x128xf32> to vector<8x128xf32>
    %34 = arith.addf %32, %33 : vector<8x128xf32>
    %cst_18 = arith.constant 0.000000e+00 : f32
    %35 = vector.broadcast %cst_18 : f32 to vector<8x128xf32>
    %36 = arith.maximumf %34, %35 : vector<8x128xf32>
    %c0_19 = arith.constant 0 : index
    %c0_20 = arith.constant 0 : index
    %c0_21 = arith.constant 0 : index
    %37 = vector.load %arg11[%c0_19, %c0_20, %c0_21] : memref<4x128x128xf32, #tpu.memory_space<vmem>>, vector<1x128x128xf32>
    %38 = vector.shape_cast %37 : vector<1x128x128xf32> to vector<128x128xf32>
    %cst_22 = arith.constant dense<0.000000e+00> : vector<8x128xf32>
    %39 = tpu.matmul %36, %38, %cst_22 {dimension_numbers = #tpu.dot_dimension_numbers<[1], [0], [0], [1], [0, 0, 1, 1], [], []>} : vector<8x128xf32>, vector<128x128xf32>, vector<8x128xf32> -> vector<8x128xf32>
    %c0_23 = arith.constant 0 : index
    %c0_24 = arith.constant 0 : index
    %c0_25 = arith.constant 0 : index
    %40 = vector.load %arg12[%c0_23, %c0_24, %c0_25] : memref<4x1x128xf32, #tpu.memory_space<vmem>>, vector<1x1x128xf32>
    %41 = vector.shape_cast %40 : vector<1x1x128xf32> to vector<1x128xf32>
    %42 = vector.broadcast %41 : vector<1x128xf32> to vector<8x128xf32>
    %43 = arith.addf %39, %42 : vector<8x128xf32>
    %c0_26 = arith.constant 0 : index
    %c0_27 = arith.constant 0 : index
    %c0_28 = arith.constant 0 : index
    %44 = vector.load %arg13[%c0_26, %c0_27, %c0_28] : memref<4x1x128xf32, #tpu.memory_space<vmem>>, vector<1x1x128xf32>
    %45 = vector.shape_cast %44 : vector<1x1x128xf32> to vector<1x128xf32>
    %c0_29 = arith.constant 0 : index
    %c0_30 = arith.constant 0 : index
    %c0_31 = arith.constant 0 : index
    %46 = vector.load %arg14[%c0_29, %c0_30, %c0_31] : memref<4x1x128xf32, #tpu.memory_space<vmem>>, vector<1x1x128xf32>
    %47 = vector.shape_cast %46 : vector<1x1x128xf32> to vector<1x128xf32>
    %cst_32 = arith.constant dense<0.000000e+00> : vector<8xf32>
    %48 = vector.multi_reduction <add>, %43, %cst_32 [1] : vector<8x128xf32> to vector<8xf32>
    %49 = vector.shape_cast %48 : vector<8xf32> to vector<8x1xf32>
    %cst_33 = arith.constant 1.280000e+02 : f32
    %50 = vector.broadcast %cst_33 : f32 to vector<8x1xf32>
    %51 = arith.divf %49, %50 : vector<8x1xf32>
    %52 = arith.mulf %43, %43 : vector<8x128xf32>
    %cst_34 = arith.constant dense<0.000000e+00> : vector<8xf32>
    %53 = vector.multi_reduction <add>, %52, %cst_34 [1] : vector<8x128xf32> to vector<8xf32>
    %54 = vector.shape_cast %53 : vector<8xf32> to vector<8x1xf32>
    %cst_35 = arith.constant 1.280000e+02 : f32
    %55 = vector.broadcast %cst_35 : f32 to vector<8x1xf32>
    %56 = arith.divf %54, %55 : vector<8x1xf32>
    %57 = arith.mulf %51, %51 : vector<8x1xf32>
    %58 = arith.subf %56, %57 : vector<8x1xf32>
    %cst_36 = arith.constant 0.000000e+00 : f32
    %59 = vector.broadcast %cst_36 : f32 to vector<8x1xf32>
    %60 = arith.maximumf %58, %59 : vector<8x1xf32>
    %61 = vector.broadcast %51 : vector<8x1xf32> to vector<8x128xf32>
    %62 = arith.subf %43, %61 : vector<8x128xf32>
    %cst_37 = arith.constant 9.99999974E-6 : f32
    %63 = vector.broadcast %cst_37 : f32 to vector<8x1xf32>
    %64 = arith.addf %60, %63 : vector<8x1xf32>
    %65 = math.rsqrt %64 : vector<8x1xf32>
    %66 = vector.broadcast %65 : vector<8x1xf32> to vector<8x128xf32>
    %67 = arith.mulf %62, %66 : vector<8x128xf32>
    %68 = vector.broadcast %45 : vector<1x128xf32> to vector<8x128xf32>
    %69 = arith.mulf %67, %68 : vector<8x128xf32>
    %70 = vector.broadcast %47 : vector<1x128xf32> to vector<8x128xf32>
    %71 = arith.addf %69, %70 : vector<8x128xf32>
    %cst_38 = arith.constant 0.000000e+00 : f32
    %72 = vector.broadcast %cst_38 : f32 to vector<8x128xf32>
    %73 = arith.maximumf %71, %72 : vector<8x128xf32>
    %c0_39 = arith.constant 0 : index
    %c0_40 = arith.constant 0 : index
    %74 = vector.load %arg30[%c0_39, %c0_40] : memref<32x128xf32, #tpu.memory_space<vmem>>, vector<8x128xf32>
    tpu.vector_store %arg30[%c0_39, %c0_40], %73 {strides = array<i32>} : memref<32x128xf32, #tpu.memory_space<vmem>>, vector<8x128xf32>,
    %c0_41 = arith.constant 0 : index
    %c0_42 = arith.constant 0 : index
    %75 = vector.load %arg1[%c0_41, %c0_42] : memref<8x128xf32, #tpu.memory_space<vmem>>, vector<8x128xf32>
    %c0_43 = arith.constant 0 : index
    %c0_44 = arith.constant 0 : index
    %76 = vector.load %arg5[%c0_43, %c0_44] : memref<128x128xf32, #tpu.memory_space<vmem>>, vector<128x128xf32>
    %cst_45 = arith.constant dense<0.000000e+00> : vector<8x128xf32>
    %77 = tpu.matmul %75, %76, %cst_45 {dimension_numbers = #tpu.dot_dimension_numbers<[1], [0], [0], [1], [0, 0, 1, 1], [], []>} : vector<8x128xf32>, vector<128x128xf32>, vector<8x128xf32> -> vector<8x128xf32>
    %c1 = arith.constant 1 : index
    %c0_46 = arith.constant 0 : index
    %c0_47 = arith.constant 0 : index
    %78 = vector.load %arg8[%c1, %c0_46, %c0_47] : memref<4x1x128xf32, #tpu.memory_space<vmem>>, vector<1x1x128xf32>
    %79 = vector.shape_cast %78 : vector<1x1x128xf32> to vector<1x128xf32>
    %80 = vector.broadcast %79 : vector<1x128xf32> to vector<8x128xf32>
    %81 = arith.addf %77, %80 : vector<8x128xf32>
    %c1_48 = arith.constant 1 : index
    %c0_49 = arith.constant 0 : index
    %c0_50 = arith.constant 0 : index
    %82 = vector.load %arg9[%c1_48, %c0_49, %c0_50] : memref<4x1x128xf32, #tpu.memory_space<vmem>>, vector<1x1x128xf32>
    %83 = vector.shape_cast %82 : vector<1x1x128xf32> to vector<1x128xf32>
    %c1_51 = arith.constant 1 : index
    %c0_52 = arith.constant 0 : index
    %c0_53 = arith.constant 0 : index
    %84 = vector.load %arg10[%c1_51, %c0_52, %c0_53] : memref<4x1x128xf32, #tpu.memory_space<vmem>>, vector<1x1x128xf32>
    %85 = vector.shape_cast %84 : vector<1x1x128xf32> to vector<1x128xf32>
    %cst_54 = arith.constant dense<0.000000e+00> : vector<8xf32>
    %86 = vector.multi_reduction <add>, %81, %cst_54 [1] : vector<8x128xf32> to vector<8xf32>
    %87 = vector.shape_cast %86 : vector<8xf32> to vector<8x1xf32>
    %cst_55 = arith.constant 1.280000e+02 : f32
    %88 = vector.broadcast %cst_55 : f32 to vector<8x1xf32>
    %89 = arith.divf %87, %88 : vector<8x1xf32>
    %90 = arith.mulf %81, %81 : vector<8x128xf32>
    %cst_56 = arith.constant dense<0.000000e+00> : vector<8xf32>
    %91 = vector.multi_reduction <add>, %90, %cst_56 [1] : vector<8x128xf32> to vector<8xf32>
    %92 = vector.shape_cast %91 : vector<8xf32> to vector<8x1xf32>
    %cst_57 = arith.constant 1.280000e+02 : f32
    %93 = vector.broadcast %cst_57 : f32 to vector<8x1xf32>
    %94 = arith.divf %92, %93 : vector<8x1xf32>
    %95 = arith.mulf %89, %89 : vector<8x1xf32>
    %96 = arith.subf %94, %95 : vector<8x1xf32>
    %cst_58 = arith.constant 0.000000e+00 : f32
    %97 = vector.broadcast %cst_58 : f32 to vector<8x1xf32>
    %98 = arith.maximumf %96, %97 : vector<8x1xf32>
    %99 = vector.broadcast %89 : vector<8x1xf32> to vector<8x128xf32>
    %100 = arith.subf %81, %99 : vector<8x128xf32>
    %cst_59 = arith.constant 9.99999974E-6 : f32
    %101 = vector.broadcast %cst_59 : f32 to vector<8x1xf32>
    %102 = arith.addf %98, %101 : vector<8x1xf32>
    %103 = math.rsqrt %102 : vector<8x1xf32>
    %104 = vector.broadcast %103 : vector<8x1xf32> to vector<8x128xf32>
    %105 = arith.mulf %100, %104 : vector<8x128xf32>
    %106 = vector.broadcast %83 : vector<1x128xf32> to vector<8x128xf32>
    %107 = arith.mulf %105, %106 : vector<8x128xf32>
    %108 = vector.broadcast %85 : vector<1x128xf32> to vector<8x128xf32>
    %109 = arith.addf %107, %108 : vector<8x128xf32>
    %cst_60 = arith.constant 0.000000e+00 : f32
    %110 = vector.broadcast %cst_60 : f32 to vector<8x128xf32>
    %111 = arith.maximumf %109, %110 : vector<8x128xf32>
    %c1_61 = arith.constant 1 : index
    %c0_62 = arith.constant 0 : index
    %c0_63 = arith.constant 0 : index
    %112 = vector.load %arg11[%c1_61, %c0_62, %c0_63] : memref<4x128x128xf32, #tpu.memory_space<vmem>>, vector<1x128x128xf32>
    %113 = vector.shape_cast %112 : vector<1x128x128xf32> to vector<128x128xf32>
    %cst_64 = arith.constant dense<0.000000e+00> : vector<8x128xf32>
    %114 = tpu.matmul %111, %113, %cst_64 {dimension_numbers = #tpu.dot_dimension_numbers<[1], [0], [0], [1], [0, 0, 1, 1], [], []>} : vector<8x128xf32>, vector<128x128xf32>, vector<8x128xf32> -> vector<8x128xf32>
    %c1_65 = arith.constant 1 : index
    %c0_66 = arith.constant 0 : index
    %c0_67 = arith.constant 0 : index
    %115 = vector.load %arg12[%c1_65, %c0_66, %c0_67] : memref<4x1x128xf32, #tpu.memory_space<vmem>>, vector<1x1x128xf32>
    %116 = vector.shape_cast %115 : vector<1x1x128xf32> to vector<1x128xf32>
    %117 = vector.broadcast %116 : vector<1x128xf32> to vector<8x128xf32>
    %118 = arith.addf %114, %117 : vector<8x128xf32>
    %c1_68 = arith.constant 1 : index
    %c0_69 = arith.constant 0 : index
    %c0_70 = arith.constant 0 : index
    %119 = vector.load %arg13[%c1_68, %c0_69, %c0_70] : memref<4x1x128xf32, #tpu.memory_space<vmem>>, vector<1x1x128xf32>
    %120 = vector.shape_cast %119 : vector<1x1x128xf32> to vector<1x128xf32>
    %c1_71 = arith.constant 1 : index
    %c0_72 = arith.constant 0 : index
    %c0_73 = arith.constant 0 : index
    %121 = vector.load %arg14[%c1_71, %c0_72, %c0_73] : memref<4x1x128xf32, #tpu.memory_space<vmem>>, vector<1x1x128xf32>
    %122 = vector.shape_cast %121 : vector<1x1x128xf32> to vector<1x128xf32>
    %cst_74 = arith.constant dense<0.000000e+00> : vector<8xf32>
    %123 = vector.multi_reduction <add>, %118, %cst_74 [1] : vector<8x128xf32> to vector<8xf32>
    %124 = vector.shape_cast %123 : vector<8xf32> to vector<8x1xf32>
    %cst_75 = arith.constant 1.280000e+02 : f32
    %125 = vector.broadcast %cst_75 : f32 to vector<8x1xf32>
    %126 = arith.divf %124, %125 : vector<8x1xf32>
    %127 = arith.mulf %118, %118 : vector<8x128xf32>
    %cst_76 = arith.constant dense<0.000000e+00> : vector<8xf32>
    %128 = vector.multi_reduction <add>, %127, %cst_76 [1] : vector<8x128xf32> to vector<8xf32>
    %129 = vector.shape_cast %128 : vector<8xf32> to vector<8x1xf32>
    %cst_77 = arith.constant 1.280000e+02 : f32
    %130 = vector.broadcast %cst_77 : f32 to vector<8x1xf32>
    %131 = arith.divf %129, %130 : vector<8x1xf32>
    %132 = arith.mulf %126, %126 : vector<8x1xf32>
    %133 = arith.subf %131, %132 : vector<8x1xf32>
    %cst_78 = arith.constant 0.000000e+00 : f32
    %134 = vector.broadcast %cst_78 : f32 to vector<8x1xf32>
    %135 = arith.maximumf %133, %134 : vector<8x1xf32>
    %136 = vector.broadcast %126 : vector<8x1xf32> to vector<8x128xf32>
    %137 = arith.subf %118, %136 : vector<8x128xf32>
    %cst_79 = arith.constant 9.99999974E-6 : f32
    %138 = vector.broadcast %cst_79 : f32 to vector<8x1xf32>
    %139 = arith.addf %135, %138 : vector<8x1xf32>
    %140 = math.rsqrt %139 : vector<8x1xf32>
    %141 = vector.broadcast %140 : vector<8x1xf32> to vector<8x128xf32>
    %142 = arith.mulf %137, %141 : vector<8x128xf32>
    %143 = vector.broadcast %120 : vector<1x128xf32> to vector<8x128xf32>
    %144 = arith.mulf %142, %143 : vector<8x128xf32>
    %145 = vector.broadcast %122 : vector<1x128xf32> to vector<8x128xf32>
    %146 = arith.addf %144, %145 : vector<8x128xf32>
    %cst_80 = arith.constant 0.000000e+00 : f32
    %147 = vector.broadcast %cst_80 : f32 to vector<8x128xf32>
    %148 = arith.maximumf %146, %147 : vector<8x128xf32>
    %c8 = arith.constant 8 : index
    %c0_81 = arith.constant 0 : index
    %149 = vector.load %arg30[%c8, %c0_81] : memref<32x128xf32, #tpu.memory_space<vmem>>, vector<8x128xf32>
    tpu.vector_store %arg30[%c8, %c0_81], %148 {strides = array<i32>} : memref<32x128xf32, #tpu.memory_space<vmem>>, vector<8x128xf32>,
    %c0_82 = arith.constant 0 : index
    %c0_83 = arith.constant 0 : index
    %150 = vector.load %arg2[%c0_82, %c0_83] : memref<8x128xf32, #tpu.memory_space<vmem>>, vector<8x128xf32>
    %c0_84 = arith.constant 0 : index
    %c0_85 = arith.constant 0 : index
    %151 = vector.load %arg6[%c0_84, %c0_85] : memref<128x128xf32, #tpu.memory_space<vmem>>, vector<128x128xf32>
    %cst_86 = arith.constant dense<0.000000e+00> : vector<8x128xf32>
    %152 = tpu.matmul %150, %151, %cst_86 {dimension_numbers = #tpu.dot_dimension_numbers<[1], [0], [0], [1], [0, 0, 1, 1], [], []>} : vector<8x128xf32>, vector<128x128xf32>, vector<8x128xf32> -> vector<8x128xf32>
    %c2 = arith.constant 2 : index
    %c0_87 = arith.constant 0 : index
    %c0_88 = arith.constant 0 : index
    %153 = vector.load %arg8[%c2, %c0_87, %c0_88] : memref<4x1x128xf32, #tpu.memory_space<vmem>>, vector<1x1x128xf32>
    %154 = vector.shape_cast %153 : vector<1x1x128xf32> to vector<1x128xf32>
    %155 = vector.broadcast %154 : vector<1x128xf32> to vector<8x128xf32>
    %156 = arith.addf %152, %155 : vector<8x128xf32>
    %c2_89 = arith.constant 2 : index
    %c0_90 = arith.constant 0 : index
    %c0_91 = arith.constant 0 : index
    %157 = vector.load %arg9[%c2_89, %c0_90, %c0_91] : memref<4x1x128xf32, #tpu.memory_space<vmem>>, vector<1x1x128xf32>
    %158 = vector.shape_cast %157 : vector<1x1x128xf32> to vector<1x128xf32>
    %c2_92 = arith.constant 2 : index
    %c0_93 = arith.constant 0 : index
    %c0_94 = arith.constant 0 : index
    %159 = vector.load %arg10[%c2_92, %c0_93, %c0_94] : memref<4x1x128xf32, #tpu.memory_space<vmem>>, vector<1x1x128xf32>
    %160 = vector.shape_cast %159 : vector<1x1x128xf32> to vector<1x128xf32>
    %cst_95 = arith.constant dense<0.000000e+00> : vector<8xf32>
    %161 = vector.multi_reduction <add>, %156, %cst_95 [1] : vector<8x128xf32> to vector<8xf32>
    %162 = vector.shape_cast %161 : vector<8xf32> to vector<8x1xf32>
    %cst_96 = arith.constant 1.280000e+02 : f32
    %163 = vector.broadcast %cst_96 : f32 to vector<8x1xf32>
    %164 = arith.divf %162, %163 : vector<8x1xf32>
    %165 = arith.mulf %156, %156 : vector<8x128xf32>
    %cst_97 = arith.constant dense<0.000000e+00> : vector<8xf32>
    %166 = vector.multi_reduction <add>, %165, %cst_97 [1] : vector<8x128xf32> to vector<8xf32>
    %167 = vector.shape_cast %166 : vector<8xf32> to vector<8x1xf32>
    %cst_98 = arith.constant 1.280000e+02 : f32
    %168 = vector.broadcast %cst_98 : f32 to vector<8x1xf32>
    %169 = arith.divf %167, %168 : vector<8x1xf32>
    %170 = arith.mulf %164, %164 : vector<8x1xf32>
    %171 = arith.subf %169, %170 : vector<8x1xf32>
    %cst_99 = arith.constant 0.000000e+00 : f32
    %172 = vector.broadcast %cst_99 : f32 to vector<8x1xf32>
    %173 = arith.maximumf %171, %172 : vector<8x1xf32>
    %174 = vector.broadcast %164 : vector<8x1xf32> to vector<8x128xf32>
    %175 = arith.subf %156, %174 : vector<8x128xf32>
    %cst_100 = arith.constant 9.99999974E-6 : f32
    %176 = vector.broadcast %cst_100 : f32 to vector<8x1xf32>
    %177 = arith.addf %173, %176 : vector<8x1xf32>
    %178 = math.rsqrt %177 : vector<8x1xf32>
    %179 = vector.broadcast %178 : vector<8x1xf32> to vector<8x128xf32>
    %180 = arith.mulf %175, %179 : vector<8x128xf32>
    %181 = vector.broadcast %158 : vector<1x128xf32> to vector<8x128xf32>
    %182 = arith.mulf %180, %181 : vector<8x128xf32>
    %183 = vector.broadcast %160 : vector<1x128xf32> to vector<8x128xf32>
    %184 = arith.addf %182, %183 : vector<8x128xf32>
    %cst_101 = arith.constant 0.000000e+00 : f32
    %185 = vector.broadcast %cst_101 : f32 to vector<8x128xf32>
    %186 = arith.maximumf %184, %185 : vector<8x128xf32>
    %c2_102 = arith.constant 2 : index
    %c0_103 = arith.constant 0 : index
    %c0_104 = arith.constant 0 : index
    %187 = vector.load %arg11[%c2_102, %c0_103, %c0_104] : memref<4x128x128xf32, #tpu.memory_space<vmem>>, vector<1x128x128xf32>
    %188 = vector.shape_cast %187 : vector<1x128x128xf32> to vector<128x128xf32>
    %cst_105 = arith.constant dense<0.000000e+00> : vector<8x128xf32>
    %189 = tpu.matmul %186, %188, %cst_105 {dimension_numbers = #tpu.dot_dimension_numbers<[1], [0], [0], [1], [0, 0, 1, 1], [], []>} : vector<8x128xf32>, vector<128x128xf32>, vector<8x128xf32> -> vector<8x128xf32>
    %c2_106 = arith.constant 2 : index
    %c0_107 = arith.constant 0 : index
    %c0_108 = arith.constant 0 : index
    %190 = vector.load %arg12[%c2_106, %c0_107, %c0_108] : memref<4x1x128xf32, #tpu.memory_space<vmem>>, vector<1x1x128xf32>
    %191 = vector.shape_cast %190 : vector<1x1x128xf32> to vector<1x128xf32>
    %192 = vector.broadcast %191 : vector<1x128xf32> to vector<8x128xf32>
    %193 = arith.addf %189, %192 : vector<8x128xf32>
    %c2_109 = arith.constant 2 : index
    %c0_110 = arith.constant 0 : index
    %c0_111 = arith.constant 0 : index
    %194 = vector.load %arg13[%c2_109, %c0_110, %c0_111] : memref<4x1x128xf32, #tpu.memory_space<vmem>>, vector<1x1x128xf32>
    %195 = vector.shape_cast %194 : vector<1x1x128xf32> to vector<1x128xf32>
    %c2_112 = arith.constant 2 : index
    %c0_113 = arith.constant 0 : index
    %c0_114 = arith.constant 0 : index
    %196 = vector.load %arg14[%c2_112, %c0_113, %c0_114] : memref<4x1x128xf32, #tpu.memory_space<vmem>>, vector<1x1x128xf32>
    %197 = vector.shape_cast %196 : vector<1x1x128xf32> to vector<1x128xf32>
    %cst_115 = arith.constant dense<0.000000e+00> : vector<8xf32>
    %198 = vector.multi_reduction <add>, %193, %cst_115 [1] : vector<8x128xf32> to vector<8xf32>
    %199 = vector.shape_cast %198 : vector<8xf32> to vector<8x1xf32>
    %cst_116 = arith.constant 1.280000e+02 : f32
    %200 = vector.broadcast %cst_116 : f32 to vector<8x1xf32>
    %201 = arith.divf %199, %200 : vector<8x1xf32>
    %202 = arith.mulf %193, %193 : vector<8x128xf32>
    %cst_117 = arith.constant dense<0.000000e+00> : vector<8xf32>
    %203 = vector.multi_reduction <add>, %202, %cst_117 [1] : vector<8x128xf32> to vector<8xf32>
    %204 = vector.shape_cast %203 : vector<8xf32> to vector<8x1xf32>
    %cst_118 = arith.constant 1.280000e+02 : f32
    %205 = vector.broadcast %cst_118 : f32 to vector<8x1xf32>
    %206 = arith.divf %204, %205 : vector<8x1xf32>
    %207 = arith.mulf %201, %201 : vector<8x1xf32>
    %208 = arith.subf %206, %207 : vector<8x1xf32>
    %cst_119 = arith.constant 0.000000e+00 : f32
    %209 = vector.broadcast %cst_119 : f32 to vector<8x1xf32>
    %210 = arith.maximumf %208, %209 : vector<8x1xf32>
    %211 = vector.broadcast %201 : vector<8x1xf32> to vector<8x128xf32>
    %212 = arith.subf %193, %211 : vector<8x128xf32>
    %cst_120 = arith.constant 9.99999974E-6 : f32
    %213 = vector.broadcast %cst_120 : f32 to vector<8x1xf32>
    %214 = arith.addf %210, %213 : vector<8x1xf32>
    %215 = math.rsqrt %214 : vector<8x1xf32>
    %216 = vector.broadcast %215 : vector<8x1xf32> to vector<8x128xf32>
    %217 = arith.mulf %212, %216 : vector<8x128xf32>
    %218 = vector.broadcast %195 : vector<1x128xf32> to vector<8x128xf32>
    %219 = arith.mulf %217, %218 : vector<8x128xf32>
    %220 = vector.broadcast %197 : vector<1x128xf32> to vector<8x128xf32>
    %221 = arith.addf %219, %220 : vector<8x128xf32>
    %cst_121 = arith.constant 0.000000e+00 : f32
    %222 = vector.broadcast %cst_121 : f32 to vector<8x128xf32>
    %223 = arith.maximumf %221, %222 : vector<8x128xf32>
    %c16 = arith.constant 16 : index
    %c0_122 = arith.constant 0 : index
    %224 = vector.load %arg30[%c16, %c0_122] : memref<32x128xf32, #tpu.memory_space<vmem>>, vector<8x128xf32>
    tpu.vector_store %arg30[%c16, %c0_122], %223 {strides = array<i32>} : memref<32x128xf32, #tpu.memory_space<vmem>>, vector<8x128xf32>,
    %c0_123 = arith.constant 0 : index
    %c0_124 = arith.constant 0 : index
    %225 = vector.load %arg3[%c0_123, %c0_124] : memref<8x256xf32, #tpu.memory_space<vmem>>, vector<8x256xf32>
    %c0_125 = arith.constant 0 : index
    %c0_126 = arith.constant 0 : index
    %226 = vector.load %arg7[%c0_125, %c0_126] : memref<256x128xf32, #tpu.memory_space<vmem>>, vector<256x128xf32>
    %cst_127 = arith.constant dense<0.000000e+00> : vector<8x128xf32>
    %227 = tpu.matmul %225, %226, %cst_127 {dimension_numbers = #tpu.dot_dimension_numbers<[1], [0], [0], [1], [0, 0, 1, 1], [], []>} : vector<8x256xf32>, vector<256x128xf32>, vector<8x128xf32> -> vector<8x128xf32>
    %c3 = arith.constant 3 : index
    %c0_128 = arith.constant 0 : index
    %c0_129 = arith.constant 0 : index
    %228 = vector.load %arg8[%c3, %c0_128, %c0_129] : memref<4x1x128xf32, #tpu.memory_space<vmem>>, vector<1x1x128xf32>
    %229 = vector.shape_cast %228 : vector<1x1x128xf32> to vector<1x128xf32>
    %230 = vector.broadcast %229 : vector<1x128xf32> to vector<8x128xf32>
    %231 = arith.addf %227, %230 : vector<8x128xf32>
    %c3_130 = arith.constant 3 : index
    %c0_131 = arith.constant 0 : index
    %c0_132 = arith.constant 0 : index
    %232 = vector.load %arg9[%c3_130, %c0_131, %c0_132] : memref<4x1x128xf32, #tpu.memory_space<vmem>>, vector<1x1x128xf32>
    %233 = vector.shape_cast %232 : vector<1x1x128xf32> to vector<1x128xf32>
    %c3_133 = arith.constant 3 : index
    %c0_134 = arith.constant 0 : index
    %c0_135 = arith.constant 0 : index
    %234 = vector.load %arg10[%c3_133, %c0_134, %c0_135] : memref<4x1x128xf32, #tpu.memory_space<vmem>>, vector<1x1x128xf32>
    %235 = vector.shape_cast %234 : vector<1x1x128xf32> to vector<1x128xf32>
    %cst_136 = arith.constant dense<0.000000e+00> : vector<8xf32>
    %236 = vector.multi_reduction <add>, %231, %cst_136 [1] : vector<8x128xf32> to vector<8xf32>
    %237 = vector.shape_cast %236 : vector<8xf32> to vector<8x1xf32>
    %cst_137 = arith.constant 1.280000e+02 : f32
    %238 = vector.broadcast %cst_137 : f32 to vector<8x1xf32>
    %239 = arith.divf %237, %238 : vector<8x1xf32>
    %240 = arith.mulf %231, %231 : vector<8x128xf32>
    %cst_138 = arith.constant dense<0.000000e+00> : vector<8xf32>
    %241 = vector.multi_reduction <add>, %240, %cst_138 [1] : vector<8x128xf32> to vector<8xf32>
    %242 = vector.shape_cast %241 : vector<8xf32> to vector<8x1xf32>
    %cst_139 = arith.constant 1.280000e+02 : f32
    %243 = vector.broadcast %cst_139 : f32 to vector<8x1xf32>
    %244 = arith.divf %242, %243 : vector<8x1xf32>
    %245 = arith.mulf %239, %239 : vector<8x1xf32>
    %246 = arith.subf %244, %245 : vector<8x1xf32>
    %cst_140 = arith.constant 0.000000e+00 : f32
    %247 = vector.broadcast %cst_140 : f32 to vector<8x1xf32>
    %248 = arith.maximumf %246, %247 : vector<8x1xf32>
    %249 = vector.broadcast %239 : vector<8x1xf32> to vector<8x128xf32>
    %250 = arith.subf %231, %249 : vector<8x128xf32>
    %cst_141 = arith.constant 9.99999974E-6 : f32
    %251 = vector.broadcast %cst_141 : f32 to vector<8x1xf32>
    %252 = arith.addf %248, %251 : vector<8x1xf32>
    %253 = math.rsqrt %252 : vector<8x1xf32>
    %254 = vector.broadcast %253 : vector<8x1xf32> to vector<8x128xf32>
    %255 = arith.mulf %250, %254 : vector<8x128xf32>
    %256 = vector.broadcast %233 : vector<1x128xf32> to vector<8x128xf32>
    %257 = arith.mulf %255, %256 : vector<8x128xf32>
    %258 = vector.broadcast %235 : vector<1x128xf32> to vector<8x128xf32>
    %259 = arith.addf %257, %258 : vector<8x128xf32>
    %cst_142 = arith.constant 0.000000e+00 : f32
    %260 = vector.broadcast %cst_142 : f32 to vector<8x128xf32>
    %261 = arith.maximumf %259, %260 : vector<8x128xf32>
    %c3_143 = arith.constant 3 : index
    %c0_144 = arith.constant 0 : index
    %c0_145 = arith.constant 0 : index
    %262 = vector.load %arg11[%c3_143, %c0_144, %c0_145] : memref<4x128x128xf32, #tpu.memory_space<vmem>>, vector<1x128x128xf32>
    %263 = vector.shape_cast %262 : vector<1x128x128xf32> to vector<128x128xf32>
    %cst_146 = arith.constant dense<0.000000e+00> : vector<8x128xf32>
    %264 = tpu.matmul %261, %263, %cst_146 {dimension_numbers = #tpu.dot_dimension_numbers<[1], [0], [0], [1], [0, 0, 1, 1], [], []>} : vector<8x128xf32>, vector<128x128xf32>, vector<8x128xf32> -> vector<8x128xf32>
    %c3_147 = arith.constant 3 : index
    %c0_148 = arith.constant 0 : index
    %c0_149 = arith.constant 0 : index
    %265 = vector.load %arg12[%c3_147, %c0_148, %c0_149] : memref<4x1x128xf32, #tpu.memory_space<vmem>>, vector<1x1x128xf32>
    %266 = vector.shape_cast %265 : vector<1x1x128xf32> to vector<1x128xf32>
    %267 = vector.broadcast %266 : vector<1x128xf32> to vector<8x128xf32>
    %268 = arith.addf %264, %267 : vector<8x128xf32>
    %c3_150 = arith.constant 3 : index
    %c0_151 = arith.constant 0 : index
    %c0_152 = arith.constant 0 : index
    %269 = vector.load %arg13[%c3_150, %c0_151, %c0_152] : memref<4x1x128xf32, #tpu.memory_space<vmem>>, vector<1x1x128xf32>
    %270 = vector.shape_cast %269 : vector<1x1x128xf32> to vector<1x128xf32>
    %c3_153 = arith.constant 3 : index
    %c0_154 = arith.constant 0 : index
    %c0_155 = arith.constant 0 : index
    %271 = vector.load %arg14[%c3_153, %c0_154, %c0_155] : memref<4x1x128xf32, #tpu.memory_space<vmem>>, vector<1x1x128xf32>
    %272 = vector.shape_cast %271 : vector<1x1x128xf32> to vector<1x128xf32>
    %cst_156 = arith.constant dense<0.000000e+00> : vector<8xf32>
    %273 = vector.multi_reduction <add>, %268, %cst_156 [1] : vector<8x128xf32> to vector<8xf32>
    %274 = vector.shape_cast %273 : vector<8xf32> to vector<8x1xf32>
    %cst_157 = arith.constant 1.280000e+02 : f32
    %275 = vector.broadcast %cst_157 : f32 to vector<8x1xf32>
    %276 = arith.divf %274, %275 : vector<8x1xf32>
    %277 = arith.mulf %268, %268 : vector<8x128xf32>
    %cst_158 = arith.constant dense<0.000000e+00> : vector<8xf32>
    %278 = vector.multi_reduction <add>, %277, %cst_158 [1] : vector<8x128xf32> to vector<8xf32>
    %279 = vector.shape_cast %278 : vector<8xf32> to vector<8x1xf32>
    %cst_159 = arith.constant 1.280000e+02 : f32
    %280 = vector.broadcast %cst_159 : f32 to vector<8x1xf32>
    %281 = arith.divf %279, %280 : vector<8x1xf32>
    %282 = arith.mulf %276, %276 : vector<8x1xf32>
    %283 = arith.subf %281, %282 : vector<8x1xf32>
    %cst_160 = arith.constant 0.000000e+00 : f32
    %284 = vector.broadcast %cst_160 : f32 to vector<8x1xf32>
    %285 = arith.maximumf %283, %284 : vector<8x1xf32>
    %286 = vector.broadcast %276 : vector<8x1xf32> to vector<8x128xf32>
    %287 = arith.subf %268, %286 : vector<8x128xf32>
    %cst_161 = arith.constant 9.99999974E-6 : f32
    %288 = vector.broadcast %cst_161 : f32 to vector<8x1xf32>
    %289 = arith.addf %285, %288 : vector<8x1xf32>
    %290 = math.rsqrt %289 : vector<8x1xf32>
    %291 = vector.broadcast %290 : vector<8x1xf32> to vector<8x128xf32>
    %292 = arith.mulf %287, %291 : vector<8x128xf32>
    %293 = vector.broadcast %270 : vector<1x128xf32> to vector<8x128xf32>
    %294 = arith.mulf %292, %293 : vector<8x128xf32>
    %295 = vector.broadcast %272 : vector<1x128xf32> to vector<8x128xf32>
    %296 = arith.addf %294, %295 : vector<8x128xf32>
    %cst_162 = arith.constant 0.000000e+00 : f32
    %297 = vector.broadcast %cst_162 : f32 to vector<8x128xf32>
    %298 = arith.maximumf %296, %297 : vector<8x128xf32>
    %c24 = arith.constant 24 : index
    %c0_163 = arith.constant 0 : index
    %299 = vector.load %arg30[%c24, %c0_163] : memref<32x128xf32, #tpu.memory_space<vmem>>, vector<8x128xf32>
    tpu.vector_store %arg30[%c24, %c0_163], %298 {strides = array<i32>} : memref<32x128xf32, #tpu.memory_space<vmem>>, vector<8x128xf32>,
    %c0_164 = arith.constant 0 : index
    %c0_165 = arith.constant 0 : index
    %300 = vector.load %arg30[%c0_164, %c0_165] : memref<32x128xf32, #tpu.memory_space<vmem>>, vector<32x128xf32>
    %301 = tpu.iota {dimensions = array<i32: 0>} : vector<32x32xi32>
    %c8_i32 = arith.constant 8 : i32
    %c0_i32 = arith.constant 0 : i32
    %302 = arith.cmpi eq, %c8_i32, %c0_i32 : i32
    %c1_i32 = arith.constant 1 : i32
    %303 = arith.select %302, %c1_i32, %c8_i32 : i32
    %304 = vector.broadcast %303 : i32 to vector<32x32xi32>
    %305 = arith.remsi %301, %304 : vector<32x32xi32>
    %c0_i32_166 = arith.constant 0 : i32
    %306 = vector.broadcast %c0_i32_166 : i32 to vector<32x32xi32>
    %307 = arith.cmpi ne, %305, %306 : vector<32x32xi32>
    %c0_i32_167 = arith.constant 0 : i32
    %308 = vector.broadcast %c0_i32_167 : i32 to vector<32x32xi32>
    %309 = arith.cmpi slt, %305, %308 : vector<32x32xi32>
    %c0_i32_168 = arith.constant 0 : i32
    %310 = arith.cmpi slt, %303, %c0_i32_168 : i32
    %311 = vector.broadcast %310 : i1 to vector<32x32xi1>
    %312 = vector.broadcast %311 : vector<32x32xi1> to vector<32x32xi1>
    %313 = arith.xori %309, %312 : vector<32x32xi1>
    %314 = arith.andi %313, %307 : vector<32x32xi1>
    %315 = vector.broadcast %303 : i32 to vector<32x32xi32>
    %316 = arith.addi %305, %315 : vector<32x32xi32>
    %317 = arith.select %314, %316, %305 : vector<32x32xi1>, vector<32x32xi32>
    %318 = tpu.iota {dimensions = array<i32: 1>} : vector<32x32xi32>
    %c8_i32_169 = arith.constant 8 : i32
    %c0_i32_170 = arith.constant 0 : i32
    %319 = arith.cmpi eq, %c8_i32_169, %c0_i32_170 : i32
    %c1_i32_171 = arith.constant 1 : i32
    %320 = arith.select %319, %c1_i32_171, %c8_i32_169 : i32
    %321 = vector.broadcast %320 : i32 to vector<32x32xi32>
    %322 = arith.remsi %318, %321 : vector<32x32xi32>
    %c0_i32_172 = arith.constant 0 : i32
    %323 = vector.broadcast %c0_i32_172 : i32 to vector<32x32xi32>
    %324 = arith.cmpi ne, %322, %323 : vector<32x32xi32>
    %c0_i32_173 = arith.constant 0 : i32
    %325 = vector.broadcast %c0_i32_173 : i32 to vector<32x32xi32>
    %326 = arith.cmpi slt, %322, %325 : vector<32x32xi32>
    %c0_i32_174 = arith.constant 0 : i32
    %327 = arith.cmpi slt, %320, %c0_i32_174 : i32
    %328 = vector.broadcast %327 : i1 to vector<32x32xi1>
    %329 = vector.broadcast %328 : vector<32x32xi1> to vector<32x32xi1>
    %330 = arith.xori %326, %329 : vector<32x32xi1>
    %331 = arith.andi %330, %324 : vector<32x32xi1>
    %332 = vector.broadcast %320 : i32 to vector<32x32xi32>
    %333 = arith.addi %322, %332 : vector<32x32xi32>
    %334 = arith.select %331, %333, %322 : vector<32x32xi1>, vector<32x32xi32>
    %335 = arith.cmpi eq, %317, %334 : vector<32x32xi32>
    %c0_175 = arith.constant 0 : index
    %c0_176 = arith.constant 0 : index
    %c0_177 = arith.constant 0 : index
    %336 = vector.load %arg15[%c0_175, %c0_176, %c0_177] : memref<2x128x384xf32, #tpu.memory_space<vmem>>, vector<1x128x384xf32>
    %337 = vector.shape_cast %336 : vector<1x128x384xf32> to vector<128x384xf32>
    %cst_178 = arith.constant dense<0.000000e+00> : vector<32x384xf32>
    %338 = tpu.matmul %300, %337, %cst_178 {dimension_numbers = #tpu.dot_dimension_numbers<[1], [0], [0], [1], [0, 0, 1, 1], [], []>} : vector<32x128xf32>, vector<128x384xf32>, vector<32x384xf32> -> vector<32x384xf32>
    %c0_179 = arith.constant 0 : index
    %c0_180 = arith.constant 0 : index
    %c0_181 = arith.constant 0 : index
    %339 = vector.load %arg16[%c0_179, %c0_180, %c0_181] : memref<2x1x384xf32, #tpu.memory_space<vmem>>, vector<1x1x384xf32>
    %340 = vector.shape_cast %339 : vector<1x1x384xf32> to vector<1x384xf32>
    %341 = vector.broadcast %340 : vector<1x384xf32> to vector<32x384xf32>
    %342 = arith.addf %338, %341 : vector<32x384xf32>
    %343 = vector.extract_strided_slice %342 {offsets = [0, 0], sizes = [32, 128], strides = [1, 1]} : vector<32x384xf32> to vector<32x128xf32>
    %344 = vector.extract_strided_slice %342 {offsets = [0, 128], sizes = [32, 128], strides = [1, 1]} : vector<32x384xf32> to vector<32x128xf32>
    %345 = vector.extract_strided_slice %342 {offsets = [0, 256], sizes = [32, 128], strides = [1, 1]} : vector<32x384xf32> to vector<32x128xf32>
    %cst_182 = arith.constant dense<0.000000e+00> : vector<32x32xf32>
    %346 = tpu.matmul %343, %344, %cst_182 {dimension_numbers = #tpu.dot_dimension_numbers<[1], [1], [0], [0], [0, 0, 1, 0], [], []>} : vector<32x128xf32>, vector<32x128xf32>, vector<32x32xf32> -> vector<32x32xf32>
    %cst_183 = arith.constant 0.0883883461 : f32
    %347 = vector.broadcast %cst_183 : f32 to vector<32x32xf32>
    %348 = arith.mulf %346, %347 : vector<32x32xf32>
    %cst_184 = arith.constant -1.000000e+30 : f32
    %349 = vector.broadcast %cst_184 : f32 to vector<32x32xf32>
    %350 = arith.select %335, %348, %349 : vector<32x32xi1>, vector<32x32xf32>
    %cst_185 = arith.constant dense<0xFF800000> : vector<32xf32>
    %351 = vector.multi_reduction <maximumf>, %350, %cst_185 [1] : vector<32x32xf32> to vector<32xf32>
    %352 = vector.shape_cast %351 : vector<32xf32> to vector<32x1xf32>
    %353 = vector.broadcast %352 : vector<32x1xf32> to vector<32x32xf32>
    %354 = arith.subf %350, %353 : vector<32x32xf32>
    %355 = math.exp %354 : vector<32x32xf32>
    %cst_186 = arith.constant 0.000000e+00 : f32
    %356 = vector.broadcast %cst_186 : f32 to vector<32x32xf32>
    %357 = arith.select %335, %355, %356 : vector<32x32xi1>, vector<32x32xf32>
    %cst_187 = arith.constant dense<0.000000e+00> : vector<32xf32>
    %358 = vector.multi_reduction <add>, %357, %cst_187 [1] : vector<32x32xf32> to vector<32xf32>
    %359 = vector.shape_cast %358 : vector<32xf32> to vector<32x1xf32>
    %360 = tpu.reciprocal %359 {approx = true} : vector<32x1xf32> -> vector<32x1xf32>
    %361 = vector.broadcast %360 : vector<32x1xf32> to vector<32x32xf32>
    %362 = arith.mulf %357, %361 : vector<32x32xf32>
    %cst_188 = arith.constant dense<0.000000e+00> : vector<32x128xf32>
    %363 = tpu.matmul %362, %345, %cst_188 {dimension_numbers = #tpu.dot_dimension_numbers<[1], [0], [0], [1], [0, 0, 1, 1], [], []>} : vector<32x32xf32>, vector<32x128xf32>, vector<32x128xf32> -> vector<32x128xf32>
    %c0_189 = arith.constant 0 : index
    %c0_190 = arith.constant 0 : index
    %c0_191 = arith.constant 0 : index
    %364 = vector.load %arg17[%c0_189, %c0_190, %c0_191] : memref<2x128x128xf32, #tpu.memory_space<vmem>>, vector<1x128x128xf32>
    %365 = vector.shape_cast %364 : vector<1x128x128xf32> to vector<128x128xf32>
    %cst_192 = arith.constant dense<0.000000e+00> : vector<32x128xf32>
    %366 = tpu.matmul %363, %365, %cst_192 {dimension_numbers = #tpu.dot_dimension_numbers<[1], [0], [0], [1], [0, 0, 1, 1], [], []>} : vector<32x128xf32>, vector<128x128xf32>, vector<32x128xf32> -> vector<32x128xf32>
    %c0_193 = arith.constant 0 : index
    %c0_194 = arith.constant 0 : index
    %c0_195 = arith.constant 0 : index
    %367 = vector.load %arg18[%c0_193, %c0_194, %c0_195] : memref<2x1x128xf32, #tpu.memory_space<vmem>>, vector<1x1x128xf32>
    %368 = vector.shape_cast %367 : vector<1x1x128xf32> to vector<1x128xf32>
    %369 = vector.broadcast %368 : vector<1x128xf32> to vector<32x128xf32>
    %370 = arith.addf %366, %369 : vector<32x128xf32>
    %371 = arith.addf %300, %370 : vector<32x128xf32>
    %c0_196 = arith.constant 0 : index
    %c0_197 = arith.constant 0 : index
    %c0_198 = arith.constant 0 : index
    %372 = vector.load %arg19[%c0_196, %c0_197, %c0_198] : memref<2x1x128xf32, #tpu.memory_space<vmem>>, vector<1x1x128xf32>
    %373 = vector.shape_cast %372 : vector<1x1x128xf32> to vector<1x128xf32>
    %c0_199 = arith.constant 0 : index
    %c0_200 = arith.constant 0 : index
    %c0_201 = arith.constant 0 : index
    %374 = vector.load %arg20[%c0_199, %c0_200, %c0_201] : memref<2x1x128xf32, #tpu.memory_space<vmem>>, vector<1x1x128xf32>
    %375 = vector.shape_cast %374 : vector<1x1x128xf32> to vector<1x128xf32>
    %cst_202 = arith.constant dense<0.000000e+00> : vector<32xf32>
    %376 = vector.multi_reduction <add>, %371, %cst_202 [1] : vector<32x128xf32> to vector<32xf32>
    %377 = vector.shape_cast %376 : vector<32xf32> to vector<32x1xf32>
    %cst_203 = arith.constant 1.280000e+02 : f32
    %378 = vector.broadcast %cst_203 : f32 to vector<32x1xf32>
    %379 = arith.divf %377, %378 : vector<32x1xf32>
    %380 = arith.mulf %371, %371 : vector<32x128xf32>
    %cst_204 = arith.constant dense<0.000000e+00> : vector<32xf32>
    %381 = vector.multi_reduction <add>, %380, %cst_204 [1] : vector<32x128xf32> to vector<32xf32>
    %382 = vector.shape_cast %381 : vector<32xf32> to vector<32x1xf32>
    %cst_205 = arith.constant 1.280000e+02 : f32
    %383 = vector.broadcast %cst_205 : f32 to vector<32x1xf32>
    %384 = arith.divf %382, %383 : vector<32x1xf32>
    %385 = arith.mulf %379, %379 : vector<32x1xf32>
    %386 = arith.subf %384, %385 : vector<32x1xf32>
    %cst_206 = arith.constant 0.000000e+00 : f32
    %387 = vector.broadcast %cst_206 : f32 to vector<32x1xf32>
    %388 = arith.maximumf %386, %387 : vector<32x1xf32>
    %389 = vector.broadcast %379 : vector<32x1xf32> to vector<32x128xf32>
    %390 = arith.subf %371, %389 : vector<32x128xf32>
    %cst_207 = arith.constant 9.99999974E-6 : f32
    %391 = vector.broadcast %cst_207 : f32 to vector<32x1xf32>
    %392 = arith.addf %388, %391 : vector<32x1xf32>
    %393 = math.rsqrt %392 : vector<32x1xf32>
    %394 = vector.broadcast %393 : vector<32x1xf32> to vector<32x128xf32>
    %395 = arith.mulf %390, %394 : vector<32x128xf32>
    %396 = vector.broadcast %373 : vector<1x128xf32> to vector<32x128xf32>
    %397 = arith.mulf %395, %396 : vector<32x128xf32>
    %398 = vector.broadcast %375 : vector<1x128xf32> to vector<32x128xf32>
    %399 = arith.addf %397, %398 : vector<32x128xf32>
    %c0_208 = arith.constant 0 : index
    %c0_209 = arith.constant 0 : index
    %c0_210 = arith.constant 0 : index
    %400 = vector.load %arg29[%c0_208, %c0_209, %c0_210] : memref<2x32x32xf32, #tpu.memory_space<vmem>>, vector<1x32x32xf32>
    %401 = vector.shape_cast %400 : vector<1x32x32xf32> to vector<32x32xf32>
    %402 = vector.shape_cast %362 : vector<32x32xf32> to vector<1x32x32xf32>
    tpu.vector_store %arg29[%c0_208, %c0_209, %c0_210], %402 {strides = array<i32>} : memref<2x32x32xf32, #tpu.memory_space<vmem>>, vector<1x32x32xf32>,
    %c1_211 = arith.constant 1 : index
    %c0_212 = arith.constant 0 : index
    %c0_213 = arith.constant 0 : index
    %403 = vector.load %arg15[%c1_211, %c0_212, %c0_213] : memref<2x128x384xf32, #tpu.memory_space<vmem>>, vector<1x128x384xf32>
    %404 = vector.shape_cast %403 : vector<1x128x384xf32> to vector<128x384xf32>
    %cst_214 = arith.constant dense<0.000000e+00> : vector<32x384xf32>
    %405 = tpu.matmul %399, %404, %cst_214 {dimension_numbers = #tpu.dot_dimension_numbers<[1], [0], [0], [1], [0, 0, 1, 1], [], []>} : vector<32x128xf32>, vector<128x384xf32>, vector<32x384xf32> -> vector<32x384xf32>
    %c1_215 = arith.constant 1 : index
    %c0_216 = arith.constant 0 : index
    %c0_217 = arith.constant 0 : index
    %406 = vector.load %arg16[%c1_215, %c0_216, %c0_217] : memref<2x1x384xf32, #tpu.memory_space<vmem>>, vector<1x1x384xf32>
    %407 = vector.shape_cast %406 : vector<1x1x384xf32> to vector<1x384xf32>
    %408 = vector.broadcast %407 : vector<1x384xf32> to vector<32x384xf32>
    %409 = arith.addf %405, %408 : vector<32x384xf32>
    %410 = vector.extract_strided_slice %409 {offsets = [0, 0], sizes = [32, 128], strides = [1, 1]} : vector<32x384xf32> to vector<32x128xf32>
    %411 = vector.extract_strided_slice %409 {offsets = [0, 128], sizes = [32, 128], strides = [1, 1]} : vector<32x384xf32> to vector<32x128xf32>
    %412 = vector.extract_strided_slice %409 {offsets = [0, 256], sizes = [32, 128], strides = [1, 1]} : vector<32x384xf32> to vector<32x128xf32>
    %cst_218 = arith.constant dense<0.000000e+00> : vector<32x32xf32>
    %413 = tpu.matmul %410, %411, %cst_218 {dimension_numbers = #tpu.dot_dimension_numbers<[1], [1], [0], [0], [0, 0, 1, 0], [], []>} : vector<32x128xf32>, vector<32x128xf32>, vector<32x32xf32> -> vector<32x32xf32>
    %cst_219 = arith.constant 0.0883883461 : f32
    %414 = vector.broadcast %cst_219 : f32 to vector<32x32xf32>
    %415 = arith.mulf %413, %414 : vector<32x32xf32>
    %cst_220 = arith.constant -1.000000e+30 : f32
    %416 = vector.broadcast %cst_220 : f32 to vector<32x32xf32>
    %417 = arith.select %335, %415, %416 : vector<32x32xi1>, vector<32x32xf32>
    %cst_221 = arith.constant dense<0xFF800000> : vector<32xf32>
    %418 = vector.multi_reduction <maximumf>, %417, %cst_221 [1] : vector<32x32xf32> to vector<32xf32>
    %419 = vector.shape_cast %418 : vector<32xf32> to vector<32x1xf32>
    %420 = vector.broadcast %419 : vector<32x1xf32> to vector<32x32xf32>
    %421 = arith.subf %417, %420 : vector<32x32xf32>
    %422 = math.exp %421 : vector<32x32xf32>
    %cst_222 = arith.constant 0.000000e+00 : f32
    %423 = vector.broadcast %cst_222 : f32 to vector<32x32xf32>
    %424 = arith.select %335, %422, %423 : vector<32x32xi1>, vector<32x32xf32>
    %cst_223 = arith.constant dense<0.000000e+00> : vector<32xf32>
    %425 = vector.multi_reduction <add>, %424, %cst_223 [1] : vector<32x32xf32> to vector<32xf32>
    %426 = vector.shape_cast %425 : vector<32xf32> to vector<32x1xf32>
    %427 = tpu.reciprocal %426 {approx = true} : vector<32x1xf32> -> vector<32x1xf32>
    %428 = vector.broadcast %427 : vector<32x1xf32> to vector<32x32xf32>
    %429 = arith.mulf %424, %428 : vector<32x32xf32>
    %cst_224 = arith.constant dense<0.000000e+00> : vector<32x128xf32>
    %430 = tpu.matmul %429, %412, %cst_224 {dimension_numbers = #tpu.dot_dimension_numbers<[1], [0], [0], [1], [0, 0, 1, 1], [], []>} : vector<32x32xf32>, vector<32x128xf32>, vector<32x128xf32> -> vector<32x128xf32>
    %c1_225 = arith.constant 1 : index
    %c0_226 = arith.constant 0 : index
    %c0_227 = arith.constant 0 : index
    %431 = vector.load %arg17[%c1_225, %c0_226, %c0_227] : memref<2x128x128xf32, #tpu.memory_space<vmem>>, vector<1x128x128xf32>
    %432 = vector.shape_cast %431 : vector<1x128x128xf32> to vector<128x128xf32>
    %cst_228 = arith.constant dense<0.000000e+00> : vector<32x128xf32>
    %433 = tpu.matmul %430, %432, %cst_228 {dimension_numbers = #tpu.dot_dimension_numbers<[1], [0], [0], [1], [0, 0, 1, 1], [], []>} : vector<32x128xf32>, vector<128x128xf32>, vector<32x128xf32> -> vector<32x128xf32>
    %c1_229 = arith.constant 1 : index
    %c0_230 = arith.constant 0 : index
    %c0_231 = arith.constant 0 : index
    %434 = vector.load %arg18[%c1_229, %c0_230, %c0_231] : memref<2x1x128xf32, #tpu.memory_space<vmem>>, vector<1x1x128xf32>
    %435 = vector.shape_cast %434 : vector<1x1x128xf32> to vector<1x128xf32>
    %436 = vector.broadcast %435 : vector<1x128xf32> to vector<32x128xf32>
    %437 = arith.addf %433, %436 : vector<32x128xf32>
    %438 = arith.addf %399, %437 : vector<32x128xf32>
    %c1_232 = arith.constant 1 : index
    %c0_233 = arith.constant 0 : index
    %c0_234 = arith.constant 0 : index
    %439 = vector.load %arg19[%c1_232, %c0_233, %c0_234] : memref<2x1x128xf32, #tpu.memory_space<vmem>>, vector<1x1x128xf32>
    %440 = vector.shape_cast %439 : vector<1x1x128xf32> to vector<1x128xf32>
    %c1_235 = arith.constant 1 : index
    %c0_236 = arith.constant 0 : index
    %c0_237 = arith.constant 0 : index
    %441 = vector.load %arg20[%c1_235, %c0_236, %c0_237] : memref<2x1x128xf32, #tpu.memory_space<vmem>>, vector<1x1x128xf32>
    %442 = vector.shape_cast %441 : vector<1x1x128xf32> to vector<1x128xf32>
    %cst_238 = arith.constant dense<0.000000e+00> : vector<32xf32>
    %443 = vector.multi_reduction <add>, %438, %cst_238 [1] : vector<32x128xf32> to vector<32xf32>
    %444 = vector.shape_cast %443 : vector<32xf32> to vector<32x1xf32>
    %cst_239 = arith.constant 1.280000e+02 : f32
    %445 = vector.broadcast %cst_239 : f32 to vector<32x1xf32>
    %446 = arith.divf %444, %445 : vector<32x1xf32>
    %447 = arith.mulf %438, %438 : vector<32x128xf32>
    %cst_240 = arith.constant dense<0.000000e+00> : vector<32xf32>
    %448 = vector.multi_reduction <add>, %447, %cst_240 [1] : vector<32x128xf32> to vector<32xf32>
    %449 = vector.shape_cast %448 : vector<32xf32> to vector<32x1xf32>
    %cst_241 = arith.constant 1.280000e+02 : f32
    %450 = vector.broadcast %cst_241 : f32 to vector<32x1xf32>
    %451 = arith.divf %449, %450 : vector<32x1xf32>
    %452 = arith.mulf %446, %446 : vector<32x1xf32>
    %453 = arith.subf %451, %452 : vector<32x1xf32>
    %cst_242 = arith.constant 0.000000e+00 : f32
    %454 = vector.broadcast %cst_242 : f32 to vector<32x1xf32>
    %455 = arith.maximumf %453, %454 : vector<32x1xf32>
    %456 = vector.broadcast %446 : vector<32x1xf32> to vector<32x128xf32>
    %457 = arith.subf %438, %456 : vector<32x128xf32>
    %cst_243 = arith.constant 9.99999974E-6 : f32
    %458 = vector.broadcast %cst_243 : f32 to vector<32x1xf32>
    %459 = arith.addf %455, %458 : vector<32x1xf32>
    %460 = math.rsqrt %459 : vector<32x1xf32>
    %461 = vector.broadcast %460 : vector<32x1xf32> to vector<32x128xf32>
    %462 = arith.mulf %457, %461 : vector<32x128xf32>
    %463 = vector.broadcast %440 : vector<1x128xf32> to vector<32x128xf32>
    %464 = arith.mulf %462, %463 : vector<32x128xf32>
    %465 = vector.broadcast %442 : vector<1x128xf32> to vector<32x128xf32>
    %466 = arith.addf %464, %465 : vector<32x128xf32>
    %c1_244 = arith.constant 1 : index
    %c0_245 = arith.constant 0 : index
    %c0_246 = arith.constant 0 : index
    %467 = vector.load %arg29[%c1_244, %c0_245, %c0_246] : memref<2x32x32xf32, #tpu.memory_space<vmem>>, vector<1x32x32xf32>
    %468 = vector.shape_cast %467 : vector<1x32x32xf32> to vector<32x32xf32>
    %469 = vector.shape_cast %429 : vector<32x32xf32> to vector<1x32x32xf32>
    tpu.vector_store %arg29[%c1_244, %c0_245, %c0_246], %469 {strides = array<i32>} : memref<2x32x32xf32, #tpu.memory_space<vmem>>, vector<1x32x32xf32>,
    %470 = vector.extract_strided_slice %466 {offsets = [0, 0], sizes = [8, 128], strides = [1, 1]} : vector<32x128xf32> to vector<8x128xf32>
    %471 = vector.extract_strided_slice %466 {offsets = [8, 0], sizes = [8, 128], strides = [1, 1]} : vector<32x128xf32> to vector<8x128xf32>
    %472 = arith.addf %470, %471 : vector<8x128xf32>
    %473 = vector.extract_strided_slice %466 {offsets = [16, 0], sizes = [8, 128], strides = [1, 1]} : vector<32x128xf32> to vector<8x128xf32>
    %474 = arith.addf %472, %473 : vector<8x128xf32>
    %475 = vector.extract_strided_slice %466 {offsets = [24, 0], sizes = [8, 128], strides = [1, 1]} : vector<32x128xf32> to vector<8x128xf32>
    %476 = arith.addf %474, %475 : vector<8x128xf32>
    %cst_247 = arith.constant 2.500000e-01 : f32
    %477 = vector.broadcast %cst_247 : f32 to vector<8x128xf32>
    %478 = arith.mulf %476, %477 : vector<8x128xf32>
    %c0_248 = arith.constant 0 : index
    %c0_249 = arith.constant 0 : index
    %479 = vector.load %arg27[%c0_248, %c0_249] : memref<8x128xf32, #tpu.memory_space<vmem>>, vector<8x128xf32>
    tpu.vector_store %arg27[%c0_248, %c0_249], %478 {strides = array<i32>} : memref<8x128xf32, #tpu.memory_space<vmem>>, vector<8x128xf32>,
    %c0_250 = arith.constant 0 : index
    %c0_251 = arith.constant 0 : index
    %480 = vector.load %arg21[%c0_250, %c0_251] : memref<128x128xf32, #tpu.memory_space<vmem>>, vector<128x128xf32>
    %cst_252 = arith.constant dense<0.000000e+00> : vector<8x128xf32>
    %481 = tpu.matmul %478, %480, %cst_252 {dimension_numbers = #tpu.dot_dimension_numbers<[1], [0], [0], [1], [0, 0, 1, 1], [], []>} : vector<8x128xf32>, vector<128x128xf32>, vector<8x128xf32> -> vector<8x128xf32>
    %c0_253 = arith.constant 0 : index
    %c0_254 = arith.constant 0 : index
    %482 = vector.load %arg22[%c0_253, %c0_254] : memref<1x128xf32, #tpu.memory_space<vmem>>, vector<1x128xf32>
    %483 = vector.broadcast %482 : vector<1x128xf32> to vector<8x128xf32>
    %484 = arith.addf %481, %483 : vector<8x128xf32>
    %cst_255 = arith.constant 0.000000e+00 : f32
    %485 = vector.broadcast %cst_255 : f32 to vector<8x128xf32>
    %486 = arith.maximumf %484, %485 : vector<8x128xf32>
    %c0_256 = arith.constant 0 : index
    %c0_257 = arith.constant 0 : index
    %487 = vector.load %arg23[%c0_256, %c0_257] : memref<1x128xf32, #tpu.memory_space<vmem>>, vector<1x128xf32>
    %c0_258 = arith.constant 0 : index
    %c0_259 = arith.constant 0 : index
    %488 = vector.load %arg24[%c0_258, %c0_259] : memref<1x128xf32, #tpu.memory_space<vmem>>, vector<1x128xf32>
    %cst_260 = arith.constant dense<0.000000e+00> : vector<8xf32>
    %489 = vector.multi_reduction <add>, %486, %cst_260 [1] : vector<8x128xf32> to vector<8xf32>
    %490 = vector.shape_cast %489 : vector<8xf32> to vector<8x1xf32>
    %cst_261 = arith.constant 1.280000e+02 : f32
    %491 = vector.broadcast %cst_261 : f32 to vector<8x1xf32>
    %492 = arith.divf %490, %491 : vector<8x1xf32>
    %493 = arith.mulf %486, %486 : vector<8x128xf32>
    %cst_262 = arith.constant dense<0.000000e+00> : vector<8xf32>
    %494 = vector.multi_reduction <add>, %493, %cst_262 [1] : vector<8x128xf32> to vector<8xf32>
    %495 = vector.shape_cast %494 : vector<8xf32> to vector<8x1xf32>
    %cst_263 = arith.constant 1.280000e+02 : f32
    %496 = vector.broadcast %cst_263 : f32 to vector<8x1xf32>
    %497 = arith.divf %495, %496 : vector<8x1xf32>
    %498 = arith.mulf %492, %492 : vector<8x1xf32>
    %499 = arith.subf %497, %498 : vector<8x1xf32>
    %cst_264 = arith.constant 0.000000e+00 : f32
    %500 = vector.broadcast %cst_264 : f32 to vector<8x1xf32>
    %501 = arith.maximumf %499, %500 : vector<8x1xf32>
    %502 = vector.broadcast %492 : vector<8x1xf32> to vector<8x128xf32>
    %503 = arith.subf %486, %502 : vector<8x128xf32>
    %cst_265 = arith.constant 9.99999974E-6 : f32
    %504 = vector.broadcast %cst_265 : f32 to vector<8x1xf32>
    %505 = arith.addf %501, %504 : vector<8x1xf32>
    %506 = math.rsqrt %505 : vector<8x1xf32>
    %507 = vector.broadcast %506 : vector<8x1xf32> to vector<8x128xf32>
    %508 = arith.mulf %503, %507 : vector<8x128xf32>
    %509 = vector.broadcast %487 : vector<1x128xf32> to vector<8x128xf32>
    %510 = arith.mulf %508, %509 : vector<8x128xf32>
    %511 = vector.broadcast %488 : vector<1x128xf32> to vector<8x128xf32>
    %512 = arith.addf %510, %511 : vector<8x128xf32>
    %c0_266 = arith.constant 0 : index
    %c0_267 = arith.constant 0 : index
    %513 = vector.load %arg25[%c0_266, %c0_267] : memref<128x128xf32, #tpu.memory_space<vmem>>, vector<128x128xf32>
    %cst_268 = arith.constant dense<0.000000e+00> : vector<8x128xf32>
    %514 = tpu.matmul %512, %513, %cst_268 {dimension_numbers = #tpu.dot_dimension_numbers<[1], [0], [0], [1], [0, 0, 1, 1], [], []>} : vector<8x128xf32>, vector<128x128xf32>, vector<8x128xf32> -> vector<8x128xf32>
    %c0_269 = arith.constant 0 : index
    %c0_270 = arith.constant 0 : index
    %515 = vector.load %arg26[%c0_269, %c0_270] : memref<1x128xf32, #tpu.memory_space<vmem>>, vector<1x128xf32>
    %516 = vector.broadcast %515 : vector<1x128xf32> to vector<8x128xf32>
    %517 = arith.addf %514, %516 : vector<8x128xf32>
    %c0_271 = arith.constant 0 : index
    %c0_272 = arith.constant 0 : index
    %518 = vector.load %arg28[%c0_271, %c0_272] : memref<8x128xf32, #tpu.memory_space<vmem>>, vector<8x128xf32>
    tpu.vector_store %arg28[%c0_271, %c0_272], %517 {strides = array<i32>} : memref<8x128xf32, #tpu.memory_space<vmem>>, vector<8x128xf32>,
    return
  }
}

</mosaic_0001>

<bundles_post_ra>
// kernel: tpu_custom_call.1
= control target key start
LH: loop header
LB: loop body
LE: loop exit
PB: predicated region body
PF: predicated region fallthrough
CT: control target
= control target key end

     0   :  { %s4465_s6 = smov 1   ;;  %s4466_s10 = smov 2   ;;  %s5143_s0 = inlined_call_operand.smem [shape: u32[30], index: -1, kind: input, shape index: {}] }
   0x1   :  { %s4528_s5 = sld [smem:[%s5143_s0]]   ;;  %s4467_s14 = smov 3  }
   0x2   :  { %s4533_s9 = sld [smem:[%s5143_s0 + %s4465_s6]]   ;;  %s4468_s18 = smov 4  }
   0x3   :  { %s4538_s13 = sld [smem:[%s5143_s0 + %s4466_s10]]   ;;  %s4469_s22 = smov 5  }
   0x4   :  { %s4543_s17 = sld [smem:[%s5143_s0 + %s4467_s14]]   ;;  %s4470_s26 = smov 6  }
   0x5   :  { %s4548_s21 = sld [smem:[%s5143_s0 + %s4468_s18]]   ;;  %s4471_s30 = smov 7  }
   0x6   :  { %s4553_s25 = sld [smem:[%s5143_s0 + %s4469_s22]]   ;;  %s4472_s4 = smov 8  }
   0x7   :  { %s4558_s29 = sld [smem:[%s5143_s0 + %s4470_s26]]   ;;  %s4473_s10 = smov 9  }
   0x8   :  { %s4563_s3 = sld [smem:[%s5143_s0 + %s4471_s30]]   ;;  %s4474_s15 = smov 10  }
   0x9   :  { %s4568_s8 = sld [smem:[%s5143_s0 + %s4472_s4]]   ;;  %s4475_s20 = smov 11  }
   0xa   :  { %s4573_s14 = sld [smem:[%s5143_s0 + %s4473_s10]]   ;;  %s4476_s26 = smov 12  }
   0xb   :  { %s4578_s19 = sld [smem:[%s5143_s0 + %s4474_s15]]   ;;  %s4477_s1 = smov 13  }
   0xc   :  { %s4583_s24 = sld [smem:[%s5143_s0 + %s4475_s20]]   ;;  %s4478_s7 = smov 14  }
   0xd   :  { %s4588_s30 = sld [smem:[%s5143_s0 + %s4476_s26]]   ;;  %s4479_s15 = smov 15  }
   0xe   :  { %s4593_s6 = sld [smem:[%s5143_s0 + %s4477_s1]]   ;;  %s4480_s22 = smov 16  }
   0xf   :  { %5152 = sst [smem:[#allocation41_spill]] %s4568_s8  ;;  %s4481_s28 = smov 17  }
  0x10   :  { %5153 = sst [smem:[#allocation42_spill]] %s4573_s14 }
  0x11   :  { %5154 = sst [smem:[#allocation43_spill]] %s4578_s19 }
  0x12   :  { %s4598_s12 = sld [smem:[%s5143_s0 + %s4478_s7]]   ;;  %s4482_s7 = smov 18  }
  0x13   :  { %s4603_s20 = sld [smem:[%s5143_s0 + %s4479_s15]]   ;;  %s4483_s15 = smov 19  }
  0x14   :  { %5155 = sst [smem:[#allocation44_spill]] %s4593_s6 }
  0x15   :  { %s4608_s27 = sld [smem:[%s5143_s0 + %s4480_s22]]   ;;  %s4484_s22 = smov 20  }
  0x16   :  { %s4613_s4 = sld [smem:[%s5143_s0 + %s4481_s28]]   ;;  %s4485_s28 = smov 21  }
  0x17   :  { %s4618_s6 = sld [smem:[%s5143_s0 + %s4482_s7]]   ;;  %s4486_s7 = smov 22  }
  0x18   :  { %s4623_s19 = sld [smem:[%s5143_s0 + %s4483_s15]]   ;;  %s4487_s15 = smov 23  }
  0x19   :  { %s4633_s14 = sld [smem:[%s5143_s0 + %s4485_s28]]   ;;  %s4489_s28 = smov 25  }
  0x1a   :  { %s4653_s8 = sld [smem:[%s5143_s0 + %s4489_s28]]   ;;  %s4493_s28 = smov 29  }
  0x1b   :  { %5156 = sst [smem:[#allocation45_spill]] %s4608_s27 }
  0x1c   :  { %s4628_s27 = sld [smem:[%s5143_s0 + %s4484_s22]]   ;;  %s4488_s22 = smov 24  }
  0x1d   :  { %5157 = sst [smem:[#allocation46_spill]] %s4618_s6 }
  0x1e   :  { %5158 = sst [smem:[#allocation47_spill]] %s4623_s19 }
  0x1f   :  { %s4638_s6 = sld [smem:[%s5143_s0 + %s4486_s7]]   ;;  %s4490_s7 = smov 26  }
  0x20   :  { %s4643_s19 = sld [smem:[%s5143_s0 + %s4487_s15]]   ;;  %s4491_s15 = smov 27  }
  0x21   :  { %5163 = sst [smem:[#allocation52_spill]] %s4653_s8 }
  0x22   :  { %5159 = sst [smem:[#allocation48_spill]] %s4628_s27 }
  0x23   :  { %s4648_s27 = sld [smem:[%s5143_s0 + %s4488_s22]]   ;;  %s4492_s22 = smov 28  }
  0x24   :  { %s4673_s8 = sld [smem:[%s5143_s0 + %s4493_s28]]  }
  0x25   :  { %5160 = sst [smem:[#allocation49_spill]] %s4638_s6 }
  0x26   :  { %5161 = sst [smem:[#allocation50_spill]] %s4643_s19 }
  0x27   :  { %s4658_s6 = sld [smem:[%s5143_s0 + %s4490_s7]]  }
  0x28   :  { %s4663_s19 = sld [smem:[%s5143_s0 + %s4491_s15]]  }
  0x29   :  { %5162 = sst [smem:[#allocation51_spill]] %s4648_s27 }
  0x2a   :  { %s4668_s27 = sld [smem:[%s5143_s0 + %s4492_s22]]  }
  0x2b   :  { %65 = vsyncpa [#allocation4], 0 }
  0x2c   :  { %66 = vsyncpa [#allocation7], 0 }
  0x2d   :  { %67 = vsyncpa [#allocation10], 0 }
  0x2e   :  { %68 = vsyncpa [#allocation13], 0 }
  0x2f   :  { %69 = vsyncpa [#allocation16], 0 }
  0x30   :  { %70 = vsyncpa [#allocation19], 0 }
  0x31   :  { %71 = vsyncpa [#allocation22], 0 }
  0x32   :  { %72 = vsyncpa [#allocation25], 0 }
  0x33   :  { %73 = vsyncpa [#allocation5], 0 }
  0x34   :  { %74 = vsyncpa [#allocation29], 0  ;;  %s4494_s7 = smov [#allocation6]   ;;  %s4495_s11 = smov [#allocation9]  }
  0x35   :  { %s91_s10 = sshll.u32 %s4494_s7, 4  ;;  %s111_s15 = sshll.u32 %s4495_s11, 4  ;;  %s92_s10 = int_to_ptr.vmem [resolvable:$true] %s91_s10  ;;  %s112_s15 = int_to_ptr.vmem [resolvable:$true] %s111_s15 }
  0x36   :  { %s4093_s16 = scalar_lea.vmem %s92_s10, 128  ;;  %p4098_p1 = scmp.lt.s32.totalorder %s92_s10, %s92_s10 }
  0x37   :  { %p4094_p0 = scmp.ne.s32.totalorder %s92_s10, %s4093_s16  ;;  %p4099_p2 = scmp.lt.s32.totalorder %s4093_s16, %s4093_s16 }
  0x39   :  { %p4100_p3 = por %p4099_p2, %p4098_p1 }
  0x3b   :  { %p4101_p4 = pnand %p4100_p3, %p4094_p0 }
  0x3d   :  { %4104 = shalt.err (!%p4101_p4)
}
  0x3e   :  { %94 = dma.hbm_to_vmem [thread:$0]  %s4533_s9, 128, %s92_s10, [#allocation7]  }
  0x3f   :  { %s4113_s0 = scalar_lea.vmem %s112_s15, 256  ;;  %p4118_p6 = scmp.lt.s32.totalorder %s112_s15, %s112_s15 }
  0x40   :  { %p4114_p5 = scmp.ne.s32.totalorder %s112_s15, %s4113_s0  ;;  %p4119_p7 = scmp.lt.s32.totalorder %s4113_s0, %s4113_s0 }
  0x42   :  { %p4120_p8 = por %p4119_p7, %p4118_p6 }
  0x44   :  { %p4121_p9 = pnand %p4120_p8, %p4114_p5 }
  0x46   :  { %4124 = shalt.err (!%p4121_p9)
}
  0x47   :  { %114 = dma.hbm_to_vmem [thread:$0]  %s4543_s17, 256, %s112_s15, [#allocation10]  }
  0x48   :  { %s4496_s18 = smov [#allocation12]   ;;  %s4497_s23 = smov [#allocation15]  }
  0x49   :  { %s132_s22 = sshll.u32 %s4496_s18, 4  ;;  %s156_s26 = sshll.u32 %s4497_s23, 4  ;;  %s133_s22 = int_to_ptr.vmem [resolvable:$true] %s132_s22  ;;  %s157_s26 = int_to_ptr.vmem [resolvable:$true] %s156_s26 }
  0x4a   :  { %s4133_s28 = scalar_lea.vmem %s133_s22, 2048  ;;  %p4138_p11 = scmp.lt.s32.totalorder %s133_s22, %s133_s22 }
  0x4b   :  { %p4134_p10 = scmp.ne.s32.totalorder %s133_s22, %s4133_s28  ;;  %p4139_p12 = scmp.lt.s32.totalorder %s4133_s28, %s4133_s28 }
  0x4d   :  { %p4140_p13 = por %p4139_p12, %p4138_p11 }
  0x4f   :  { %p4141_p0 = pnand %p4140_p13, %p4134_p10 }
  0x51   :  { %4144 = shalt.err (!%p4141_p0)
}
  0x52   :  { %s4498_s9 = smov 128   ;;  %s4499_s1 = smov 8  }
  0x53   :  { %138 = dma.hbm_to_vmem [thread:$0]  %s4553_s25, 2048, %s133_s22, [#allocation13], %s4498_s9, %s4498_s9, %s4499_s1  }
  0x54   :  { %s4153_s17 = scalar_lea.vmem %s157_s26, 4096  ;;  %p4158_p2 = scmp.lt.s32.totalorder %s157_s26, %s157_s26 }
  0x55   :  { %p4154_p1 = scmp.ne.s32.totalorder %s157_s26, %s4153_s17  ;;  %p4159_p3 = scmp.lt.s32.totalorder %s4153_s17, %s4153_s17 }
  0x57   :  { %p4160_p4 = por %p4159_p3, %p4158_p2 }
  0x59   :  { %p4161_p5 = pnand %p4160_p4, %p4154_p1 }
  0x5b   :  { %4164 = shalt.err (!%p4161_p5)
}
  0x5c   :  { %162 = dma.hbm_to_vmem [thread:$0]  %s4563_s3, 4096, %s157_s26, [#allocation16], %s4498_s9, %s4498_s9, %s4499_s1  }
  0x5d   :  { %s4500_s2 = smov [#allocation18]  }
  0x5e   :  { %s186_s7 = sshll.u32 %s4500_s2, 4  ;;  %s187_s7 = int_to_ptr.vmem [resolvable:$true] %s186_s7 }
  0x5f   :  { %s4173_s10 = scalar_lea.vmem %s187_s7, 64  ;;  %p4178_p7 = scmp.lt.s32.totalorder %s187_s7, %s187_s7 }
  0x60   :  { %p4174_p6 = scmp.ne.s32.totalorder %s187_s7, %s4173_s10  ;;  %p4179_p8 = scmp.lt.s32.totalorder %s4173_s10, %s4173_s10 }
  0x62   :  { %p4180_p9 = por %p4179_p8, %p4178_p7 }
  0x64   :  { %p4181_p10 = pnand %p4180_p9, %p4174_p6 }
  0x66   :  { %4184 = shalt.err (!%p4181_p10)
}
  0x67   :  { %s4501_s25 = smov 16   ;;  %s4502_s11 = smov 1  }
  0x68   :  { %192 = dma.hbm_to_vmem [thread:$0]  %s4588_s30, 64, %s187_s7, [#allocation19], %s4501_s25, %s4501_s25, %s4502_s11  }
  0x69   :  { %s4503_s15 = smov [#allocation21]  }
  0x6a   :  { %s212_s16 = sshll.u32 %s4503_s15, 4  ;;  %s213_s16 = int_to_ptr.vmem [resolvable:$true] %s212_s16 }
  0x6b   :  { %s4193_s3 = scalar_lea.vmem %s213_s16, 12288  ;;  %p4198_p12 = scmp.lt.s32.totalorder %s213_s16, %s213_s16 }
  0x6c   :  { %p4194_p11 = scmp.ne.s32.totalorder %s213_s16, %s4193_s3  ;;  %p4199_p13 = scmp.lt.s32.totalorder %s4193_s3, %s4193_s3 }
  0x6e   :  { %p4200_p0 = por %p4199_p13, %p4198_p12 }
  0x70   :  { %p4201_p1 = pnand %p4200_p0, %p4194_p11 }
  0x72   :  { %4204 = shalt.err (!%p4201_p1)
}
  0x73   :  { %s4504_s0 = smov 384   ;;  %s4505_s18 = smov 24  }
  0x74   :  { %218 = dma.hbm_to_vmem [thread:$0]  %s4603_s20, 12288, %s213_s16, [#allocation22], %s4504_s0, %s4504_s0, %s4505_s18  }
  0x75   :  { %s4506_s22 = smov [#allocation24]   ;;  %s4507_s26 = smov [#allocation3]  }
  0x76   :  { %s244_s23 = sshll.u32 %s4506_s22, 4  ;;  %s81_s28 = sshll.u32 %s4507_s26, 4  ;;  %s245_s23 = int_to_ptr.vmem [resolvable:$true] %s244_s23  ;;  %s82_s28 = int_to_ptr.vmem [resolvable:$true] %s81_s28 }
  0x77   :  { %s4213_s30 = scalar_lea.vmem %s245_s23, 2048  ;;  %p4218_p3 = scmp.lt.s32.totalorder %s245_s23, %s245_s23 }
  0x78   :  { %p4214_p2 = scmp.ne.s32.totalorder %s245_s23, %s4213_s30  ;;  %p4219_p4 = scmp.lt.s32.totalorder %s4213_s30, %s4213_s30 }
  0x7a   :  { %p4220_p5 = por %p4219_p4, %p4218_p3 }
  0x7c   :  { %p4221_p6 = pnand %p4220_p5, %p4214_p2 }
  0x7e   :  { %4224 = shalt.err (!%p4221_p6)
}
  0x7f   :  { %250 = dma.hbm_to_vmem [thread:$0]  %s4633_s14, 2048, %s245_s23, [#allocation25], %s4498_s9, %s4498_s9, %s4499_s1  }
  0x80   :  { %s4233_s17 = scalar_lea.vmem %s82_s28, 256  ;;  %p4238_p8 = scmp.lt.s32.totalorder %s82_s28, %s82_s28 }
  0x81   :  { %p4234_p7 = scmp.ne.s32.totalorder %s82_s28, %s4233_s17  ;;  %p4239_p9 = scmp.lt.s32.totalorder %s4233_s17, %s4233_s17 }
  0x83   :  { %p4240_p10 = por %p4239_p9, %p4238_p8 }
  0x85   :  { %p4241_p11 = pnand %p4240_p10, %p4234_p7 }
  0x87   :  { %4244 = shalt.err (!%p4241_p11)
}
  0x88   :  { %84 = dma.hbm_to_vmem [thread:$0]  %s4528_s5, 256, %s82_s28, [#allocation4]  }
  0x89   :  { %s4508_s20 = smov [#allocation8]   ;;  %s4509_s7 = smov [#allocation11]  }
  0x8a   :  { %s101_s2 = sshll.u32 %s4508_s20, 4  ;;  %s120_s10 = sshll.u32 %s4509_s7, 4  ;;  %s102_s2 = int_to_ptr.vmem [resolvable:$true] %s101_s2  ;;  %s121_s10 = int_to_ptr.vmem [resolvable:$true] %s120_s10 }
  0x8b   :  { %s4253_s15 = scalar_lea.vmem %s102_s2, 128  ;;  %p4258_p13 = scmp.lt.s32.totalorder %s102_s2, %s102_s2 }
  0x8c   :  { %p4254_p12 = scmp.ne.s32.totalorder %s102_s2, %s4253_s15  ;;  %p4259_p0 = scmp.lt.s32.totalorder %s4253_s15, %s4253_s15 }
  0x8e   :  { %p4260_p1 = por %p4259_p0, %p4258_p13 }
  0x90   :  { %p4261_p2 = pnand %p4260_p1, %p4254_p12 }
  0x92   :  { %4264 = shalt.err (!%p4261_p2)
}
  0x93   :  { %104 = dma.hbm_to_vmem [thread:$0]  %s4538_s13, 128, %s102_s2, [#allocation7]  }
  0x94   :  { %s4273_s14 = scalar_lea.vmem %s121_s10, 4096  ;;  %p4278_p4 = scmp.lt.s32.totalorder %s121_s10, %s121_s10 }
  0x95   :  { %p4274_p3 = scmp.ne.s32.totalorder %s121_s10, %s4273_s14  ;;  %p4279_p5 = scmp.lt.s32.totalorder %s4273_s14, %s4273_s14 }
  0x97   :  { %p4280_p6 = por %p4279_p5, %p4278_p4 }
  0x99   :  { %p4281_p7 = pnand %p4280_p6, %p4274_p3 }
  0x9b   :  { %4284 = shalt.err (!%p4281_p7)
}
  0x9c   :  { %126 = dma.hbm_to_vmem [thread:$0]  %s4548_s21, 4096, %s121_s10, [#allocation10], %s4498_s9, %s4498_s9, %s4499_s1  }
  0x9d   :  { %s4510_s5 = smov [#allocation14]   ;;  %s4511_s3 = smov [#allocation17]  }
  0x9e   :  { %s144_s16 = sshll.u32 %s4510_s5, 4  ;;  %s174_s0 = sshll.u32 %s4511_s3, 4  ;;  %s145_s16 = int_to_ptr.vmem [resolvable:$true] %s144_s16  ;;  %s175_s0 = int_to_ptr.vmem [resolvable:$true] %s174_s0 }
  0x9f   :  { %s4293_s18 = scalar_lea.vmem %s145_s16, 2048  ;;  %p4298_p9 = scmp.lt.s32.totalorder %s145_s16, %s145_s16 }
  0xa0   :  { %p4294_p8 = scmp.ne.s32.totalorder %s145_s16, %s4293_s18  ;;  %p4299_p10 = scmp.lt.s32.totalorder %s4293_s18, %s4293_s18 }
  0xa2   :  { %p4300_p11 = por %p4299_p10, %p4298_p9 }
  0xa4   :  { %p4301_p12 = pnand %p4300_p11, %p4294_p8 }
  0xa6   :  { %4304 = shalt.err (!%p4301_p12)
}
  0xa7   :  { %150 = dma.hbm_to_vmem [thread:$0]  %s4558_s29, 2048, %s145_s16, [#allocation13], %s4498_s9, %s4498_s9, %s4499_s1  }
  0xa8   :  { %s4313_s13 = scalar_lea.vmem %s175_s0, 8192  ;;  %p4318_p0 = scmp.lt.s32.totalorder %s175_s0, %s175_s0 }
  0xa9   :  { %p4314_p13 = scmp.ne.s32.totalorder %s175_s0, %s4313_s13  ;;  %p4319_p1 = scmp.lt.s32.totalorder %s4313_s13, %s4313_s13 }
  0xab   :  { %p4320_p2 = por %p4319_p1, %p4318_p0 }
  0xad   :  { %p4321_p3 = pnand %p4320_p2, %p4314_p13 }
  0xaf   :  { %4324 = shalt.err (!%p4321_p3)
}
  0xb0   :  { %180 = dma.hbm_to_vmem [thread:$0]  %s4583_s24, 8192, %s175_s0, [#allocation16], %s4498_s9, %s4498_s9, %s4499_s1  }
  0xb1   :  { %s4512_s21 = smov [#allocation20]   ;;  %s4513_s23 = smov [#allocation23]  }
  0xb2   :  { %s200_s22 = sshll.u32 %s4512_s21, 4  ;;  %s226_s26 = sshll.u32 %s4513_s23, 4  ;;  %s201_s22 = int_to_ptr.vmem [resolvable:$true] %s200_s22  ;;  %s227_s26 = int_to_ptr.vmem [resolvable:$true] %s226_s26 }
  0xb3   :  { %s4333_s28 = scalar_lea.vmem %s201_s22, 64  ;;  %p4338_p5 = scmp.lt.s32.totalorder %s201_s22, %s201_s22 }
  0xb4   :  { %p4334_p4 = scmp.ne.s32.totalorder %s201_s22, %s4333_s28  ;;  %p4339_p6 = scmp.lt.s32.totalorder %s4333_s28, %s4333_s28 }
  0xb6   :  { %p4340_p7 = por %p4339_p6, %p4338_p5 }
  0xb8   :  { %p4341_p8 = pnand %p4340_p7, %p4334_p4 }
  0xba   :  { %4344 = shalt.err (!%p4341_p8)
}
  0xbb   :  { %206 = dma.hbm_to_vmem [thread:$0]  %s4598_s12, 64, %s201_s22, [#allocation19], %s4501_s25, %s4501_s25, %s4502_s11  }
  0xbc   :  { %s4353_s29 = scalar_lea.vmem %s227_s26, 4096  ;;  %p4358_p10 = scmp.lt.s32.totalorder %s227_s26, %s227_s26 }
  0xbd   :  { %p4354_p9 = scmp.ne.s32.totalorder %s227_s26, %s4353_s29  ;;  %p4359_p11 = scmp.lt.s32.totalorder %s4353_s29, %s4353_s29 }
  0xbf   :  { %p4360_p12 = por %p4359_p11, %p4358_p10 }
  0xc1   :  { %p4361_p13 = pnand %p4360_p12, %p4354_p9 }
  0xc3   :  { %4364 = shalt.err (!%p4361_p13)
}
  0xc4   :  { %232 = dma.hbm_to_vmem [thread:$0]  %s4613_s4, 4096, %s227_s26, [#allocation22], %s4498_s9, %s4498_s9, %s4499_s1  }
  0xc5   :  { %s4514_s24 = smov [#allocation26]  }
  0xc6   :  { %s262_s30 = sshll.u32 %s4514_s24, 4  ;;  %s263_s30 = int_to_ptr.vmem [resolvable:$true] %s262_s30 }
  0xc7   :  { %s4373_s17 = scalar_lea.vmem %s263_s30, 2048  ;;  %p4378_p1 = scmp.lt.s32.totalorder %s263_s30, %s263_s30 }
  0xc8   :  { %p4374_p0 = scmp.ne.s32.totalorder %s263_s30, %s4373_s17  ;;  %p4379_p2 = scmp.lt.s32.totalorder %s4373_s17, %s4373_s17 }
  0xca   :  { %p4380_p3 = por %p4379_p2, %p4378_p1 }
  0xcc   :  { %p4381_p4 = pnand %p4380_p3, %p4374_p0 }
  0xce   :  { %4384 = shalt.err (!%p4381_p4)
}
  0xcf   :  { %s5164_s12 = sld [smem:[#allocation52_spill]] }
  0xd5   :  { %268 = dma.hbm_to_vmem [thread:$0]  %s5164_s12, 2048, %s263_s30, [#allocation25], %s4498_s9, %s4498_s9, %s4499_s1  }
  0xd6   :  { %4445 = dma.done.wait [#allocation4], 256  }
  0xd7   :  { %4446 = vsyncadd [#allocation4], 4294967040 }
  0xd8   :  { %4447 = dma.done.wait [#allocation7], 256  }
  0xd9   :  { %4448 = vsyncadd [#allocation7], 4294967040 }
  0xda   :  { %4449 = dma.done.wait [#allocation10], 4352  }
  0xdb   :  { %4450 = vsyncadd [#allocation10], 4294962944 }
  0xdc   :  { %4451 = dma.done.wait [#allocation13], 4096  }
  0xdd   :  { %4452 = vsyncadd [#allocation13], 4294963200 }
  0xde   :  { %4453 = dma.done.wait [#allocation16], 12288  }
  0xdf   :  { %4454 = vsyncadd [#allocation16], 4294955008 }
  0xe0   :  { %4455 = dma.done.wait [#allocation19], 128  }
  0xe1   :  { %4456 = vsyncadd [#allocation19], 4294967168 }
  0xe2   :  { %4457 = dma.done.wait [#allocation22], 16384  }
  0xe3   :  { %4458 = vsyncadd [#allocation22], 4294950912 }
  0xe4   :  { %4459 = dma.done.wait [#allocation25], 4096  }
  0xe5   :  { %4460 = vsyncadd [#allocation25], 4294963200  ;;  %v4515_v0 = vmov 0.0   ;;  %vm4516_vm0 = vmmov 0   ;;  %v349_v1 = vld [vmem:[#allocation11 + $0xf8] sm:$0xff]  ;;  %v348_v3 = vld [vmem:[#allocation11 + $0xf0] sm:$0xff] }
  0xe6   :  { %3476 = vmatprep.subr.mxu1 %v4515_v0  ;;  %3508 = vmatprep.mubr.msk.f32.mxu1 %vm4516_vm0, %v4515_v0  ;;  %v333_v2 = vld [vmem:[#allocation11 + $0x78] sm:$0xff]  ;;  %v332_v4 = vld [vmem:[#allocation11 + $0x70] sm:$0xff]  ;;  %v347_v5 = vld [vmem:[#allocation11 + $0xe8] sm:$0xff]  ;;  %s5165_s4 = sld [smem:[#allocation41_spill]]  ;;  %vm1779_vm2 = vcmask 261120   ;;  %s4517_s3 = smov [#allocation27]  }
  0xe7   :  { %3158 = vmatprep.subr.mxu0 %v349_v1  ;;  %v331_v6 = vld [vmem:[#allocation11 + $0x68] sm:$0xff]  ;;  %v346_v7 = vld [vmem:[#allocation11 + $0xe0] sm:$0xff]  ;;  %v345_v9 = vld [vmem:[#allocation11 + $0xd8] sm:$0xff]  ;;  %s5166_s25 = sld [smem:[#allocation42_spill]]  ;;  %s3026_s0 = sshll.u32 %s4517_s3, 4  ;;  %s3027_s0 = int_to_ptr.vmem [resolvable:$true] %s3026_s0 }
  0xe8   :  { %3159 = vmatpush3.msra.mxu0 %v333_v2  ;;  %v330_v8 = vld [vmem:[#allocation11 + $0x60] sm:$0xff]  ;;  %v329_v10 = vld [vmem:[#allocation11 + $0x58] sm:$0xff]  ;;  %v344_v11 = vld [vmem:[#allocation11 + $0xd0] sm:$0xff]  ;;  %s5167_s11 = sld [smem:[#allocation43_spill]]  ;;  %s4385_s18 = scalar_lea.vmem %s3027_s0, 128 }
  0xe9   :  { %3160 = vmatprep.subr.mxu0 %v348_v3  ;;  %v328_v12 = vld [vmem:[#allocation11 + $0x50] sm:$0xff]  ;;  %v343_v13 = vld [vmem:[#allocation11 + $0xc8] sm:$0xff]  ;;  %v317_v14 = vld [vmem:[#allocation3 + $0x8] sm:$0xff]  ;;  %s5168_s20 = sld [smem:[#allocation44_spill]]  ;;  %p4386_p5 = scmp.ne.s32.totalorder %s3027_s0, %s4385_s18 }
  0xea   :  { %3161 = vmatpush3.msra.mxu0 %v332_v4  ;;  %v327_v15 = vld [vmem:[#allocation11 + $0x48] sm:$0xff]  ;;  %421 = vmatprep.mubr.f32.mxu0 %v317_v14  ;;  %v342_v16 = vld [vmem:[#allocation11 + $0xc0] sm:$0xff]  ;;  %v341_v18 = vld [vmem:[#allocation11 + $0xb8] sm:$0xff]  ;;  %s5169_s2 = sld [smem:[#allocation45_spill]]  ;;  %p4390_p6 = scmp.lt.s32.totalorder %s3027_s0, %s3027_s0 }
  0xeb   :  { %3162 = vmatprep.subr.mxu0 %v347_v5  ;;  %v326_v17 = vld [vmem:[#allocation11 + $0x40] sm:$0xff]  ;;  %v325_v19 = vld [vmem:[#allocation11 + $0x38] sm:$0xff]  ;;  %v340_v20 = vld [vmem:[#allocation11 + $0xb0] sm:$0xff]  ;;  %s5178_s7 = sld [smem:[#allocation46_spill]]  ;;  %p4391_p7 = scmp.lt.s32.totalorder %s4385_s18, %s4385_s18 }
  0xec   :  { %3163 = vmatpush3.msra.mxu0 %v331_v6  ;;  %v324_v21 = vld [vmem:[#allocation11 + $0x30] sm:$0xff]  ;;  %v339_v22 = vld [vmem:[#allocation11 + $0xa8] sm:$0xff]  ;;  %v338_v24 = vld [vmem:[#allocation11 + $0xa0] sm:$0xff]  ;;  %s5179_s10 = sld [smem:[#allocation47_spill]] }
  0xed   :  { %3164 = vmatprep.subr.mxu0 %v346_v7  ;;  %v323_v23 = vld [vmem:[#allocation11 + $0x28] sm:$0xff]  ;;  %v322_v25 = vld [vmem:[#allocation11 + $0x20] sm:$0xff]  ;;  %v337_v26 = vld [vmem:[#allocation11 + $0x98] sm:$0xff]  ;;  %s5180_s15 = sld [smem:[#allocation48_spill]]  ;;  %p4392_p8 = por %p4391_p7, %p4390_p6 }
  0xee   :  { %3165 = vmatpush3.msra.mxu0 %v330_v8  ;;  %v321_v27 = vld [vmem:[#allocation11 + $0x18] sm:$0xff]  ;;  %v336_v28 = vld [vmem:[#allocation11 + $0x90] sm:$0xff]  ;;  %v335_v30 = vld [vmem:[#allocation11 + $0x88] sm:$0xff]  ;;  %s5181_s14 = sld [smem:[#allocation49_spill]] }
  0xef   :  { %3166 = vmatprep.subr.mxu0 %v345_v9  ;;  %v320_v29 = vld [vmem:[#allocation11 + $0x10] sm:$0xff]  ;;  %v319_v31 = vld [vmem:[#allocation11 + $0x8] sm:$0xff]  ;;  %v334_v32 = vld [vmem:[#allocation11 + $0x80] sm:$0xff]  ;;  %s5182_s5 = sld [smem:[#allocation50_spill]]  ;;  %p4393_p9 = pnand %p4392_p8, %p4386_p5 }
  0xf0   :  { %3167 = vmatpush3.msra.mxu0 %v329_v10  ;;  %v318_v33 = vld [vmem:[#allocation11] sm:$0xff]  ;;  %v316_v34 = vld [vmem:[#allocation3] sm:$0xff]  ;;  %v600_v35 = vld [vmem:[#allocation12 + $0x78] sm:$0xff]  ;;  %s5183_s16 = sld [smem:[#allocation51_spill]] }
  0xf1   :  { %3168 = vmatprep.subr.mxu0 %v344_v11  ;;  %v599_v36 = vld [vmem:[#allocation12 + $0x70] sm:$0xff]  ;;  %v598_v37 = vld [vmem:[#allocation12 + $0x68] sm:$0xff]  ;;  %v597_v38 = vld [vmem:[#allocation12 + $0x60] sm:$0xff] }
  0xf2   :  { %3169 = vmatpush3.msra.mxu0 %v328_v12  ;;  %v596_v39 = vld [vmem:[#allocation12 + $0x58] sm:$0xff]  ;;  %v595_v40 = vld [vmem:[#allocation12 + $0x50] sm:$0xff]  ;;  %v594_v41 = vld [vmem:[#allocation12 + $0x48] sm:$0xff] }
  0xf3   :  { %3170 = vmatprep.subr.mxu0 %v343_v13  ;;  %v593_v42 = vld [vmem:[#allocation12 + $0x40] sm:$0xff]  ;;  %v592_v43 = vld [vmem:[#allocation12 + $0x38] sm:$0xff]  ;;  %v591_v44 = vld [vmem:[#allocation12 + $0x30] sm:$0xff] }
  0xf4   :  { %3171 = vmatpush3.msra.mxu0 %v327_v15  ;;  %v590_v45 = vld [vmem:[#allocation12 + $0x28] sm:$0xff]  ;;  %v589_v46 = vld [vmem:[#allocation12 + $0x20] sm:$0xff]  ;;  %v588_v47 = vld [vmem:[#allocation12 + $0x18] sm:$0xff] }
  0xf5   :  { %3172 = vmatprep.subr.mxu0 %v342_v16  ;;  %v587_v48 = vld [vmem:[#allocation12 + $0x10] sm:$0xff]  ;;  %v586_v49 = vld [vmem:[#allocation12 + $0x8] sm:$0xff]  ;;  %v585_v50 = vld [vmem:[#allocation12] sm:$0xff] }
  0xf6   :  { %3173 = vmatpush3.msra.mxu0 %v326_v17  ;;  %v584_v51 = vld [vmem:[#allocation6] sm:$0xff]  ;;  %v857_v52 = vld [vmem:[#allocation14 + $0x78] sm:$0xff]  ;;  %v856_v53 = vld [vmem:[#allocation14 + $0x70] sm:$0xff] }
  0xf7   :  { %3174 = vmatprep.subr.mxu0 %v341_v18  ;;  %v855_v54 = vld [vmem:[#allocation14 + $0x68] sm:$0xff]  ;;  %v854_v55 = vld [vmem:[#allocation14 + $0x60] sm:$0xff]  ;;  %v853_v56 = vld [vmem:[#allocation14 + $0x58] sm:$0xff] }
  0xf8   :  { %3175 = vmatpush3.msra.mxu0 %v325_v19  ;;  %v852_v57 = vld [vmem:[#allocation14 + $0x50] sm:$0xff]  ;;  %v851_v58 = vld [vmem:[#allocation14 + $0x48] sm:$0xff]  ;;  %v850_v59 = vld [vmem:[#allocation14 + $0x40] sm:$0xff] }
  0xf9   :  { %3176 = vmatprep.subr.mxu0 %v340_v20  ;;  %v849_v60 = vld [vmem:[#allocation14 + $0x38] sm:$0xff]  ;;  %v848_v61 = vld [vmem:[#allocation14 + $0x30] sm:$0xff]  ;;  %v847_v62 = vld [vmem:[#allocation14 + $0x28] sm:$0xff] }
  0xfa   :  { %3177 = vmatpush3.msra.mxu0 %v324_v21  ;;  %v846_v63 = vld [vmem:[#allocation14 + $0x20] sm:$0xff]  ;;  %v845_v1 = vld [vmem:[#allocation14 + $0x18] sm:$0xff]  ;;  %v844_v2 = vld [vmem:[#allocation14 + $0x10] sm:$0xff] }
  0xfb   :  { %3178 = vmatprep.subr.mxu0 %v339_v22  ;;  %v843_v3 = vld [vmem:[#allocation14 + $0x8] sm:$0xff]  ;;  %v842_v4 = vld [vmem:[#allocation14] sm:$0xff]  ;;  %v1131_v6 = vld [vmem:[#allocation15 + $0xf8] sm:$0xff] }
  0xfc   :  { %3179 = vmatpush3.msra.mxu0 %v323_v23  ;;  %v841_v5 = vld [vmem:[#allocation8] sm:$0xff]  ;;  %v1115_v7 = vld [vmem:[#allocation15 + $0x78] sm:$0xff]  ;;  %v1130_v9 = vld [vmem:[#allocation15 + $0xf0] sm:$0xff] }
  0xfd   :  { %3180 = vmatprep.subr.mxu0 %v338_v24  ;;  %v1099_v8 = vld [vmem:[#allocation9 + $0x8] sm:$0xff]  ;;  %v1114_v10 = vld [vmem:[#allocation15 + $0x70] sm:$0xff]  ;;  %v1129_v11 = vld [vmem:[#allocation15 + $0xe8] sm:$0xff] }
  0xfe   :  { %3181 = vmatpush3.msra.mxu0 %v322_v25  ;;  %v1113_v12 = vld [vmem:[#allocation15 + $0x68] sm:$0xff]  ;;  %v1128_v13 = vld [vmem:[#allocation15 + $0xe0] sm:$0xff]  ;;  %v1127_v15 = vld [vmem:[#allocation15 + $0xd8] sm:$0xff] }
  0xff   :  { %3182 = vmatprep.subr.mxu0 %v337_v26  ;;  %v1112_v14 = vld [vmem:[#allocation15 + $0x60] sm:$0xff]  ;;  %v1111_v16 = vld [vmem:[#allocation15 + $0x58] sm:$0xff]  ;;  %v1126_v17 = vld [vmem:[#allocation15 + $0xd0] sm:$0xff] }
 0x100   :  { %3183 = vmatpush3.msra.mxu0 %v321_v27  ;;  %v1110_v18 = vld [vmem:[#allocation15 + $0x50] sm:$0xff]  ;;  %v1125_v19 = vld [vmem:[#allocation15 + $0xc8] sm:$0xff]  ;;  %v1124_v21 = vld [vmem:[#allocation15 + $0xc0] sm:$0xff] }
 0x101   :  { %3184 = vmatprep.subr.mxu0 %v336_v28  ;;  %v1109_v20 = vld [vmem:[#allocation15 + $0x48] sm:$0xff]  ;;  %v1108_v22 = vld [vmem:[#allocation15 + $0x40] sm:$0xff]  ;;  %v1123_v23 = vld [vmem:[#allocation15 + $0xb8] sm:$0xff] }
 0x102   :  { %3185 = vmatpush3.msra.mxu0 %v320_v29  ;;  %v1107_v24 = vld [vmem:[#allocation15 + $0x38] sm:$0xff]  ;;  %v1122_v25 = vld [vmem:[#allocation15 + $0xb0] sm:$0xff]  ;;  %v1121_v27 = vld [vmem:[#allocation15 + $0xa8] sm:$0xff] }
 0x103   :  { %3186 = vmatprep.subr.mxu0 %v335_v30  ;;  %v1106_v26 = vld [vmem:[#allocation15 + $0x30] sm:$0xff]  ;;  %v1105_v28 = vld [vmem:[#allocation15 + $0x28] sm:$0xff]  ;;  %v1120_v29 = vld [vmem:[#allocation15 + $0xa0] sm:$0xff] }
 0x104   :  { %3187 = vmatpush3.msra.mxu0 %v319_v31  ;;  %v1104_v30 = vld [vmem:[#allocation15 + $0x20] sm:$0xff]  ;;  %v1119_v31 = vld [vmem:[#allocation15 + $0x98] sm:$0xff] }
 0x105   :  { %3188 = vmatprep.subr.mxu0 %v334_v32  ;;  %v1103_v32 = vld [vmem:[#allocation15 + $0x18] sm:$0xff] }
 0x106   :  { %3189 = vmatpush3.msra.mxu0 %v318_v33  ;;  %v1118_v33 = vld [vmem:[#allocation15 + $0x90] sm:$0xff] }
 0x107   :  { %422 = vmatmul.mubr.f32.vlgmr.msra.gmra.mxu0 %v316_v34  ;;  %3511 = vmatprep.subr.mxu0 %v4515_v0  ;;  %v1102_v34 = vld [vmem:[#allocation15 + $0x10] sm:$0xff] }
 0x108   :  { %3512 = vmatpush3.msra.mxu0 %v600_v35  ;;  %3543 = vmatprep.mubr.msk.f32.mxu0 %vm4516_vm0, %v4515_v0  ;;  %v1117_v35 = vld [vmem:[#allocation15 + $0x88] sm:$0xff] }
 0x109   :  { %3513 = vmatprep.subr.mxu0 %v4515_v0 }
 0x10a   :  { %3514 = vmatpush3.msra.mxu0 %v599_v36  ;;  %v1101_v36 = vld [vmem:[#allocation15 + $0x8] sm:$0xff] }
 0x10b   :  { %3515 = vmatprep.subr.mxu0 %v4515_v0 }
 0x10c   :  { %3516 = vmatpush3.msra.mxu0 %v598_v37  ;;  %v1116_v37 = vld [vmem:[#allocation15 + $0x80] sm:$0xff] }
 0x10d   :  { %3517 = vmatprep.subr.mxu0 %v4515_v0 }
 0x10e   :  { %3518 = vmatpush3.msra.mxu0 %v597_v38  ;;  %v1100_v38 = vld [vmem:[#allocation15] sm:$0xff] }
 0x10f   :  { %3519 = vmatprep.subr.mxu0 %v4515_v0 }
 0x110   :  { %3520 = vmatpush3.msra.mxu0 %v596_v39  ;;  %v1098_v39 = vld [vmem:[#allocation9] sm:$0xff] }
 0x111   :  { %3521 = vmatprep.subr.mxu0 %v4515_v0 }
 0x112   :  { %3522 = vmatpush3.msra.mxu0 %v595_v40 }
 0x113   :  { %3523 = vmatprep.subr.mxu0 %v4515_v0 }
 0x114   :  { %3524 = vmatpush3.msra.mxu0 %v594_v41  ;;  %v3100_v41 = vld [vmem:[%s5165_s4] ss:$0 sm:$0xff] }
 0x115   :  { %3525 = vmatprep.subr.mxu0 %v4515_v0 }
 0x116   :  { %3526 = vmatpush3.msra.mxu0 %v593_v42 }
 0x117   :  { %3527 = vmatprep.subr.mxu0 %v4515_v0 }
 0x118   :  { %3528 = vmatpush3.msra.mxu0 %v592_v43 }
 0x119   :  { %3529 = vmatprep.subr.mxu0 %v4515_v0 }
 0x11a   :  { %3530 = vmatpush3.msra.mxu0 %v591_v44 }
 0x11b   :  { %3531 = vmatprep.subr.mxu0 %v4515_v0 }
 0x11c   :  { %3532 = vmatpush3.msra.mxu0 %v590_v45 }
 0x11d   :  { %3533 = vmatprep.subr.mxu0 %v4515_v0 }
 0x11e   :  { %3534 = vmatpush3.msra.mxu0 %v589_v46  ;;  %v474_v46 = vld [vmem:[#allocation17 + $0x78] sm:$0xff] }
 0x11f   :  { %3535 = vmatprep.subr.mxu0 %v4515_v0  ;;  %3477 = vmatpush3.msra.mxu1 %v474_v46  ;;  %v721_v46 = vld [vmem:[#allocation17 + $0xc0] sm:$0xff] }
 0x120   :  { %3536 = vmatpush3.msra.mxu0 %v588_v47  ;;  %3478 = vmatprep.subr.mxu1 %v4515_v0  ;;  %v473_v47 = vld [vmem:[#allocation17 + $0x70] sm:$0xff] }
 0x121   :  { %3537 = vmatprep.subr.mxu0 %v4515_v0  ;;  %3479 = vmatpush3.msra.mxu1 %v473_v47  ;;  %v720_v47 = vld [vmem:[#allocation17 + $0xb8] sm:$0xff] }
 0x122   :  { %3538 = vmatpush3.msra.mxu0 %v587_v48  ;;  %3480 = vmatprep.subr.mxu1 %v4515_v0  ;;  %v472_v48 = vld [vmem:[#allocation17 + $0x68] sm:$0xff] }
 0x123   :  { %3539 = vmatprep.subr.mxu0 %v4515_v0  ;;  %3481 = vmatpush3.msra.mxu1 %v472_v48  ;;  %v719_v48 = vld [vmem:[#allocation17 + $0xb0] sm:$0xff] }
 0x124   :  { %3540 = vmatpush3.msra.mxu0 %v586_v49  ;;  %3482 = vmatprep.subr.mxu1 %v4515_v0  ;;  %v471_v49 = vld [vmem:[#allocation17 + $0x60] sm:$0xff] }
 0x125   :  { %3541 = vmatprep.subr.mxu0 %v4515_v0  ;;  %3483 = vmatpush3.msra.mxu1 %v471_v49 }
 0x126   :  { %3542 = vmatpush3.msra.mxu0 %v585_v50  ;;  %3484 = vmatprep.subr.mxu1 %v4515_v0  ;;  %v470_v50 = vld [vmem:[#allocation17 + $0x58] sm:$0xff] }
 0x127   :  { %3544 = vmatmul.mubr.f32.vlgmr.msra.gmra.mxu0 %v584_v51  ;;  %3581 = vmatprep.subr.mxu0 %v4515_v0  ;;  %v469_v51 = vld [vmem:[#allocation17 + $0x50] sm:$0xff] }
 0x128   :  { %3582 = vmatpush3.msra.mxu0 %v857_v52  ;;  %3613 = vmatprep.mubr.msk.f32.mxu0 %vm4516_vm0, %v4515_v0  ;;  %v468_v52 = vld [vmem:[#allocation17 + $0x48] sm:$0xff] }
 0x129   :  { %3583 = vmatprep.subr.mxu0 %v4515_v0  ;;  %3485 = vmatpush3.msra.mxu1 %v470_v50  ;;  %v718_v50 = vld [vmem:[#allocation17 + $0xa8] sm:$0xff] }
 0x12a   :  { %3584 = vmatpush3.msra.mxu0 %v856_v53  ;;  %3486 = vmatprep.subr.mxu1 %v4515_v0  ;;  %v3107_v53 = vld [vmem:[%s5165_s4 + $0x1] ss:$0 sm:$0xff] }
 0x12b   :  { %3585 = vmatprep.subr.mxu0 %v4515_v0  ;;  %3487 = vmatpush3.msra.mxu1 %v469_v51 }
 0x12c   :  { %3586 = vmatpush3.msra.mxu0 %v855_v54  ;;  %3488 = vmatprep.subr.mxu1 %v4515_v0  ;;  %v467_v54 = vld [vmem:[#allocation17 + $0x40] sm:$0xff] }
 0x12d   :  { %3587 = vmatprep.subr.mxu0 %v4515_v0  ;;  %3489 = vmatpush3.msra.mxu1 %v468_v52  ;;  %v3110_v52 = vld [vmem:[%s5166_s25 + $0x1] ss:$0 sm:$0xff] }
 0x12e   :  { %3588 = vmatpush3.msra.mxu0 %v854_v55  ;;  %3490 = vmatprep.subr.mxu1 %v4515_v0 }
 0x12f   :  { %3589 = vmatprep.subr.mxu0 %v4515_v0  ;;  %3491 = vmatpush3.msra.mxu1 %v467_v54 }
 0x130   :  { %3590 = vmatpush3.msra.mxu0 %v853_v56  ;;  %v466_v56 = vld [vmem:[#allocation17 + $0x38] sm:$0xff]  ;;  %3492 = vmatprep.subr.mxu1 %v4515_v0 }
 0x131   :  { %3591 = vmatprep.subr.mxu0 %v4515_v0  ;;  %3493 = vmatpush3.msra.mxu1 %v466_v56 }
 0x132   :  { %3592 = vmatpush3.msra.mxu0 %v852_v57  ;;  %3494 = vmatprep.subr.mxu1 %v4515_v0 }
 0x133   :  { %3593 = vmatprep.subr.mxu0 %v4515_v0 }
 0x134   :  { %3594 = vmatpush3.msra.mxu0 %v851_v58 }
 0x135   :  { %3595 = vmatprep.subr.mxu0 %v4515_v0 }
 0x136   :  { %3596 = vmatpush3.msra.mxu0 %v850_v59  ;;  %v465_v59 = vld [vmem:[#allocation17 + $0x30] sm:$0xff] }
 0x137   :  { %3597 = vmatprep.subr.mxu0 %v4515_v0  ;;  %3495 = vmatpush3.msra.mxu1 %v465_v59 }
 0x138   :  { %3598 = vmatpush3.msra.mxu0 %v849_v60  ;;  %3496 = vmatprep.subr.mxu1 %v4515_v0 }
 0x139   :  { %3599 = vmatprep.subr.mxu0 %v4515_v0 }
 0x13a   :  { %3600 = vmatpush3.msra.mxu0 %v848_v61  ;;  %v464_v61 = vld [vmem:[#allocation17 + $0x28] sm:$0xff] }
 0x13b   :  { %3601 = vmatprep.subr.mxu0 %v4515_v0  ;;  %3497 = vmatpush3.msra.mxu1 %v464_v61  ;;  %v714_v61 = vld [vmem:[#allocation17 + $0x88] sm:$0xff] }
 0x13c   :  { %3602 = vmatpush3.msra.mxu0 %v847_v62  ;;  %v463_v62 = vld [vmem:[#allocation17 + $0x20] sm:$0xff]  ;;  %3498 = vmatprep.subr.mxu1 %v4515_v0 }
 0x13d   :  { %3603 = vmatprep.subr.mxu0 %v4515_v0  ;;  %3499 = vmatpush3.msra.mxu1 %v463_v62 }
 0x13e   :  { %3604 = vmatpush3.msra.mxu0 %v846_v63  ;;  %v462_v63 = vld [vmem:[#allocation17 + $0x18] sm:$0xff]  ;;  %3500 = vmatprep.subr.mxu1 %v4515_v0 }
 0x13f   :  { %3605 = vmatprep.subr.mxu0 %v4515_v0  ;;  %3501 = vmatpush3.msra.mxu1 %v462_v63 }
 0x140   :  { %3606 = vmatpush3.msra.mxu0 %v845_v1  ;;  %3502 = vmatprep.subr.mxu1 %v4515_v0  ;;  %v461_v1 = vld [vmem:[#allocation17 + $0x10] sm:$0xff] }
 0x141   :  { %3607 = vmatprep.subr.mxu0 %v4515_v0  ;;  %3503 = vmatpush3.msra.mxu1 %v461_v1 }
 0x142   :  { %3608 = vmatpush3.msra.mxu0 %v844_v2  ;;  %3504 = vmatprep.subr.mxu1 %v4515_v0  ;;  %v460_v2 = vld [vmem:[#allocation17 + $0x8] sm:$0xff] }
 0x143   :  { %3609 = vmatprep.subr.mxu0 %v4515_v0  ;;  %3505 = vmatpush3.msra.mxu1 %v460_v2 }
 0x144   :  { %3610 = vmatpush3.msra.mxu0 %v843_v3  ;;  %3506 = vmatprep.subr.mxu1 %v4515_v0  ;;  %v459_v3 = vld [vmem:[#allocation17] sm:$0xff] }
 0x145   :  { %3611 = vmatprep.subr.mxu0 %v4515_v0  ;;  %3507 = vmatpush3.msra.mxu1 %v459_v3  ;;  %v713_v3 = vld [vmem:[#allocation17 + $0x80] sm:$0xff] }
 0x146   :  { %3612 = vmatpush3.msra.mxu0 %v842_v4  ;;  %3546 = vmatprep.subr.mxu1 %v4515_v0  ;;  %v3117_v4 = vld [vmem:[%s5165_s4 + $0x2] ss:$0 sm:$0xff] }
 0x147   :  { %3614 = vmatmul.mubr.f32.vlgmr.msra.gmra.mxu0 %v841_v5  ;;  %3278 = vmatprep.subr.mxu0 %v1131_v6 }
 0x148   :  { %3279 = vmatpush3.msra.mxu0 %v1115_v7  ;;  %1204 = vmatprep.mubr.f32.mxu0 %v1099_v8 }
 0x149   :  { %3280 = vmatprep.subr.mxu0 %v1130_v9 }
 0x14a   :  { %3281 = vmatpush3.msra.mxu0 %v1114_v10  ;;  %v3127_v10 = vld [vmem:[%s5165_s4 + $0x3] ss:$0 sm:$0xff] }
 0x14b   :  { %3282 = vmatprep.subr.mxu0 %v1129_v11 }
 0x14c   :  { %3283 = vmatpush3.msra.mxu0 %v1113_v12 }
 0x14d   :  { %3284 = vmatprep.subr.mxu0 %v1128_v13 }
 0x14e   :  { %3285 = vmatpush3.msra.mxu0 %v1112_v14 }
 0x14f   :  { %3286 = vmatprep.subr.mxu0 %v1127_v15 }
 0x150   :  { %3287 = vmatpush3.msra.mxu0 %v1111_v16 }
 0x151   :  { %3288 = vmatprep.subr.mxu0 %v1126_v17 }
 0x152   :  { %3289 = vmatpush3.msra.mxu0 %v1110_v18 }
 0x153   :  { %3290 = vmatprep.subr.mxu0 %v1125_v19 }
 0x154   :  { %3291 = vmatpush3.msra.mxu0 %v1109_v20 }
 0x155   :  { %3292 = vmatprep.subr.mxu0 %v1124_v21 }
 0x156   :  { %3293 = vmatpush3.msra.mxu0 %v1108_v22 }
 0x157   :  { %3294 = vmatprep.subr.mxu0 %v1123_v23 }
 0x158   :  { %3295 = vmatpush3.msra.mxu0 %v1107_v24 }
 0x159   :  { %3296 = vmatprep.subr.mxu0 %v1122_v25  ;;  %v3101_v25 = vld [vmem:[%s5166_s25] ss:$0 sm:$0xff] }
 0x15a   :  { %3297 = vmatpush3.msra.mxu0 %v1106_v26 }
 0x15b   :  { %3298 = vmatprep.subr.mxu0 %v1121_v27 }
 0x15c   :  { %3299 = vmatpush3.msra.mxu0 %v1105_v28  ;;  %v3102_v28 = vld [vmem:[%s5167_s11] ss:$0 sm:$0xff] }
 0x15d   :  { %3300 = vmatprep.subr.mxu0 %v1120_v29 }
 0x15e   :  { %3301 = vmatpush3.msra.mxu0 %v1104_v30 }
 0x15f   :  { %3302 = vmatprep.subr.mxu0 %v1119_v31 }
 0x160   :  { %3303 = vmatpush3.msra.mxu0 %v1103_v32 }
 0x161   :  { %3304 = vmatprep.subr.mxu0 %v1118_v33 }
 0x162   :  { %3305 = vmatpush3.msra.mxu0 %v1102_v34 }
 0x163   :  { %3306 = vmatprep.subr.mxu0 %v1117_v35 }
 0x164   :  { %3307 = vmatpush3.msra.mxu0 %v1101_v36  ;;  %v728_v36 = vld [vmem:[#allocation17 + $0xf8] sm:$0xff] }
 0x165   :  { %3308 = vmatprep.subr.mxu0 %v1116_v37 }
 0x166   :  { %3309 = vmatpush3.msra.mxu0 %v1100_v38  ;;  %v727_v38 = vld [vmem:[#allocation17 + $0xf0] sm:$0xff] }
 0x167   :  { %1205 = vmatmul.mubr.f32.vlgmr.msra.gmra.mxu0 %v1098_v39 }
 0x168   :  { %1576 = vmatprep.mubr.f32.mxu0 %v4515_v0 }
 0x1c7   :  { %v3190_v40 = vpop.f32.mrf.mxu0 }
 0x1c9   :  { %v3191_v42 = vpop.f32.mrf.mxu0 }
 0x1ca   :  { %v3192_v43 = vadd.f32 %v3191_v42, %v3190_v40  ;;  %v726_v40 = vld [vmem:[#allocation17 + $0xe8] sm:$0xff]  ;;  %v725_v42 = vld [vmem:[#allocation17 + $0xe0] sm:$0xff] }
 0x1cc   :  { %v4761_v44 = vadd.f32 %v3192_v43, %v3100_v41  ;;  %v724_v43 = vld [vmem:[#allocation17 + $0xd8] sm:$0xff] }
 0x1ce   :  { %429 = vadd.xlane.f32.xlu0 %v4761_v44  ;;  %v433_v45 = vmul.f32 %v4761_v44, %v4761_v44 }
 0x1d2   :  { %434 = vadd.xlane.f32.xlu0 %v433_v45  ;;  %v722_v45 = vld [vmem:[#allocation17 + $0xc8] sm:$0xff] }
 0x1e7   :  { %v675_v55 = vpop.f32.mrf.mxu0 }
 0x1e8   :  { %v4774_v57 = vadd.f32 %v3107_v53, %v675_v55  ;;  %v717_v53 = vld [vmem:[#allocation17 + $0xa0] sm:$0xff]  ;;  %v716_v55 = vld [vmem:[#allocation17 + $0x98] sm:$0xff] }
 0x1e9   :  { %v3545_v58 = vpop.f32.mrf.mxu0 }
 0x1ea   :  { %683 = vadd.xlane.f32.xlu1 %v4774_v57  ;;  %v686_v60 = vmul.f32 %v4774_v57, %v4774_v57  ;;  %v3111_v58 = vld [vmem:[%s5167_s11 + $0x1] ss:$0 sm:$0xff] }
 0x1ee   :  { %687 = vadd.xlane.f32.xlu1 %v686_v60 }
 0x207   :  { %v932_v5 = vpop.f32.mrf.mxu0 }
 0x208   :  { %v4789_v6 = vadd.f32 %v3117_v4, %v932_v5 }
 0x209   :  { %v3615_v7 = vpop.f32.mrf.mxu0 }
 0x20a   :  { %940 = vadd.xlane.f32.xlu0 %v4789_v6  ;;  %v943_v8 = vmul.f32 %v4789_v6, %v4789_v6  ;;  %v985_v7 = vld [vmem:[#allocation17 + $0x178] sm:$0xff] }
 0x20c   :  { %944 = vadd.xlane.f32.xlu1 %v943_v8 }
 0x227   :  { %v3310_v9 = vpop.f32.mrf.mxu0 }
 0x229   :  { %v3311_v11 = vpop.f32.mrf.mxu0 }
 0x22a   :  { %v3312_v12 = vadd.f32 %v3311_v11, %v3310_v9  ;;  %v984_v9 = vld [vmem:[#allocation17 + $0x170] sm:$0xff]  ;;  %v983_v11 = vld [vmem:[#allocation17 + $0x168] sm:$0xff] }
 0x22c   :  { %v4795_v13 = vadd.f32 %v3312_v12, %v3127_v10  ;;  %v982_v12 = vld [vmem:[#allocation17 + $0x160] sm:$0xff] }
 0x22e   :  { %1214 = vadd.xlane.f32.xlu0 %v4795_v13  ;;  %v1217_v14 = vmul.f32 %v4795_v13, %v4795_v13 }
 0x230   :  { %1218 = vadd.xlane.f32.xlu1 %v1217_v14  ;;  %v981_v14 = vld [vmem:[#allocation17 + $0x158] sm:$0xff] }
 0x257   :  { %v430_v15 = vpop.xlane.xlu0 %429 }
 0x258   :  { %v432_v16 = vmul.f32 0.0078125, %v430_v15  ;;  %v980_v15 = vld [vmem:[#allocation17 + $0x150] sm:$0xff] }
 0x25a   :  { %v437_v18 = vmul.f32 %v432_v16, %v432_v16  ;;  %v440_v23 = vsub.f32 %v4761_v44, %v432_v16  ;;  %v723_v44 = vld [vmem:[#allocation17 + $0xd0] sm:$0xff]  ;;  %v979_v16 = vld [vmem:[#allocation17 + $0x148] sm:$0xff] }
 0x25b   :  { %v435_v17 = vpop.xlane.xlu0 %434 }
 0x25c   :  { %v436_v19 = vmul.f32 0.0078125, %v435_v17  ;;  %v978_v17 = vld [vmem:[#allocation17 + $0x140] sm:$0xff] }
 0x25e   :  { %v438_v20 = vsub.f32 %v436_v19, %v437_v18  ;;  %v977_v18 = vld [vmem:[#allocation17 + $0x138] sm:$0xff] }
 0x260   :  { %v439_v21 = vmax.f32 %v438_v20, 0.0  ;;  %v976_v20 = vld [vmem:[#allocation17 + $0x130] sm:$0xff] }
 0x262   :  { %v441_v22 = vadd.f32 1e-05, %v439_v21 }
 0x264   :  { %4019 = vrsqrt.f32 %v441_v22  ;;  %v975_v22 = vld [vmem:[#allocation17 + $0x128] sm:$0xff] }
 0x271   :  { %v4020_v24 = vpop.eup %4019 }
 0x272   :  { %v443_v26 = vmul.f32 %v4020_v24, %v440_v23  ;;  %v3120_v24 = vld [vmem:[%s5166_s25 + $0x2] ss:$0 sm:$0xff] }
 0x273   :  { %v684_v27 = vpop.xlane.xlu1 %683 }
 0x274   :  { %v685_v29 = vmul.f32 0.0078125, %v684_v27  ;;  %v450_v30 = vmul.f32 %v3101_v25, %v443_v26  ;;  %v974_v25 = vld [vmem:[#allocation17 + $0x120] sm:$0xff]  ;;  %v973_v26 = vld [vmem:[#allocation17 + $0x118] sm:$0xff]  ;;  %v3121_v27 = vld [vmem:[%s5167_s11 + $0x2] ss:$0 sm:$0xff] }
 0x276   :  { %v690_v31 = vmul.f32 %v685_v29, %v685_v29  ;;  %v457_v32 = vadd.f32 %v3102_v28, %v450_v30  ;;  %v693_v49 = vsub.f32 %v4774_v57, %v685_v29  ;;  %v715_v57 = vld [vmem:[#allocation17 + $0x90] sm:$0xff]  ;;  %v971_v29 = vld [vmem:[#allocation17 + $0x108] sm:$0xff] }
 0x277   :  { %v688_v33 = vpop.xlane.xlu1 %687  ;;  %v972_v28 = vld [vmem:[#allocation17 + $0x110] sm:$0xff] }
 0x278   :  { %v689_v34 = vmul.f32 0.0078125, %v688_v33  ;;  %v458_v35 = vmax.f32 %v457_v32, 0.0 }
 0x27a   :  { %v691_v37 = vsub.f32 %v689_v34, %v690_v31  ;;  %3509 = vmatmul.mubr.f32.vlgmr.msra.gmra.mxu1 %v458_v35  ;;  %v970_v31 = vld [vmem:[#allocation17 + $0x100] sm:$0xff]  ;;  %v1259_v35 = vld [vmem:[#allocation17 + $0x1f8] sm:$0xff] }
 0x27b   :  { %3547 = vmatpush3.msra.mxu1 %v728_v36  ;;  %3578 = vmatprep.mubr.msk.f32.mxu1 %vm4516_vm0, %v4515_v0 }
 0x27c   :  { %v692_v39 = vmax.f32 %v691_v37, 0.0  ;;  %3548 = vmatprep.subr.mxu1 %v4515_v0 }
 0x27d   :  { %3549 = vmatpush3.msra.mxu1 %v727_v38 }
 0x27e   :  { %v694_v41 = vadd.f32 1e-05, %v692_v39  ;;  %3550 = vmatprep.subr.mxu1 %v4515_v0  ;;  %v1258_v39 = vld [vmem:[#allocation17 + $0x1f0] sm:$0xff] }
 0x27f   :  { %3551 = vmatpush3.msra.mxu1 %v726_v40 }
 0x280   :  { %4021 = vrsqrt.f32 %v694_v41  ;;  %3552 = vmatprep.subr.mxu1 %v4515_v0  ;;  %v1257_v41 = vld [vmem:[#allocation17 + $0x1e8] sm:$0xff] }
 0x281   :  { %3553 = vmatpush3.msra.mxu1 %v725_v42 }
 0x282   :  { %3554 = vmatprep.subr.mxu1 %v4515_v0 }
 0x283   :  { %3555 = vmatpush3.msra.mxu1 %v724_v43  ;;  %v1256_v43 = vld [vmem:[#allocation17 + $0x1e0] sm:$0xff] }
 0x284   :  { %3556 = vmatprep.subr.mxu1 %v4515_v0 }
 0x285   :  { %3557 = vmatpush3.msra.mxu1 %v723_v44 }
 0x286   :  { %3558 = vmatprep.subr.mxu1 %v4515_v0 }
 0x287   :  { %3559 = vmatpush3.msra.mxu1 %v722_v45  ;;  %v1255_v45 = vld [vmem:[#allocation17 + $0x1d8] sm:$0xff] }
 0x288   :  { %3560 = vmatprep.subr.mxu1 %v4515_v0 }
 0x289   :  { %3561 = vmatpush3.msra.mxu1 %v721_v46  ;;  %v1254_v46 = vld [vmem:[#allocation17 + $0x1d0] sm:$0xff] }
 0x28a   :  { %3562 = vmatprep.subr.mxu1 %v4515_v0 }
 0x28b   :  { %3563 = vmatpush3.msra.mxu1 %v720_v47  ;;  %v1253_v47 = vld [vmem:[#allocation17 + $0x1c8] sm:$0xff] }
 0x28c   :  { %3564 = vmatprep.subr.mxu1 %v4515_v0 }
 0x28d   :  { %v4022_v51 = vpop.eup %4021  ;;  %3565 = vmatpush3.msra.mxu1 %v719_v48  ;;  %v1252_v48 = vld [vmem:[#allocation17 + $0x1c0] sm:$0xff] }
 0x28e   :  { %3566 = vmatprep.subr.mxu1 %v4515_v0  ;;  %v696_v54 = vmul.f32 %v4022_v51, %v693_v49  ;;  %v1251_v49 = vld [vmem:[#allocation17 + $0x1b8] sm:$0xff]  ;;  %v1249_v51 = vld [vmem:[#allocation17 + $0x1a8] sm:$0xff] }
 0x28f   :  { %3567 = vmatpush3.msra.mxu1 %v718_v50  ;;  %v1250_v50 = vld [vmem:[#allocation17 + $0x1b0] sm:$0xff] }
 0x290   :  { %3568 = vmatprep.subr.mxu1 %v4515_v0  ;;  %v703_v56 = vmul.f32 %v3110_v52, %v696_v54 }
 0x291   :  { %3569 = vmatpush3.msra.mxu1 %v717_v53  ;;  %v1248_v53 = vld [vmem:[#allocation17 + $0x1a0] sm:$0xff] }
 0x292   :  { %3570 = vmatprep.subr.mxu1 %v4515_v0  ;;  %v710_v62 = vadd.f32 %v3111_v58, %v703_v56  ;;  %v1247_v56 = vld [vmem:[#allocation17 + $0x198] sm:$0xff] }
 0x293   :  { %3571 = vmatpush3.msra.mxu1 %v716_v55  ;;  %v941_v59 = vpop.xlane.xlu0 %940  ;;  %v3130_v55 = vld [vmem:[%s5166_s25 + $0x3] ss:$0 sm:$0xff] }
 0x294   :  { %3572 = vmatprep.subr.mxu1 %v4515_v0  ;;  %v942_v60 = vmul.f32 0.0078125, %v941_v59  ;;  %v711_v5 = vmax.f32 %v710_v62, 0.0  ;;  %v1246_v59 = vld [vmem:[#allocation17 + $0x190] sm:$0xff]  ;;  %v1244_v62 = vld [vmem:[#allocation17 + $0x180] sm:$0xff] }
 0x295   :  { %3573 = vmatpush3.msra.mxu1 %v715_v57  ;;  %v945_v63 = vpop.xlane.xlu1 %944  ;;  %v3131_v57 = vld [vmem:[%s5167_s11 + $0x3] ss:$0 sm:$0xff] }
 0x296   :  { %v947_v1 = vmul.f32 %v942_v60, %v942_v60  ;;  %v946_v2 = vmul.f32 0.0078125, %v945_v63  ;;  %3574 = vmatprep.subr.mxu1 %v4515_v0  ;;  %v950_v19 = vsub.f32 %v4789_v6, %v942_v60 }
 0x297   :  { %3575 = vmatpush3.msra.mxu1 %v714_v61 }
 0x298   :  { %v948_v4 = vsub.f32 %v946_v2, %v947_v1  ;;  %3576 = vmatprep.subr.mxu1 %v4515_v0  ;;  %v3103_v1 = vld [vmem:[#allocation18] ss:$0 sm:$0xff] }
 0x299   :  { %3577 = vmatpush3.msra.mxu1 %v713_v3 }
 0x29a   :  { %v949_v8 = vmax.f32 %v948_v4, 0.0  ;;  %3579 = vmatmul.mubr.f32.vlgmr.msra.gmra.mxu1 %v711_v5  ;;  %3616 = vmatprep.subr.mxu1 %v4515_v0 }
 0x29b   :  { %3617 = vmatpush3.msra.mxu1 %v985_v7  ;;  %3648 = vmatprep.mubr.msk.f32.mxu1 %vm4516_vm0, %v4515_v0  ;;  %v1493_v7 = vld [vmem:[#allocation21 + $0x170] sm:$0xff] }
 0x29c   :  { %v951_v10 = vadd.f32 1e-05, %v949_v8  ;;  %3618 = vmatprep.subr.mxu1 %v4515_v0  ;;  %1512 = vmatprep.subr.mxu0 %v1493_v7  ;;  %v1492_v8 = vld [vmem:[#allocation21 + $0x168] sm:$0xff] }
 0x29d   :  { %3619 = vmatpush3.msra.mxu1 %v984_v9  ;;  %1513 = vmatpush1.msra.mxu0 %v1492_v8  ;;  %v1490_v9 = vld [vmem:[#allocation21 + $0x158] sm:$0xff] }
 0x29e   :  { %4023 = vrsqrt.f32 %v951_v10  ;;  %3620 = vmatprep.subr.mxu1 %v4515_v0  ;;  %1514 = vmatprep.subr.mxu0 %v1490_v9  ;;  %v1489_v10 = vld [vmem:[#allocation21 + $0x150] sm:$0xff] }
 0x29f   :  { %3621 = vmatpush3.msra.mxu1 %v983_v11  ;;  %1515 = vmatpush1.msra.mxu0 %v1489_v10  ;;  %v1487_v11 = vld [vmem:[#allocation21 + $0x140] sm:$0xff] }
 0x2a0   :  { %3622 = vmatprep.subr.mxu1 %v4515_v0  ;;  %1516 = vmatprep.subr.mxu0 %v1487_v11 }
 0x2a1   :  { %3623 = vmatpush3.msra.mxu1 %v982_v12  ;;  %v1486_v12 = vld [vmem:[#allocation21 + $0x138] sm:$0xff] }
 0x2a2   :  { %3624 = vmatprep.subr.mxu1 %v4515_v0  ;;  %1517 = vmatpush1.msra.mxu0 %v1486_v12 }
 0x2a3   :  { %3625 = vmatpush3.msra.mxu1 %v981_v14  ;;  %v1484_v14 = vld [vmem:[#allocation21 + $0x128] sm:$0xff] }
 0x2a4   :  { %3626 = vmatprep.subr.mxu1 %v4515_v0  ;;  %1518 = vmatprep.subr.mxu0 %v1484_v14 }
 0x2a5   :  { %3627 = vmatpush3.msra.mxu1 %v980_v15  ;;  %v1483_v15 = vld [vmem:[#allocation21 + $0x120] sm:$0xff] }
 0x2a6   :  { %3628 = vmatprep.subr.mxu1 %v4515_v0  ;;  %1519 = vmatpush1.msra.mxu0 %v1483_v15 }
 0x2a7   :  { %3629 = vmatpush3.msra.mxu1 %v979_v16  ;;  %v1481_v16 = vld [vmem:[#allocation21 + $0x110] sm:$0xff] }
 0x2a8   :  { %3630 = vmatprep.subr.mxu1 %v4515_v0  ;;  %1520 = vmatprep.subr.mxu0 %v1481_v16 }
 0x2a9   :  { %3631 = vmatpush3.msra.mxu1 %v978_v17  ;;  %v1480_v17 = vld [vmem:[#allocation21 + $0x108] sm:$0xff] }
 0x2aa   :  { %3632 = vmatprep.subr.mxu1 %v4515_v0  ;;  %1521 = vmatpush1.msra.mxu0 %v1480_v17 }
 0x2ab   :  { %v4024_v21 = vpop.eup %4023  ;;  %3633 = vmatpush3.msra.mxu1 %v977_v18  ;;  %v1478_v18 = vld [vmem:[#allocation21 + $0xf8] sm:$0xff] }
 0x2ac   :  { %3634 = vmatprep.subr.mxu1 %v4515_v0  ;;  %v953_v23 = vmul.f32 %v4024_v21, %v950_v19  ;;  %v1477_v19 = vld [vmem:[#allocation21 + $0xf0] sm:$0xff]  ;;  %1522 = vmatprep.subr.mxu0 %v1478_v18  ;;  %v1474_v21 = vld [vmem:[#allocation21 + $0xd8] sm:$0xff] }
 0x2ad   :  { %3635 = vmatpush3.msra.mxu1 %v976_v20  ;;  %v1475_v20 = vld [vmem:[#allocation21 + $0xe0] sm:$0xff]  ;;  %1523 = vmatpush1.msra.mxu0 %v1477_v19  ;;  %v3104_v19 = vld [vmem:[%s5168_s20] ss:$0 sm:$0xff] }
 0x2ae   :  { %3636 = vmatprep.subr.mxu1 %v4515_v0  ;;  %v960_v6 = vmul.f32 %v3120_v24, %v953_v23  ;;  %1524 = vmatprep.subr.mxu0 %v1475_v20  ;;  %v1471_v23 = vld [vmem:[#allocation21 + $0xc0] sm:$0xff]  ;;  %v1469_v24 = vld [vmem:[#allocation21 + $0xb0] sm:$0xff] }
 0x2af   :  { %3637 = vmatpush3.msra.mxu1 %v975_v22  ;;  %v1472_v22 = vld [vmem:[#allocation21 + $0xc8] sm:$0xff]  ;;  %1525 = vmatpush1.msra.mxu0 %v1474_v21  ;;  %v3105_v21 = vld [vmem:[#allocation20] ss:$0 sm:$0xff] }
 0x2b0   :  { %3638 = vmatprep.subr.mxu1 %v4515_v0  ;;  %v967_v30 = vadd.f32 %v3121_v27, %v960_v6  ;;  %1526 = vmatprep.subr.mxu0 %v1472_v22  ;;  %v3112_v6 = vld [vmem:[#allocation18 + $0x1] ss:$0 sm:$0xff]  ;;  %v1465_v27 = vld [vmem:[#allocation21 + $0x90] sm:$0xff] }
 0x2b1   :  { %3639 = vmatpush3.msra.mxu1 %v974_v25  ;;  %v1468_v25 = vld [vmem:[#allocation21 + $0xa8] sm:$0xff]  ;;  %1527 = vmatpush1.msra.mxu0 %v1471_v23 }
 0x2b2   :  { %3640 = vmatprep.subr.mxu1 %v4515_v0  ;;  %v968_v34 = vmax.f32 %v967_v30, 0.0  ;;  %1528 = vmatprep.subr.mxu0 %v1469_v24  ;;  %v1462_v30 = vld [vmem:[#allocation21 + $0x78] sm:$0xff] }
 0x2b3   :  { %3641 = vmatpush3.msra.mxu1 %v973_v26  ;;  %v1466_v26 = vld [vmem:[#allocation21 + $0x98] sm:$0xff]  ;;  %1529 = vmatpush1.msra.mxu0 %v1468_v25 }
 0x2b4   :  { %3642 = vmatprep.subr.mxu1 %v4515_v0  ;;  %1530 = vmatprep.subr.mxu0 %v1466_v26 }
 0x2b5   :  { %3643 = vmatpush3.msra.mxu1 %v972_v28  ;;  %v1463_v28 = vld [vmem:[#allocation21 + $0x80] sm:$0xff]  ;;  %1531 = vmatpush1.msra.mxu0 %v1465_v27 }
 0x2b6   :  { %3644 = vmatprep.subr.mxu1 %v4515_v0  ;;  %1532 = vmatprep.subr.mxu0 %v1463_v28 }
 0x2b7   :  { %3645 = vmatpush3.msra.mxu1 %v971_v29  ;;  %v1215_v32 = vpop.xlane.xlu0 %1214  ;;  %1533 = vmatpush1.msra.mxu0 %v1462_v30 }
 0x2b8   :  { %3646 = vmatprep.subr.mxu1 %v4515_v0  ;;  %v1216_v33 = vmul.f32 0.0078125, %v1215_v32  ;;  %v1460_v32 = vld [vmem:[#allocation21 + $0x68] sm:$0xff] }
 0x2b9   :  { %3647 = vmatpush3.msra.mxu1 %v970_v31  ;;  %v1219_v36 = vpop.xlane.xlu1 %1218  ;;  %1534 = vmatprep.subr.mxu0 %v1460_v32 }
 0x2ba   :  { %v1221_v37 = vmul.f32 %v1216_v33, %v1216_v33  ;;  %v1220_v38 = vmul.f32 0.0078125, %v1219_v36  ;;  %3649 = vmatmul.mubr.f32.vlgmr.msra.gmra.mxu1 %v968_v34  ;;  %3651 = vmatprep.subr.mxu1 %v4515_v0  ;;  %v1224_v52 = vsub.f32 %v4795_v13, %v1216_v33  ;;  %v1245_v13 = vld [vmem:[#allocation17 + $0x188] sm:$0xff]  ;;  %v1457_v36 = vld [vmem:[#allocation21 + $0x50] sm:$0xff] }
 0x2bb   :  { %3652 = vmatpush3.msra.mxu1 %v1259_v35  ;;  %3683 = vmatprep.mubr.msk.f32.mxu1 %vm4516_vm0, %v4515_v0  ;;  %v1459_v34 = vld [vmem:[#allocation21 + $0x60] sm:$0xff] }
 0x2bc   :  { %v1222_v40 = vsub.f32 %v1220_v38, %v1221_v37  ;;  %3653 = vmatprep.subr.mxu1 %v4515_v0  ;;  %v1456_v37 = vld [vmem:[#allocation21 + $0x48] sm:$0xff]  ;;  %1535 = vmatpush1.msra.mxu0 %v1459_v34  ;;  %v1454_v38 = vld [vmem:[#allocation21 + $0x38] sm:$0xff] }
 0x2bd   :  { %3654 = vmatpush3.msra.mxu1 %v1258_v39  ;;  %1536 = vmatprep.subr.mxu0 %v1457_v36  ;;  %v1453_v39 = vld [vmem:[#allocation21 + $0x30] sm:$0xff]  ;;  %v3114_v34 = vld [vmem:[%s5168_s20 + $0x1] ss:$0 sm:$0xff]  ;;  %v3115_v36 = vld [vmem:[#allocation20 + $0x1] ss:$0 sm:$0xff] }
 0x2be   :  { %v1223_v42 = vmax.f32 %v1222_v40, 0.0  ;;  %3655 = vmatprep.subr.mxu1 %v4515_v0  ;;  %1537 = vmatpush1.msra.mxu0 %v1456_v37  ;;  %v1451_v40 = vld [vmem:[#allocation21 + $0x20] sm:$0xff] }
 0x2bf   :  { %3656 = vmatpush3.msra.mxu1 %v1257_v41  ;;  %1538 = vmatprep.subr.mxu0 %v1454_v38  ;;  %v1450_v41 = vld [vmem:[#allocation21 + $0x18] sm:$0xff] }
 0x2c0   :  { %v1225_v44 = vadd.f32 1e-05, %v1223_v42  ;;  %3657 = vmatprep.subr.mxu1 %v4515_v0  ;;  %1539 = vmatpush1.msra.mxu0 %v1453_v39  ;;  %v1448_v42 = vld [vmem:[#allocation21 + $0x8] sm:$0xff] }
 0x2c1   :  { %3658 = vmatpush3.msra.mxu1 %v1256_v43  ;;  %1540 = vmatprep.subr.mxu0 %v1451_v40  ;;  %v1447_v43 = vld [vmem:[#allocation21] sm:$0xff] }
 0x2c2   :  { %4025 = vrsqrt.f32 %v1225_v44  ;;  %3659 = vmatprep.subr.mxu1 %v4515_v0  ;;  %1541 = vmatpush1.msra.mxu0 %v1450_v41  ;;  %v1494_v44 = vld [vmem:[#allocation21 + $0x178] sm:$0xff] }
 0x2c3   :  { %3660 = vmatpush3.msra.mxu1 %v1255_v45  ;;  %1542 = vmatprep.subr.mxu0 %v1448_v42  ;;  %v1491_v45 = vld [vmem:[#allocation21 + $0x160] sm:$0xff] }
 0x2c4   :  { %3661 = vmatprep.subr.mxu1 %v4515_v0  ;;  %1543 = vmatpush1.msra.mxu0 %v1447_v43 }
 0x2c5   :  { %3662 = vmatpush3.msra.mxu1 %v1254_v46  ;;  %v1488_v46 = vld [vmem:[#allocation21 + $0x148] sm:$0xff] }
 0x2c6   :  { %3663 = vmatprep.subr.mxu1 %v4515_v0 }
 0x2c7   :  { %3664 = vmatpush3.msra.mxu1 %v1253_v47  ;;  %v1485_v47 = vld [vmem:[#allocation21 + $0x130] sm:$0xff] }
 0x2c8   :  { %3665 = vmatprep.subr.mxu1 %v4515_v0 }
 0x2c9   :  { %3666 = vmatpush3.msra.mxu1 %v1252_v48  ;;  %v1482_v48 = vld [vmem:[#allocation21 + $0x118] sm:$0xff] }
 0x2ca   :  { %3667 = vmatprep.subr.mxu1 %v4515_v0 }
 0x2cb   :  { %3668 = vmatpush3.msra.mxu1 %v1251_v49  ;;  %v1479_v49 = vld [vmem:[#allocation21 + $0x100] sm:$0xff] }
 0x2cc   :  { %3669 = vmatprep.subr.mxu1 %v4515_v0 }
 0x2cd   :  { %3670 = vmatpush3.msra.mxu1 %v1250_v50  ;;  %v1476_v50 = vld [vmem:[#allocation21 + $0xe8] sm:$0xff] }
 0x2ce   :  { %3671 = vmatprep.subr.mxu1 %v4515_v0 }
 0x2cf   :  { %v4026_v54 = vpop.eup %4025  ;;  %3672 = vmatpush3.msra.mxu1 %v1249_v51  ;;  %v1473_v51 = vld [vmem:[#allocation21 + $0xd0] sm:$0xff] }
 0x2d0   :  { %3673 = vmatprep.subr.mxu1 %v4515_v0  ;;  %v1227_v58 = vmul.f32 %v4026_v54, %v1224_v52  ;;  %v1470_v52 = vld [vmem:[#allocation21 + $0xb8] sm:$0xff] }
 0x2d1   :  { %3674 = vmatpush3.msra.mxu1 %v1248_v53  ;;  %v1467_v53 = vld [vmem:[#allocation21 + $0xa0] sm:$0xff]  ;;  %v3122_v54 = vld [vmem:[#allocation18 + $0x2] ss:$0 sm:$0xff] }
 0x2d2   :  { %3675 = vmatprep.subr.mxu1 %v4515_v0  ;;  %v1234_v60 = vmul.f32 %v3130_v55, %v1227_v58  ;;  %v1464_v55 = vld [vmem:[#allocation21 + $0x88] sm:$0xff]  ;;  %v1461_v58 = vld [vmem:[#allocation21 + $0x70] sm:$0xff] }
 0x2d3   :  { %3676 = vmatpush3.msra.mxu1 %v1247_v56 }
 0x2d4   :  { %3677 = vmatprep.subr.mxu1 %v4515_v0  ;;  %v1241_v61 = vadd.f32 %v3131_v57, %v1234_v60  ;;  %v1458_v60 = vld [vmem:[#allocation21 + $0x58] sm:$0xff] }
 0x2d5   :  { %3678 = vmatpush3.msra.mxu1 %v1246_v59 }
 0x2d6   :  { %3679 = vmatprep.subr.mxu1 %v4515_v0  ;;  %v1242_v63 = vmax.f32 %v1241_v61, 0.0  ;;  %v1455_v61 = vld [vmem:[#allocation21 + $0x40] sm:$0xff] }
 0x2d7   :  { %3680 = vmatpush3.msra.mxu1 %v1245_v13 }
 0x2d8   :  { %3681 = vmatprep.subr.mxu1 %v4515_v0 }
 0x2d9   :  { %3682 = vmatpush3.msra.mxu1 %v1244_v62  ;;  %v1452_v62 = vld [vmem:[#allocation21 + $0x28] sm:$0xff] }
 0x2da   :  { %3684 = vmatmul.mubr.f32.vlgmr.msra.gmra.mxu1 %v1242_v63  ;;  %3686 = vmatprep.subr.mxu1 %v1494_v44  ;;  %v1449_v63 = vld [vmem:[#allocation21 + $0x10] sm:$0xff] }
 0x2db   :  { %3687 = vmatpush3.msra.mxu1 %v1494_v44 }
 0x2dc   :  { %3688 = vmatprep.subr.mxu1 %v1491_v45 }
 0x2dd   :  { %3689 = vmatpush3.msra.mxu1 %v1491_v45 }
 0x2de   :  { %3690 = vmatprep.subr.mxu1 %v1488_v46 }
 0x2df   :  { %3691 = vmatpush3.msra.mxu1 %v1488_v46 }
 0x2e0   :  { %3692 = vmatprep.subr.mxu1 %v1485_v47 }
 0x2e1   :  { %3693 = vmatpush3.msra.mxu1 %v1485_v47 }
 0x2e2   :  { %3694 = vmatprep.subr.mxu1 %v1482_v48 }
 0x2e3   :  { %3695 = vmatpush3.msra.mxu1 %v1482_v48 }
 0x2e4   :  { %3696 = vmatprep.subr.mxu1 %v1479_v49 }
 0x2e5   :  { %3697 = vmatpush3.msra.mxu1 %v1479_v49  ;;  %v3124_v49 = vld [vmem:[%s5168_s20 + $0x2] ss:$0 sm:$0xff] }
 0x2e6   :  { %3698 = vmatprep.subr.mxu1 %v1476_v50 }
 0x2e7   :  { %3699 = vmatpush3.msra.mxu1 %v1476_v50 }
 0x2e8   :  { %3700 = vmatprep.subr.mxu1 %v1473_v51 }
 0x2e9   :  { %3701 = vmatpush3.msra.mxu1 %v1473_v51  ;;  %v3125_v51 = vld [vmem:[#allocation20 + $0x2] ss:$0 sm:$0xff] }
 0x2ea   :  { %3702 = vmatprep.subr.mxu1 %v1470_v52 }
 0x2eb   :  { %3703 = vmatpush3.msra.mxu1 %v1470_v52 }
 0x2ec   :  { %3704 = vmatprep.subr.mxu1 %v1467_v53 }
 0x2ed   :  { %3705 = vmatpush3.msra.mxu1 %v1467_v53 }
 0x2ee   :  { %3706 = vmatprep.subr.mxu1 %v1464_v55 }
 0x2ef   :  { %3707 = vmatpush3.msra.mxu1 %v1464_v55 }
 0x2f0   :  { %3708 = vmatprep.subr.mxu1 %v1461_v58 }
 0x2f1   :  { %3709 = vmatpush3.msra.mxu1 %v1461_v58 }
 0x2f2   :  { %3710 = vmatprep.subr.mxu1 %v1458_v60 }
 0x2f3   :  { %3711 = vmatpush3.msra.mxu1 %v1458_v60 }
 0x2f4   :  { %3712 = vmatprep.subr.mxu1 %v1455_v61 }
 0x2f5   :  { %3713 = vmatpush3.msra.mxu1 %v1455_v61 }
 0x2f6   :  { %3714 = vmatprep.subr.mxu1 %v1452_v62 }
 0x2f7   :  { %3715 = vmatpush3.msra.mxu1 %v1452_v62 }
 0x2f8   :  { %3716 = vmatprep.subr.mxu1 %v1449_v63 }
 0x2f9   :  { %3717 = vmatpush3.msra.mxu1 %v1449_v63 }
 0x33a   :  { %v548_v2 = vpop.f32.mrf.mxu1 }
 0x33b   :  { %v4865_v3 = vadd.f32 %v3103_v1, %v548_v2  ;;  %v3132_v1 = vld [vmem:[#allocation18 + $0x3] ss:$0 sm:$0xff] }
 0x33c   :  { %v3510_v4 = vpop.f32.mrf.mxu1 }
 0x33d   :  { %554 = vadd.xlane.f32.xlu0 %v4865_v3  ;;  %v557_v5 = vmul.f32 %v4865_v3, %v4865_v3 }
 0x33f   :  { %558 = vadd.xlane.f32.xlu1 %v557_v5 }
 0x35a   :  { %v803_v29 = vpop.f32.mrf.mxu1 }
 0x35b   :  { %v4870_v31 = vadd.f32 %v3112_v6, %v803_v29 }
 0x35c   :  { %v3580_v33 = vpop.f32.mrf.mxu1 }
 0x35d   :  { %811 = vadd.xlane.f32.xlu0 %v4870_v31  ;;  %v814_v35 = vmul.f32 %v4870_v31, %v4870_v31 }
 0x35f   :  { %815 = vadd.xlane.f32.xlu1 %v814_v35 }
 0x37a   :  { %v1060_v56 = vpop.f32.mrf.mxu1 }
 0x37b   :  { %v4875_v57 = vadd.f32 %v3122_v54, %v1060_v56 }
 0x37c   :  { %v3650_v59 = vpop.f32.mrf.mxu1 }
 0x37d   :  { %1068 = vadd.xlane.f32.xlu0 %v4875_v57  ;;  %v1071_v13 = vmul.f32 %v4875_v57, %v4875_v57 }
 0x37f   :  { %1072 = vadd.xlane.f32.xlu1 %v1071_v13 }
 0x39a   :  { %v1334_v2 = vpop.f32.mrf.mxu1 }
 0x39b   :  { %v4880_v4 = vadd.f32 %v3132_v1, %v1334_v2  ;;  %v3134_v1 = vld [vmem:[%s5168_s20 + $0x3] ss:$0 sm:$0xff] }
 0x39c   :  { %v3685_v5 = vpop.f32.mrf.mxu1 }
 0x39d   :  { %1342 = vadd.xlane.f32.xlu0 %v4880_v4  ;;  %v1345_v7 = vmul.f32 %v4880_v4, %v4880_v4  ;;  %v3135_v5 = vld [vmem:[#allocation20 + $0x3] ss:$0 sm:$0xff] }
 0x39f   :  { %1346 = vadd.xlane.f32.xlu1 %v1345_v7 }
 0x3c6   :  { %v555_v8 = vpop.xlane.xlu0 %554 }
 0x3c7   :  { %v556_v9 = vmul.f32 0.0078125, %v555_v8 }
 0x3c8   :  { %v559_v10 = vpop.xlane.xlu1 %558 }
 0x3c9   :  { %v561_v11 = vmul.f32 %v556_v9, %v556_v9  ;;  %v560_v12 = vmul.f32 0.0078125, %v559_v10  ;;  %v564_v17 = vsub.f32 %v4865_v3, %v556_v9  ;;  %v1376_v10 = vlaneseq }
 0x3cb   :  { %v562_v14 = vsub.f32 %v560_v12, %v561_v11  ;;  %v4913_v11 = vshrl.u32 %v1376_v10, 7 }
 0x3cd   :  { %v563_v15 = vmax.f32 %v562_v14, 0.0  ;;  %v1499_v12 = vsub.s32 0, %v4913_v11 }
 0x3cf   :  { %v565_v16 = vadd.f32 1e-05, %v563_v15 }
 0x3d1   :  { %4027 = vrsqrt.f32 %v565_v16 }
 0x3de   :  { %v4028_v18 = vpop.eup %4027 }
 0x3df   :  { %v567_v20 = vmul.f32 %v4028_v18, %v564_v17 }
 0x3e1   :  { %v574_v22 = vmul.f32 %v3104_v19, %v567_v20 }
 0x3e3   :  { %v581_v23 = vadd.f32 %v3105_v21, %v574_v22  ;;  %v1503_v21 = vsub.s32 1, %v4913_v11 }
 0x3e5   :  { %v4887_v24 = vmax.f32 %v581_v23, 0.0 }
 0x3e6   :  { %v812_v25 = vpop.xlane.xlu0 %811 }
 0x3e7   :  { %v813_v26 = vmul.f32 0.0078125, %v812_v25  ;;  %1577 = vmatmul.mubr.f32.vlgmr.msra.gmra.mxu0 %v4887_v24  ;;  %3718 = vmatprep.mubr.f32.mxu1 %v4887_v24 }
 0x3e8   :  { %v816_v6 = vpop.xlane.xlu1 %815  ;;  %1582 = vmatprep.mubr.f32.mxu0 %v4515_v0 }
 0x3e9   :  { %v818_v27 = vmul.f32 %v813_v26, %v813_v26  ;;  %v817_v3 = vmul.f32 0.0078125, %v816_v6  ;;  %v821_v32 = vsub.f32 %v4870_v31, %v813_v26 }
 0x3eb   :  { %v819_v28 = vsub.f32 %v817_v3, %v818_v27 }
 0x3ed   :  { %v820_v29 = vmax.f32 %v819_v28, 0.0 }
 0x3ef   :  { %v822_v30 = vadd.f32 1e-05, %v820_v29  ;;  %v1507_v29 = vsub.s32 2, %v4913_v11 }
 0x3f1   :  { %4029 = vrsqrt.f32 %v822_v30 }
 0x3fe   :  { %v4030_v33 = vpop.eup %4029 }
 0x3ff   :  { %v824_v35 = vmul.f32 %v4030_v33, %v821_v32 }
 0x401   :  { %v831_v37 = vmul.f32 %v3114_v34, %v824_v35 }
 0x403   :  { %v838_v38 = vadd.f32 %v3115_v36, %v831_v37 }
 0x405   :  { %v4894_v39 = vmax.f32 %v838_v38, 0.0 }
 0x406   :  { %v1069_v40 = vpop.xlane.xlu0 %1068 }
 0x407   :  { %v1070_v41 = vmul.f32 0.0078125, %v1069_v40  ;;  %1583 = vmatmul.mubr.f32.gmra.mxu0 %v4894_v39  ;;  %3719 = vmatmul.mubr.f32.vlgmr.msra.gmra.mxu1 %v4894_v39 }
 0x408   :  { %v1073_v42 = vpop.xlane.xlu1 %1072  ;;  %1588 = vmatprep.mubr.f32.mxu0 %v4515_v0 }
 0x409   :  { %v1075_v43 = vmul.f32 %v1070_v41, %v1070_v41  ;;  %v1074_v31 = vmul.f32 0.0078125, %v1073_v42  ;;  %v1078_v47 = vsub.f32 %v4875_v57, %v1070_v41 }
 0x40b   :  { %v1076_v44 = vsub.f32 %v1074_v31, %v1075_v43  ;;  %v1378_v31 = vadd.s32 8, %v4913_v11 }
 0x40d   :  { %v1077_v45 = vmax.f32 %v1076_v44, 0.0  ;;  %v1430_v44 = vand.u32 127, %v1376_v10 }
 0x40f   :  { %v1079_v46 = vadd.f32 1e-05, %v1077_v45  ;;  %v1392_v45 = vand.u32 7, %v1378_v31 }
 0x411   :  { %4031 = vrsqrt.f32 %v1079_v46  ;;  %v1435_v46 = vand.u32 7, %v1430_v44 }
 0x413   :  { %vm4929_vm1 = vcmp.eq.s32.totalorder %v1392_v45, %v1435_v46 }
 0x41e   :  { %v4032_v48 = vpop.eup %4031 }
 0x41f   :  { %v1081_v50 = vmul.f32 %v4032_v48, %v1078_v47  ;;  %v1380_v47 = vadd.s32 24, %v4913_v11  ;;  %v1385_v48 = vand.u32 7, %v4913_v11 }
 0x421   :  { %v1088_v52 = vmul.f32 %v3124_v49, %v1081_v50  ;;  %v1379_v49 = vadd.s32 16, %v4913_v11  ;;  %vm4933_vm3 = vcmp.eq.s32.totalorder %v1385_v48, %v1435_v46 }
 0x423   :  { %v1095_v53 = vadd.f32 %v3125_v51, %v1088_v52  ;;  %v1406_v52 = vand.u32 7, %v1380_v47 }
 0x425   :  { %v4901_v54 = vmax.f32 %v1095_v53, 0.0  ;;  %vm4940_vm4 = vcmp.eq.s32.totalorder %v1406_v52, %v1435_v46 }
 0x426   :  { %v1343_v55 = vpop.xlane.xlu0 %1342 }
 0x427   :  { %v1344_v56 = vmul.f32 0.0078125, %v1343_v55  ;;  %1589 = vmatmul.mubr.f32.gmra.mxu0 %v4901_v54  ;;  %3721 = vmatprep.mubr.f32.mxu1 %v4901_v54 }
 0x428   :  { %v1347_v58 = vpop.xlane.xlu1 %1346  ;;  %1594 = vmatprep.mubr.f32.mxu0 %v4515_v0 }
 0x429   :  { %v1349_v59 = vmul.f32 %v1344_v56, %v1344_v56  ;;  %v1348_v57 = vmul.f32 0.0078125, %v1347_v58  ;;  %v1352_v62 = vsub.f32 %v4880_v4, %v1344_v56  ;;  %v1495_v4 = vld [vmem:[%s5169_s2] sm:$0x7]  ;;  %v1399_v58 = vand.u32 7, %v1379_v49 }
 0x42a   :  { %v1500_v14 = vrot.slane %v1495_v4, %v1499_v12  ;;  %v1504_v25 = vrot.slane %v1495_v4, %v1503_v21  ;;  %v1508_v34 = vrot.slane %v1495_v4, %v1507_v29 }
 0x42b   :  { %v1350_v60 = vsub.f32 %v1348_v57, %v1349_v59  ;;  %vm4947_vm5 = vcmp.eq.s32.totalorder %v1399_v58, %v1435_v46 }
 0x42d   :  { %v1351_v13 = vmax.f32 %v1350_v60, 0.0 }
 0x42f   :  { %v1353_v61 = vadd.f32 1e-05, %v1351_v13 }
 0x431   :  { %4033 = vrsqrt.f32 %v1353_v61 }
 0x43e   :  { %v4034_v63 = vpop.eup %4033 }
 0x43f   :  { %v1355_v2 = vmul.f32 %v4034_v63, %v1352_v62 }
 0x441   :  { %v1362_v7 = vmul.f32 %v3134_v1, %v1355_v2 }
 0x443   :  { %v1369_v8 = vadd.f32 %v3135_v5, %v1362_v7 }
 0x445   :  { %v4908_v9 = vmax.f32 %v1369_v8, 0.0 }
 0x447   :  { %1595 = vmatmul.mubr.f32.gmra.mxu0 %v4908_v9  ;;  %3722 = vmatmul.mubr.f32.gmra.mxu1 %v4908_v9 }
 0x448   :  { %2250 = vmatprep.mubr.f32.mxu0 %v4515_v0 }
 0x4a7   :  { %v1578_v15 = vpop.f32.mrf.mxu0 }
 0x4a8   :  { %v1579_v16 = vadd.f32 %v1578_v15, %v1500_v14 }
 0x4a9   :  { %v1580_v17 = vpop.f32.mrf.mxu0 }
 0x4aa   :  { %3732 = vmatprep.mubr.f32.mxu1 %v1579_v16  ;;  %v1581_v32 = vadd.f32 %v1580_v17, %v1504_v25 }
 0x4c7   :  { %v1584_v18 = vpop.f32.mrf.mxu0  ;;  %v3720_v3 = vpop.f32.mrf.mxu1 }
 0x4c8   :  { %v1585_v37 = vadd.f32 %v1584_v18, %v1500_v14  ;;  %v1673_v41 = vadd.f32 %v3720_v3, %v1508_v34 }
 0x4c9   :  { %v1586_v19 = vpop.f32.mrf.mxu0  ;;  %v1667_v30 = vpop.f32.mrf.mxu1 }
 0x4ca   :  { %v1587_v28 = vadd.f32 %v1586_v19, %v1504_v25  ;;  %v1668_v43 = vadd.f32 %v1667_v30, %v1508_v34 }
 0x4e7   :  { %v1590_v20 = vpop.f32.mrf.mxu0 }
 0x4e8   :  { %v1591_v38 = vadd.f32 %v1590_v20, %v1500_v14 }
 0x4e9   :  { %v1592_v22 = vpop.f32.mrf.mxu0 }
 0x4ea   :  { %v1593_v27 = vadd.f32 %v1592_v22, %v1504_v25 }
 0x507   :  { %v1596_v23 = vpop.f32.mrf.mxu0  ;;  %v3723_v33 = vpop.f32.mrf.mxu1 }
 0x508   :  { %v1683_v35 = vadd.f32 %v3723_v33, %v1508_v34  ;;  %v1597_v42 = vadd.f32 %v1596_v23, %v1500_v14 }
 0x509   :  { %v1598_v26 = vpop.f32.mrf.mxu0  ;;  %v1677_v36 = vpop.f32.mrf.mxu1 }
 0x50a   :  { %v1599_v6 = vadd.f32 %v1598_v26, %v1504_v25  ;;  %v1678_v40 = vadd.f32 %v1677_v36, %v1508_v34 }
 0x50c   :  { %3724 = vmatprep.subr.mxu1 %v1599_v6 }
 0x50d   :  { %3725 = vmatpush3.xpose.msra.mxu1 %v1599_v6 }
 0x50e   :  { %3726 = vmatprep.subr.mxu1 %v1593_v27 }
 0x511   :  { %3727 = vmatpush3.xpose.msra.mxu1 %v1593_v27 }
 0x512   :  { %3728 = vmatprep.subr.mxu1 %v1587_v28 }
 0x515   :  { %3729 = vmatpush3.xpose.msra.mxu1 %v1587_v28 }
 0x516   :  { %3730 = vmatprep.subr.mxu1 %v1581_v32 }
 0x519   :  { %3731 = vmatpush3.xpose.msra.mxu1 %v1581_v32 }
 0x51a   :  { %3738 = vmatprep.subr.mxu1 %v1683_v35 }
 0x51c   :  { %3733 = vmatmul.mubr.f32.vlgmr.msra.gmra.mxu1 %v1585_v37 }
 0x51d   :  { %3735 = vmatprep.mubr.f32.mxu1 %v1591_v38  ;;  %3739 = vmatpush3.msra.mxu1 %v1683_v35 }
 0x51e   :  { %3740 = vmatprep.subr.mxu1 %v1678_v40 }
 0x51f   :  { %3741 = vmatpush3.msra.mxu1 %v1678_v40 }
 0x520   :  { %3736 = vmatmul.mubr.f32.gmra.mxu1 %v1597_v42  ;;  %3742 = vmatprep.subr.mxu1 %v1673_v41  ;;  %v1940_v42 = vld [vmem:[#allocation23 + $0x78] sm:$0xff] }
 0x521   :  { %3743 = vmatpush3.msra.mxu1 %v1673_v41 }
 0x522   :  { %3744 = vmatprep.subr.mxu1 %v1668_v43 }
 0x523   :  { %3745 = vmatpush3.msra.mxu1 %v1668_v43 }
 0x524   :  { %3752 = vmatprep.subr.mxu1 %v1940_v42 }
 0x5dc   :  { %v3734_v50 = vpop.f32.mrf.mxu1 }
 0x5dd   :  { %v1772_v53 = vmul.f32 0.088388346, %v3734_v50 }
 0x5de   :  { %v1752_v55 = vpop.f32.mrf.mxu1 }
 0x5df   :  { %v1771_v59 = vmul.f32 0.088388346, %v1752_v55  ;;  %v1776_v57 = vsel %vm4929_vm1, %v1772_v53, -1e+30  ;;  %v1939_v53 = vld [vmem:[#allocation23 + $0x70] sm:$0xff] }
 0x5e0   :  { %v3737_v60 = vpop.f32.mrf.mxu1  ;;  %v1783_v13 = vsel %vm1779_vm2, %v1776_v57, -inf }
 0x5e1   :  { %v1774_v62 = vmul.f32 0.088388346, %v3737_v60  ;;  %1784 = vmax.xlane.f32.xlu1 %v1783_v13  ;;  %v1775_v63 = vsel %vm4933_vm3, %v1771_v59, -1e+30  ;;  %v1938_v59 = vld [vmem:[#allocation23 + $0x68] sm:$0xff]  ;;  %v1936_v60 = vld [vmem:[#allocation23 + $0x58] sm:$0xff] }
 0x5e2   :  { %v1762_v1 = vpop.f32.mrf.mxu1  ;;  %v1780_v2 = vsel %vm1779_vm2, %v1775_v63, -inf  ;;  %v1935_v13 = vld [vmem:[#allocation23 + $0x50] sm:$0xff] }
 0x5e3   :  { %v1773_v7 = vmul.f32 0.088388346, %v1762_v1  ;;  %1781 = vmax.xlane.f32.xlu0 %v1780_v2  ;;  %v1778_v8 = vsel %vm4940_vm4, %v1774_v62, -1e+30  ;;  %v1934_v62 = vld [vmem:[#allocation23 + $0x48] sm:$0xff]  ;;  %v1932_v1 = vld [vmem:[#allocation23 + $0x38] sm:$0xff] }
 0x5e4   :  { %v1789_v10 = vsel %vm1779_vm2, %v1778_v8, -inf  ;;  %v1931_v2 = vld [vmem:[#allocation23 + $0x30] sm:$0xff] }
 0x5e5   :  { %1790 = vmax.xlane.f32.xlu1 %v1789_v10  ;;  %v1777_v4 = vsel %vm4947_vm5, %v1773_v7, -1e+30  ;;  %v1930_v7 = vld [vmem:[#allocation23 + $0x28] sm:$0xff]  ;;  %v1928_v10 = vld [vmem:[#allocation23 + $0x18] sm:$0xff] }
 0x5e6   :  { %v1786_v14 = vsel %vm1779_vm2, %v1777_v4, -inf }
 0x5e7   :  { %1787 = vmax.xlane.f32.xlu0 %v1786_v14  ;;  %v1926_v14 = vld [vmem:[#allocation23 + $0x8] sm:$0xff] }
 0x66a   :  { %v1785_v15 = vpop.xlane.xlu1 %1784 }
 0x66b   :  { %v1793_v16 = vsub.f32 %v1776_v57, %v1785_v15  ;;  %v1937_v57 = vld [vmem:[#allocation23 + $0x60] sm:$0xff] }
 0x66c   :  { %v1782_v17 = vpop.xlane.xlu0 %1781  ;;  %v1925_v15 = vld [vmem:[#allocation23] sm:$0xff] }
 0x66d   :  { %v1798_v18 = vmul.f32 1.442695, %v1793_v16  ;;  %v1792_v19 = vsub.f32 %v1775_v63, %v1782_v17  ;;  %v1933_v63 = vld [vmem:[#allocation23 + $0x40] sm:$0xff] }
 0x66e   :  { %v1791_v20 = vpop.xlane.xlu1 %1790 }
 0x66f   :  { %4035 = vpow2.f32 %v1798_v18  ;;  %v1796_v22 = vmul.f32 1.442695, %v1792_v19  ;;  %v1795_v23 = vsub.f32 %v1778_v8, %v1791_v20  ;;  %v1929_v8 = vld [vmem:[#allocation23 + $0x20] sm:$0xff]  ;;  %v2166_v20 = vld [vmem:[#allocation21 + $0x2f0] sm:$0xff] }
 0x670   :  { %v1788_v25 = vpop.xlane.xlu0 %1787  ;;  %2186 = vmatprep.subr.mxu0 %v2166_v20  ;;  %v2134_v20 = vld [vmem:[#allocation21 + $0x1f0] sm:$0xff] }
 0x671   :  { %4037 = vpow2.f32 %v1796_v22  ;;  %v1802_v26 = vmul.f32 1.442695, %v1795_v23  ;;  %v1794_v6 = vsub.f32 %v1777_v4, %v1788_v25  ;;  %v1927_v4 = vld [vmem:[#allocation23 + $0x10] sm:$0xff]  ;;  %v2165_v22 = vld [vmem:[#allocation21 + $0x2e8] sm:$0xff] }
 0x672   :  { %2187 = vmatpush1.msra.mxu0 %v2165_v22  ;;  %v3140_v25 = vld [vmem:[%s5178_s7] ss:$0 sm:$0xff]  ;;  %v2126_v22 = vld [vmem:[#allocation21 + $0x1b0] sm:$0xff] }
 0x673   :  { %4039 = vpow2.f32 %v1802_v26  ;;  %v1800_v27 = vmul.f32 1.442695, %v1794_v6 }
 0x675   :  { %4041 = vpow2.f32 %v1800_v27 }
 0x67c   :  { %v4036_v3 = vpop.eup %4035 }
 0x67d   :  { %v1805_v28 = vsel %vm4929_vm1, %v4036_v3, 0.0 }
 0x67e   :  { %v4038_v30 = vpop.eup %4037  ;;  %v1811_v32 = vsel %vm1779_vm2, %v1805_v28, 0.0 }
 0x67f   :  { %1812 = vadd.xlane.f32.xlu1 %v1811_v32  ;;  %v1804_v33 = vsel %vm4933_vm3, %v4038_v30, 0.0 }
 0x680   :  { %v4040_v34 = vpop.eup %4039  ;;  %v1808_v35 = vsel %vm1779_vm2, %v1804_v33, 0.0 }
 0x681   :  { %1809 = vadd.xlane.f32.xlu0 %v1808_v35  ;;  %v1807_v36 = vsel %vm4940_vm4, %v4040_v34, 0.0 }
 0x682   :  { %v4042_v37 = vpop.eup %4041  ;;  %v1817_v38 = vsel %vm1779_vm2, %v1807_v36, 0.0 }
 0x683   :  { %1818 = vadd.xlane.f32.xlu1 %v1817_v38  ;;  %v1806_v40 = vsel %vm4947_vm5, %v4042_v37, 0.0  ;;  %v2163_v38 = vld [vmem:[#allocation21 + $0x2d8] sm:$0xff] }
 0x684   :  { %v1814_v41 = vsel %vm1779_vm2, %v1806_v40, 0.0  ;;  %2188 = vmatprep.subr.mxu0 %v2163_v38 }
 0x685   :  { %1815 = vadd.xlane.f32.xlu0 %v1814_v41  ;;  %v2167_v41 = vld [vmem:[#allocation21 + $0x2f8] sm:$0xff] }
 0x708   :  { %v1813_v43 = vpop.xlane.xlu1 %1812 }
 0x709   :  { %4043 = vrcp.f32 %v1813_v43  ;;  %v2157_v43 = vld [vmem:[#allocation21 + $0x2a8] sm:$0xff] }
 0x70a   :  { %v1810_v31 = vpop.xlane.xlu0 %1809 }
 0x70b   :  { %4045 = vrcp.f32 %v1810_v31  ;;  %v2164_v31 = vld [vmem:[#allocation21 + $0x2e0] sm:$0xff] }
 0x70c   :  { %v1819_v44 = vpop.xlane.xlu1 %1818 }
 0x70d   :  { %4047 = vrcp.f32 %v1819_v44  ;;  %v2156_v44 = vld [vmem:[#allocation21 + $0x2a0] sm:$0xff] }
 0x70e   :  { %v1816_v45 = vpop.xlane.xlu0 %1815 }
 0x70f   :  { %4049 = vrcp.f32 %v1816_v45  ;;  %v2154_v45 = vld [vmem:[#allocation21 + $0x290] sm:$0xff] }
 0x716   :  { %v4044_v46 = vpop.eup %4043 }
 0x717   :  { %v1825_v47 = vmul.f32 %v4044_v46, %v1805_v28  ;;  %v2161_v46 = vld [vmem:[#allocation21 + $0x2c8] sm:$0xff] }
 0x718   :  { %v4046_v48 = vpop.eup %4045 }
 0x719   :  { %2116 = vst.msk [vmem:[#allocation30 + $0x8] sm:$0xff] %vm1779_vm2, %v1825_v47  ;;  %v1824_v49 = vmul.f32 %v4046_v48, %v1804_v33  ;;  %v2151_v48 = vld [vmem:[#allocation21 + $0x278] sm:$0xff] }
 0x71a   :  { %v4048_v50 = vpop.eup %4047 }
 0x71b   :  { %3746 = vmatprep.mubr.msk.f32.mxu1 %vm1779_vm2, %v1824_v49  ;;  %2115 = vst.msk [vmem:[#allocation30] sm:$0xff] %vm1779_vm2, %v1824_v49  ;;  %v1827_v52 = vmul.f32 %v4048_v50, %v1807_v36  ;;  %v2158_v49 = vld [vmem:[#allocation21 + $0x2b0] sm:$0xff] }
 0x71c   :  { %v4050_v55 = vpop.eup %4049  ;;  %3747 = vmatmul.mubr.msk.f32.vlgmr.msra.gmra.mxu1 %vm1779_vm2, %v1825_v47  ;;  %v2153_v47 = vld [vmem:[#allocation21 + $0x288] sm:$0xff]  ;;  %v2150_v50 = vld [vmem:[#allocation21 + $0x270] sm:$0xff] }
 0x71d   :  { %v1826_v58 = vmul.f32 %v4050_v55, %v1806_v40  ;;  %2118 = vst.msk [vmem:[#allocation30 + $0x18] sm:$0xff] %vm1779_vm2, %v1827_v52  ;;  %3753 = vmatpush3.msra.mxu1 %v1940_v42  ;;  %v2162_v40 = vld [vmem:[#allocation21 + $0x2d0] sm:$0xff]  ;;  %v2147_v55 = vld [vmem:[#allocation21 + $0x258] sm:$0xff] }
 0x71e   :  { %3754 = vmatprep.subr.mxu1 %v1939_v53  ;;  %2189 = vmatpush1.msra.mxu0 %v2162_v40 }
 0x71f   :  { %3749 = vmatprep.mubr.msk.f32.mxu1 %vm1779_vm2, %v1826_v58  ;;  %2117 = vst.msk [vmem:[#allocation30 + $0x10] sm:$0xff] %vm1779_vm2, %v1826_v58  ;;  %3755 = vmatpush3.msra.mxu1 %v1939_v53  ;;  %v2155_v53 = vld [vmem:[#allocation21 + $0x298] sm:$0xff]  ;;  %v2145_v58 = vld [vmem:[#allocation21 + $0x248] sm:$0xff] }
 0x720   :  { %3750 = vmatmul.mubr.msk.f32.gmra.mxu1 %vm1779_vm2, %v1827_v52  ;;  %3756 = vmatprep.subr.mxu1 %v1938_v59  ;;  %v2148_v52 = vld [vmem:[#allocation21 + $0x260] sm:$0xff] }
 0x721   :  { %3757 = vmatpush3.msra.mxu1 %v1938_v59  ;;  %v2152_v59 = vld [vmem:[#allocation21 + $0x280] sm:$0xff] }
 0x722   :  { %3758 = vmatprep.subr.mxu1 %v1937_v57 }
 0x723   :  { %3759 = vmatpush3.msra.mxu1 %v1937_v57  ;;  %v2144_v57 = vld [vmem:[#allocation21 + $0x240] sm:$0xff] }
 0x724   :  { %3760 = vmatprep.subr.mxu1 %v1936_v60 }
 0x725   :  { %3761 = vmatpush3.msra.mxu1 %v1936_v60  ;;  %v2142_v60 = vld [vmem:[#allocation21 + $0x230] sm:$0xff] }
 0x726   :  { %3762 = vmatprep.subr.mxu1 %v1935_v13 }
 0x727   :  { %3763 = vmatpush3.msra.mxu1 %v1935_v13  ;;  %v2149_v13 = vld [vmem:[#allocation21 + $0x268] sm:$0xff] }
 0x728   :  { %3764 = vmatprep.subr.mxu1 %v1934_v62 }
 0x729   :  { %3765 = vmatpush3.msra.mxu1 %v1934_v62  ;;  %v2141_v62 = vld [vmem:[#allocation21 + $0x228] sm:$0xff] }
 0x72a   :  { %3766 = vmatprep.subr.mxu1 %v1933_v63 }
 0x72b   :  { %3767 = vmatpush3.msra.mxu1 %v1933_v63  ;;  %v2139_v63 = vld [vmem:[#allocation21 + $0x218] sm:$0xff] }
 0x72c   :  { %3768 = vmatprep.subr.mxu1 %v1932_v1 }
 0x72d   :  { %3769 = vmatpush3.msra.mxu1 %v1932_v1  ;;  %v2146_v1 = vld [vmem:[#allocation21 + $0x250] sm:$0xff] }
 0x72e   :  { %3770 = vmatprep.subr.mxu1 %v1931_v2 }
 0x72f   :  { %3771 = vmatpush3.msra.mxu1 %v1931_v2  ;;  %v2138_v2 = vld [vmem:[#allocation21 + $0x210] sm:$0xff] }
 0x730   :  { %3772 = vmatprep.subr.mxu1 %v1930_v7 }
 0x731   :  { %3773 = vmatpush3.msra.mxu1 %v1930_v7  ;;  %v2136_v7 = vld [vmem:[#allocation21 + $0x200] sm:$0xff] }
 0x732   :  { %3774 = vmatprep.subr.mxu1 %v1929_v8 }
 0x733   :  { %3775 = vmatpush3.msra.mxu1 %v1929_v8  ;;  %v2143_v8 = vld [vmem:[#allocation21 + $0x238] sm:$0xff] }
 0x734   :  { %3776 = vmatprep.subr.mxu1 %v1928_v10 }
 0x735   :  { %3777 = vmatpush3.msra.mxu1 %v1928_v10  ;;  %v2135_v10 = vld [vmem:[#allocation21 + $0x1f8] sm:$0xff] }
 0x736   :  { %3778 = vmatprep.subr.mxu1 %v1927_v4 }
 0x737   :  { %3779 = vmatpush3.msra.mxu1 %v1927_v4  ;;  %v2133_v4 = vld [vmem:[#allocation21 + $0x1e8] sm:$0xff] }
 0x738   :  { %3780 = vmatprep.subr.mxu1 %v1926_v14 }
 0x739   :  { %3781 = vmatpush3.msra.mxu1 %v1926_v14  ;;  %v2140_v14 = vld [vmem:[#allocation21 + $0x220] sm:$0xff] }
 0x73a   :  { %3782 = vmatprep.subr.mxu1 %v1925_v15 }
 0x73b   :  { %3783 = vmatpush3.msra.mxu1 %v1925_v15  ;;  %v2132_v15 = vld [vmem:[#allocation21 + $0x1e0] sm:$0xff] }
 0x73c   :  { %3790 = vmatprep.subr.mxu1 %v2167_v41 }
 0x7dc   :  { %v3748_v16 = vpop.f32.mrf.mxu1 }
 0x7de   :  { %v1906_v17 = vpop.f32.mrf.mxu1 }
 0x7df   :  { %3784 = vmatprep.mubr.f32.mxu1 %v1906_v17  ;;  %v2137_v17 = vld [vmem:[#allocation21 + $0x208] sm:$0xff] }
 0x7e0   :  { %v3751_v18 = vpop.f32.mrf.mxu1  ;;  %3785 = vmatmul.mubr.f32.vlgmr.msra.gmra.mxu1 %v3748_v16  ;;  %v2130_v16 = vld [vmem:[#allocation21 + $0x1d0] sm:$0xff] }
 0x7e1   :  { %3791 = vmatpush3.msra.mxu1 %v2167_v41 }
 0x7e2   :  { %v1916_v19 = vpop.f32.mrf.mxu1  ;;  %3792 = vmatprep.subr.mxu1 %v2164_v31 }
 0x7e3   :  { %3787 = vmatprep.mubr.f32.mxu1 %v1916_v19  ;;  %3793 = vmatpush3.msra.mxu1 %v2164_v31  ;;  %v2127_v19 = vld [vmem:[#allocation21 + $0x1b8] sm:$0xff] }
 0x7e4   :  { %3788 = vmatmul.mubr.f32.gmra.mxu1 %v3751_v18  ;;  %3794 = vmatprep.subr.mxu1 %v2161_v46  ;;  %v2129_v18 = vld [vmem:[#allocation21 + $0x1c8] sm:$0xff] }
 0x7e5   :  { %3795 = vmatpush3.msra.mxu1 %v2161_v46 }
 0x7e6   :  { %3796 = vmatprep.subr.mxu1 %v2158_v49 }
 0x7e7   :  { %3797 = vmatpush3.msra.mxu1 %v2158_v49 }
 0x7e8   :  { %3798 = vmatprep.subr.mxu1 %v2155_v53 }
 0x7e9   :  { %3799 = vmatpush3.msra.mxu1 %v2155_v53 }
 0x7ea   :  { %3800 = vmatprep.subr.mxu1 %v2152_v59 }
 0x7eb   :  { %3801 = vmatpush3.msra.mxu1 %v2152_v59 }
 0x7ec   :  { %3802 = vmatprep.subr.mxu1 %v2149_v13 }
 0x7ed   :  { %3803 = vmatpush3.msra.mxu1 %v2149_v13 }
 0x7ee   :  { %3804 = vmatprep.subr.mxu1 %v2146_v1 }
 0x7ef   :  { %3805 = vmatpush3.msra.mxu1 %v2146_v1 }
 0x7f0   :  { %3806 = vmatprep.subr.mxu1 %v2143_v8 }
 0x7f1   :  { %3807 = vmatpush3.msra.mxu1 %v2143_v8 }
 0x7f2   :  { %3808 = vmatprep.subr.mxu1 %v2140_v14 }
 0x7f3   :  { %3809 = vmatpush3.msra.mxu1 %v2140_v14 }
 0x7f4   :  { %3810 = vmatprep.subr.mxu1 %v2137_v17 }
 0x7f5   :  { %3811 = vmatpush3.msra.mxu1 %v2137_v17 }
 0x7f6   :  { %3812 = vmatprep.subr.mxu1 %v2134_v20 }
 0x7f7   :  { %3813 = vmatpush3.msra.mxu1 %v2134_v20 }
 0x8a0   :  { %v3786_v23 = vpop.f32.mrf.mxu1 }
 0x8a1   :  { %v2020_v6 = vadd.f32 %v3786_v23, %v3140_v25  ;;  %v2124_v23 = vld [vmem:[#allocation21 + $0x1a0] sm:$0xff] }
 0x8a2   :  { %v2014_v26 = vpop.f32.mrf.mxu1 }
 0x8a3   :  { %v2015_v27 = vadd.f32 %v3140_v25, %v2014_v26  ;;  %v4982_v32 = vadd.f32 %v2020_v6, %v4894_v39  ;;  %v2123_v26 = vld [vmem:[#allocation21 + $0x198] sm:$0xff]  ;;  %v2121_v6 = vld [vmem:[#allocation21 + $0x188] sm:$0xff] }
 0x8a4   :  { %v3789_v3 = vpop.f32.mrf.mxu1 }
 0x8a5   :  { %v4979_v28 = vadd.f32 %v2015_v27, %v4887_v24  ;;  %v2030_v35 = vadd.f32 %v3789_v3, %v3140_v25  ;;  %v2052_v24 = vmul.f32 %v4982_v32, %v4982_v32  ;;  %v2128_v27 = vld [vmem:[#allocation21 + $0x1c0] sm:$0xff] }
 0x8a6   :  { %v2024_v30 = vpop.f32.mrf.mxu1  ;;  %v2120_v3 = vld [vmem:[#allocation21 + $0x180] sm:$0xff] }
 0x8a7   :  { %v2025_v33 = vadd.f32 %v3140_v25, %v2024_v30  ;;  %2039 = vadd.xlane.f32.xlu0 %v4979_v28  ;;  %v2051_v34 = vmul.f32 %v4979_v28, %v4979_v28  ;;  %v4994_v39 = vadd.f32 %v2030_v35, %v4908_v9  ;;  %v2159_v9 = vld [vmem:[#allocation21 + $0x2b8] sm:$0xff]  ;;  %v2125_v30 = vld [vmem:[#allocation21 + $0x1a8] sm:$0xff] }
 0x8a8   :  { %v2131_v25 = vld [vmem:[#allocation21 + $0x1d8] sm:$0xff] }
 0x8a9   :  { %2055 = vadd.xlane.f32.xlu1 %v2051_v34  ;;  %v4988_v36 = vadd.f32 %v2025_v33, %v4901_v54  ;;  %v2160_v54 = vld [vmem:[#allocation21 + $0x2c0] sm:$0xff]  ;;  %v2054_v42 = vmul.f32 %v4994_v39, %v4994_v39  ;;  %3814 = vmatprep.subr.mxu1 %v2131_v25  ;;  %v2122_v33 = vld [vmem:[#allocation21 + $0x190] sm:$0xff] }
 0x8aa   :  { %2190 = vmatprep.subr.mxu0 %v2160_v54  ;;  %3815 = vmatpush3.msra.mxu1 %v2131_v25 }
 0x8ab   :  { %2041 = vadd.xlane.f32.xlu0 %v4982_v32  ;;  %v2053_v37 = vmul.f32 %v4988_v36, %v4988_v36  ;;  %2191 = vmatpush1.msra.mxu0 %v2159_v9 }
 0x8ac   :  { %2192 = vmatprep.subr.mxu0 %v2157_v43  ;;  %3816 = vmatprep.subr.mxu1 %v2128_v27 }
 0x8ad   :  { %2057 = vadd.xlane.f32.xlu1 %v2052_v24  ;;  %2193 = vmatpush1.msra.mxu0 %v2156_v44 }
 0x8ae   :  { %2194 = vmatprep.subr.mxu0 %v2154_v45  ;;  %3817 = vmatpush3.msra.mxu1 %v2128_v27 }
 0x8af   :  { %2043 = vadd.xlane.f32.xlu0 %v4988_v36  ;;  %2195 = vmatpush1.msra.mxu0 %v2153_v47 }
 0x8b0   :  { %2196 = vmatprep.subr.mxu0 %v2151_v48  ;;  %3818 = vmatprep.subr.mxu1 %v2125_v30 }
 0x8b1   :  { %2059 = vadd.xlane.f32.xlu1 %v2053_v37  ;;  %2197 = vmatpush1.msra.mxu0 %v2150_v50 }
 0x8b2   :  { %2198 = vmatprep.subr.mxu0 %v2148_v52  ;;  %3819 = vmatpush3.msra.mxu1 %v2125_v30 }
 0x8b3   :  { %2045 = vadd.xlane.f32.xlu0 %v4994_v39  ;;  %2199 = vmatpush1.msra.mxu0 %v2147_v55 }
 0x8b4   :  { %2200 = vmatprep.subr.mxu0 %v2145_v58  ;;  %3820 = vmatprep.subr.mxu1 %v2122_v33 }
 0x8b5   :  { %2061 = vadd.xlane.f32.xlu1 %v2054_v42  ;;  %2201 = vmatpush1.msra.mxu0 %v2144_v57 }
 0x8b6   :  { %2202 = vmatprep.subr.mxu0 %v2142_v60  ;;  %3821 = vmatpush3.msra.mxu1 %v2122_v33  ;;  %v3143_v33 = vld [vmem:[%s5169_s2 + $0x3] sm:$0x7] }
 0x8b7   :  { %2203 = vmatpush1.msra.mxu0 %v2141_v62  ;;  %3894 = vmatprep.subr.mxu1 %v4515_v0 }
 0x8b8   :  { %2204 = vmatprep.subr.mxu0 %v2139_v63 }
 0x8b9   :  { %2205 = vmatpush1.msra.mxu0 %v2138_v2 }
 0x8ba   :  { %2206 = vmatprep.subr.mxu0 %v2136_v7 }
 0x8bb   :  { %2207 = vmatpush1.msra.mxu0 %v2135_v10 }
 0x8bc   :  { %2208 = vmatprep.subr.mxu0 %v2133_v4  ;;  %v3141_v4 = vld [vmem:[%s5179_s10] ss:$0 sm:$0xff] }
 0x8bd   :  { %2209 = vmatpush1.msra.mxu0 %v2132_v15  ;;  %v3142_v15 = vld [vmem:[%s5180_s15] ss:$0 sm:$0xff] }
 0x8be   :  { %2210 = vmatprep.subr.mxu0 %v2130_v16 }
 0x8bf   :  { %2211 = vmatpush1.msra.mxu0 %v2129_v18 }
 0x8c0   :  { %2212 = vmatprep.subr.mxu0 %v2127_v19 }
 0x8c1   :  { %2213 = vmatpush1.msra.mxu0 %v2126_v22 }
 0x8c2   :  { %2214 = vmatprep.subr.mxu0 %v2124_v23 }
 0x8c3   :  { %2215 = vmatpush1.msra.mxu0 %v2123_v26 }
 0x8c4   :  { %2216 = vmatprep.subr.mxu0 %v2121_v6 }
 0x8c5   :  { %2217 = vmatpush1.msra.mxu0 %v2120_v3 }
 0x930   :  { %v2040_v34 = vpop.xlane.xlu0 %2039 }
 0x931   :  { %v2047_v35 = vmul.f32 0.0078125, %v2040_v34  ;;  %v2174_v34 = vrot.slane %v3143_v33, %v1499_v12 }
 0x932   :  { %v2056_v24 = vpop.xlane.xlu1 %2055 }
 0x933   :  { %v2067_v37 = vmul.f32 %v2047_v35, %v2047_v35  ;;  %v2063_v38 = vmul.f32 0.0078125, %v2056_v24  ;;  %v2079_v8 = vsub.f32 %v4979_v28, %v2047_v35 }
 0x934   :  { %v2042_v40 = vpop.xlane.xlu0 %2041 }
 0x935   :  { %v2071_v54 = vsub.f32 %v2063_v38, %v2067_v37  ;;  %v2048_v41 = vmul.f32 0.0078125, %v2042_v40 }
 0x936   :  { %v2058_v42 = vpop.xlane.xlu1 %2057 }
 0x937   :  { %v2075_v9 = vmax.f32 %v2071_v54, 0.0  ;;  %v2068_v43 = vmul.f32 %v2048_v41, %v2048_v41  ;;  %v2064_v31 = vmul.f32 0.0078125, %v2058_v42  ;;  %v2080_v16 = vsub.f32 %v4982_v32, %v2048_v41 }
 0x938   :  { %v2044_v44 = vpop.xlane.xlu0 %2043 }
 0x939   :  { %v2083_v45 = vadd.f32 1e-05, %v2075_v9  ;;  %v2072_v46 = vsub.f32 %v2064_v31, %v2068_v43  ;;  %v2049_v47 = vmul.f32 0.0078125, %v2044_v44  ;;  %v2178_v9 = vrot.slane %v3143_v33, %v1503_v21 }
 0x93a   :  { %v2060_v48 = vpop.xlane.xlu1 %2059 }
 0x93b   :  { %4051 = vrsqrt.f32 %v2083_v45  ;;  %v2076_v49 = vmax.f32 %v2072_v46, 0.0  ;;  %v2069_v50 = vmul.f32 %v2049_v47, %v2049_v47  ;;  %v2065_v52 = vmul.f32 0.0078125, %v2060_v48 }
 0x93c   :  { %v2046_v53 = vpop.xlane.xlu0 %2045  ;;  %v2081_v23 = vsub.f32 %v4988_v36, %v2049_v47 }
 0x93d   :  { %v2084_v55 = vadd.f32 1e-05, %v2076_v49  ;;  %v2050_v58 = vmul.f32 0.0078125, %v2046_v53  ;;  %v2073_v59 = vsub.f32 %v2065_v52, %v2069_v50  ;;  %v2182_v49 = vrot.slane %v3143_v33, %v1507_v29 }
 0x93e   :  { %v2062_v57 = vpop.xlane.xlu1 %2061 }
 0x93f   :  { %4053 = vrsqrt.f32 %v2084_v55  ;;  %v2070_v60 = vmul.f32 %v2050_v58, %v2050_v58  ;;  %v2066_v13 = vmul.f32 0.0078125, %v2062_v57  ;;  %v2077_v62 = vmax.f32 %v2073_v59, 0.0 }
 0x940   :  { %v2082_v32 = vsub.f32 %v4994_v39, %v2050_v58 }
 0x941   :  { %v2074_v63 = vsub.f32 %v2066_v13, %v2070_v60  ;;  %v2085_v1 = vadd.f32 1e-05, %v2077_v62 }
 0x943   :  { %v2078_v2 = vmax.f32 %v2074_v63, 0.0  ;;  %4055 = vrsqrt.f32 %v2085_v1 }
 0x945   :  { %v2086_v7 = vadd.f32 1e-05, %v2078_v2 }
 0x947   :  { %4057 = vrsqrt.f32 %v2086_v7 }
 0x948   :  { %v4052_v10 = vpop.eup %4051 }
 0x949   :  { %v2091_v14 = vmul.f32 %v4052_v10, %v2079_v8 }
 0x94b   :  { %v2101_v17 = vmul.f32 %v3141_v4, %v2091_v14 }
 0x94c   :  { %v4054_v18 = vpop.eup %4053 }
 0x94d   :  { %v5007_v19 = vadd.f32 %v3142_v15, %v2101_v17  ;;  %v2092_v20 = vmul.f32 %v4054_v18, %v2080_v16 }
 0x94f   :  { %2251 = vmatmul.mubr.f32.vlgmr.msra.gmra.mxu0 %v5007_v19  ;;  %3822 = vmatprep.mubr.f32.mxu1 %v5007_v19  ;;  %v2102_v22 = vmul.f32 %v3141_v4, %v2092_v20 }
 0x950   :  { %2256 = vmatprep.mubr.f32.mxu0 %v4515_v0  ;;  %v4056_v28 = vpop.eup %4055 }
 0x951   :  { %v5013_v25 = vadd.f32 %v3142_v15, %v2102_v22  ;;  %v2093_v26 = vmul.f32 %v4056_v28, %v2081_v23 }
 0x953   :  { %2257 = vmatmul.mubr.f32.gmra.mxu0 %v5013_v25  ;;  %3823 = vmatmul.mubr.f32.vlgmr.msra.gmra.mxu1 %v5013_v25  ;;  %v2103_v27 = vmul.f32 %v3141_v4, %v2093_v26 }
 0x954   :  { %v4058_v6 = vpop.eup %4057  ;;  %2262 = vmatprep.mubr.f32.mxu0 %v4515_v0 }
 0x955   :  { %v2094_v3 = vmul.f32 %v4058_v6, %v2082_v32  ;;  %v5019_v30 = vadd.f32 %v3142_v15, %v2103_v27 }
 0x957   :  { %v2104_v36 = vmul.f32 %v3141_v4, %v2094_v3  ;;  %2263 = vmatmul.mubr.f32.gmra.mxu0 %v5019_v30  ;;  %3825 = vmatprep.mubr.f32.mxu1 %v5019_v30 }
 0x958   :  { %2268 = vmatprep.mubr.f32.mxu0 %v4515_v0 }
 0x959   :  { %v5024_v39 = vadd.f32 %v3142_v15, %v2104_v36 }
 0x95b   :  { %3826 = vmatmul.mubr.f32.gmra.mxu1 %v5024_v39  ;;  %2269 = vmatmul.mubr.f32.gmra.mxu0 %v5024_v39 }
 0x95c   :  { %3926 = vmatprep.mubr.msk.f32.mxu1 %vm4516_vm0, %v4515_v0 }
 0xa0f   :  { %v2252_v35 = vpop.f32.mrf.mxu0 }
 0xa10   :  { %v2253_v24 = vadd.f32 %v2252_v35, %v2174_v34 }
 0xa11   :  { %v2254_v37 = vpop.f32.mrf.mxu0 }
 0xa12   :  { %3836 = vmatprep.mubr.f32.mxu0 %v2253_v24  ;;  %v2255_v47 = vadd.f32 %v2254_v37, %v2178_v9 }
 0xa13   :  { %v2258_v38 = vpop.f32.mrf.mxu0  ;;  %v3824_v45 = vpop.f32.mrf.mxu1 }
 0xa14   :  { %v2259_v52 = vadd.f32 %v2258_v38, %v2174_v34  ;;  %v2347_v58 = vadd.f32 %v3824_v45, %v2182_v49 }
 0xa15   :  { %v2260_v40 = vpop.f32.mrf.mxu0  ;;  %v2341_v46 = vpop.f32.mrf.mxu1 }
 0xa16   :  { %v2261_v12 = vadd.f32 %v2260_v40, %v2178_v9  ;;  %v2342_v57 = vadd.f32 %v2341_v46, %v2182_v49 }
 0xa17   :  { %v2264_v54 = vpop.f32.mrf.mxu0 }
 0xa18   :  { %v2265_v53 = vadd.f32 %v2264_v54, %v2174_v34 }
 0xa19   :  { %v2266_v41 = vpop.f32.mrf.mxu0 }
 0xa1a   :  { %v2267_v44 = vadd.f32 %v2266_v41, %v2178_v9 }
 0xa1b   :  { %v2270_v42 = vpop.f32.mrf.mxu0  ;;  %v3827_v48 = vpop.f32.mrf.mxu1 }
 0xa1c   :  { %v2357_v50 = vadd.f32 %v3827_v48, %v2182_v49  ;;  %v2271_v59 = vadd.f32 %v2270_v42, %v2174_v34 }
 0xa1d   :  { %v2272_v43 = vpop.f32.mrf.mxu0  ;;  %v2351_v21 = vpop.f32.mrf.mxu1 }
 0xa1e   :  { %v2273_v31 = vadd.f32 %v2272_v43, %v2178_v9  ;;  %v2352_v55 = vadd.f32 %v2351_v21, %v2182_v49 }
 0xa20   :  { %3828 = vmatprep.subr.mxu0 %v2273_v31 }
 0xa21   :  { %3829 = vmatpush3.xpose.msra.mxu0 %v2273_v31  ;;  %v2614_v31 = vld [vmem:[#allocation23 + $0xf8] sm:$0xff] }
 0xa22   :  { %3830 = vmatprep.subr.mxu0 %v2267_v44 }
 0xa25   :  { %3831 = vmatpush3.xpose.msra.mxu0 %v2267_v44 }
 0xa26   :  { %3832 = vmatprep.subr.mxu0 %v2261_v12 }
 0xa29   :  { %3833 = vmatpush3.xpose.msra.mxu0 %v2261_v12 }
 0xa2a   :  { %3834 = vmatprep.subr.mxu0 %v2255_v47 }
 0xa2d   :  { %3835 = vmatpush3.xpose.msra.mxu0 %v2255_v47 }
 0xa2e   :  { %3842 = vmatprep.subr.mxu0 %v2357_v50 }
 0xa30   :  { %3837 = vmatmul.mubr.f32.vlgmr.msra.gmra.mxu0 %v2259_v52 }
 0xa31   :  { %3839 = vmatprep.mubr.f32.mxu0 %v2265_v53  ;;  %3843 = vmatpush3.msra.mxu0 %v2357_v50  ;;  %v2613_v50 = vld [vmem:[#allocation23 + $0xf0] sm:$0xff]  ;;  %v2612_v53 = vld [vmem:[#allocation23 + $0xe8] sm:$0xff] }
 0xa32   :  { %3844 = vmatprep.subr.mxu0 %v2352_v55 }
 0xa33   :  { %3845 = vmatpush3.msra.mxu0 %v2352_v55  ;;  %v2611_v55 = vld [vmem:[#allocation23 + $0xe0] sm:$0xff] }
 0xa34   :  { %3840 = vmatmul.mubr.f32.gmra.mxu0 %v2271_v59  ;;  %3846 = vmatprep.subr.mxu0 %v2347_v58  ;;  %v2609_v59 = vld [vmem:[#allocation23 + $0xd0] sm:$0xff] }
 0xa35   :  { %3847 = vmatpush3.msra.mxu0 %v2347_v58  ;;  %v2610_v58 = vld [vmem:[#allocation23 + $0xd8] sm:$0xff] }
 0xa36   :  { %3848 = vmatprep.subr.mxu0 %v2342_v57 }
 0xa37   :  { %3849 = vmatpush3.msra.mxu0 %v2342_v57  ;;  %v2608_v57 = vld [vmem:[#allocation23 + $0xc8] sm:$0xff] }
 0xa38   :  { %3856 = vmatprep.subr.mxu0 %v2614_v31 }
 0xaf0   :  { %v3838_v11 = vpop.f32.mrf.mxu0 }
 0xaf1   :  { %v2446_v29 = vmul.f32 0.088388346, %v3838_v11  ;;  %v2607_v11 = vld [vmem:[#allocation23 + $0xc0] sm:$0xff] }
 0xaf2   :  { %v2426_v60 = vpop.f32.mrf.mxu0 }
 0xaf3   :  { %v2445_v13 = vmul.f32 0.088388346, %v2426_v60  ;;  %v2450_v62 = vsel %vm4929_vm1, %v2446_v29, -1e+30  ;;  %v2606_v29 = vld [vmem:[#allocation23 + $0xb8] sm:$0xff]  ;;  %v2605_v60 = vld [vmem:[#allocation23 + $0xb0] sm:$0xff] }
 0xaf4   :  { %v3841_v63 = vpop.f32.mrf.mxu0  ;;  %v2456_v1 = vsel %vm1779_vm2, %v2450_v62, -inf }
 0xaf5   :  { %v2448_v2 = vmul.f32 0.088388346, %v3841_v63  ;;  %2457 = vmax.xlane.f32.xlu1 %v2456_v1  ;;  %v2449_v7 = vsel %vm4933_vm3, %v2445_v13, -1e+30  ;;  %v2604_v13 = vld [vmem:[#allocation23 + $0xa8] sm:$0xff]  ;;  %v2602_v63 = vld [vmem:[#allocation23 + $0x98] sm:$0xff] }
 0xaf6   :  { %v2436_v8 = vpop.f32.mrf.mxu0  ;;  %v2453_v10 = vsel %vm1779_vm2, %v2449_v7, -inf  ;;  %v2601_v1 = vld [vmem:[#allocation23 + $0x90] sm:$0xff] }
 0xaf7   :  { %v2447_v4 = vmul.f32 0.088388346, %v2436_v8  ;;  %2454 = vmax.xlane.f32.xlu0 %v2453_v10  ;;  %v2452_v14 = vsel %vm4940_vm4, %v2448_v2, -1e+30  ;;  %v2600_v2 = vld [vmem:[#allocation23 + $0x88] sm:$0xff] }
 0xaf8   :  { %v2462_v15 = vsel %vm1779_vm2, %v2452_v14, -inf }
 0xaf9   :  { %2463 = vmax.xlane.f32.xlu1 %v2462_v15  ;;  %v2451_v16 = vsel %vm4947_vm5, %v2447_v4, -1e+30  ;;  %v3149_v15 = vld [vmem:[%s5178_s7 + $0x1] ss:$0 sm:$0xff] }
 0xafa   :  { %v2459_v17 = vsel %vm1779_vm2, %v2451_v16, -inf }
 0xafb   :  { %2460 = vmax.xlane.f32.xlu0 %v2459_v17 }
 0xb7e   :  { %v2458_v18 = vpop.xlane.xlu1 %2457 }
 0xb7f   :  { %v2466_v20 = vsub.f32 %v2450_v62, %v2458_v18  ;;  %v2603_v62 = vld [vmem:[#allocation23 + $0xa0] sm:$0xff] }
 0xb80   :  { %v2455_v22 = vpop.xlane.xlu0 %2454 }
 0xb81   :  { %v2471_v23 = vmul.f32 1.442695, %v2466_v20  ;;  %v2465_v28 = vsub.f32 %v2449_v7, %v2455_v22  ;;  %v2599_v7 = vld [vmem:[#allocation23 + $0x80] sm:$0xff] }
 0xb82   :  { %v2464_v26 = vpop.xlane.xlu1 %2463 }
 0xb83   :  { %4059 = vpow2.f32 %v2471_v23  ;;  %v2469_v32 = vmul.f32 1.442695, %v2465_v28  ;;  %v2468_v6 = vsub.f32 %v2452_v14, %v2464_v26 }
 0xb84   :  { %v2461_v27 = vpop.xlane.xlu0 %2460 }
 0xb85   :  { %4061 = vpow2.f32 %v2469_v32  ;;  %v2475_v3 = vmul.f32 1.442695, %v2468_v6  ;;  %v2467_v36 = vsub.f32 %v2451_v16, %v2461_v27 }
 0xb87   :  { %4063 = vpow2.f32 %v2475_v3  ;;  %v2473_v33 = vmul.f32 1.442695, %v2467_v36 }
 0xb89   :  { %4065 = vpow2.f32 %v2473_v33 }
 0xb90   :  { %v4060_v34 = vpop.eup %4059 }
 0xb91   :  { %v2478_v35 = vsel %vm4929_vm1, %v4060_v34, 0.0  ;;  %v2817_v34 = vld [vmem:[#allocation24 + $0x78] sm:$0xff] }
 0xb92   :  { %v4062_v24 = vpop.eup %4061  ;;  %v2484_v37 = vsel %vm1779_vm2, %v2478_v35, 0.0  ;;  %3895 = vmatpush3.msra.mxu1 %v2817_v34 }
 0xb93   :  { %2485 = vadd.xlane.f32.xlu1 %v2484_v37  ;;  %v2477_v38 = vsel %vm4933_vm3, %v4062_v24, 0.0  ;;  %3896 = vmatprep.subr.mxu1 %v4515_v0  ;;  %v2813_v24 = vld [vmem:[#allocation24 + $0x58] sm:$0xff]  ;;  %v2812_v37 = vld [vmem:[#allocation24 + $0x50] sm:$0xff] }
 0xb94   :  { %v4064_v40 = vpop.eup %4063  ;;  %v2481_v54 = vsel %vm1779_vm2, %v2477_v38, 0.0 }
 0xb95   :  { %2482 = vadd.xlane.f32.xlu0 %v2481_v54  ;;  %v2480_v41 = vsel %vm4940_vm4, %v4064_v40, 0.0  ;;  %v2810_v40 = vld [vmem:[#allocation24 + $0x40] sm:$0xff]  ;;  %v2809_v54 = vld [vmem:[#allocation24 + $0x38] sm:$0xff] }
 0xb96   :  { %v4066_v42 = vpop.eup %4065  ;;  %v2490_v9 = vsel %vm1779_vm2, %v2480_v41, 0.0 }
 0xb97   :  { %2491 = vadd.xlane.f32.xlu1 %v2490_v9  ;;  %v2479_v51 = vsel %vm4947_vm5, %v4066_v42, 0.0  ;;  %v2807_v42 = vld [vmem:[#allocation24 + $0x28] sm:$0xff]  ;;  %v2806_v9 = vld [vmem:[#allocation24 + $0x20] sm:$0xff] }
 0xb98   :  { %v2487_v43 = vsel %vm1779_vm2, %v2479_v51, 0.0 }
 0xb99   :  { %2488 = vadd.xlane.f32.xlu0 %v2487_v43  ;;  %v2804_v43 = vld [vmem:[#allocation24 + $0x10] sm:$0xff] }
 0xc1c   :  { %v2486_v56 = vpop.xlane.xlu1 %2485 }
 0xc1d   :  { %4067 = vrcp.f32 %v2486_v56  ;;  %v2802_v56 = vld [vmem:[#allocation24] sm:$0xff] }
 0xc1e   :  { %v2483_v44 = vpop.xlane.xlu0 %2482 }
 0xc1f   :  { %4069 = vrcp.f32 %v2483_v44 }
 0xc20   :  { %v2492_v45 = vpop.xlane.xlu1 %2491 }
 0xc21   :  { %4071 = vrcp.f32 %v2492_v45 }
 0xc22   :  { %v2489_v61 = vpop.xlane.xlu0 %2488 }
 0xc23   :  { %4073 = vrcp.f32 %v2489_v61 }
 0xc2a   :  { %v4068_v12 = vpop.eup %4067 }
 0xc2b   :  { %v2498_v46 = vmul.f32 %v4068_v12, %v2478_v35  ;;  %v2814_v35 = vld [vmem:[#allocation24 + $0x60] sm:$0xff] }
 0xc2c   :  { %v4070_v47 = vpop.eup %4069 }
 0xc2d   :  { %2794 = vst.msk [vmem:[#allocation30 + $0x28] sm:$0xff] %vm1779_vm2, %v2498_v46  ;;  %v2497_v5 = vmul.f32 %v4070_v47, %v2477_v38  ;;  %v2811_v38 = vld [vmem:[#allocation24 + $0x48] sm:$0xff] }
 0xc2e   :  { %v4072_v48 = vpop.eup %4071 }
 0xc2f   :  { %3850 = vmatprep.mubr.msk.f32.mxu0 %vm1779_vm2, %v2497_v5  ;;  %2793 = vst.msk [vmem:[#allocation30 + $0x20] sm:$0xff] %vm1779_vm2, %v2497_v5  ;;  %v2500_v49 = vmul.f32 %v4072_v48, %v2480_v41  ;;  %v2808_v41 = vld [vmem:[#allocation24 + $0x30] sm:$0xff] }
 0xc30   :  { %v4074_v21 = vpop.eup %4073  ;;  %3851 = vmatmul.mubr.msk.f32.vlgmr.msra.gmra.mxu0 %vm1779_vm2, %v2498_v46 }
 0xc31   :  { %v2499_v52 = vmul.f32 %v4074_v21, %v2479_v51  ;;  %2796 = vst.msk [vmem:[#allocation30 + $0x38] sm:$0xff] %vm1779_vm2, %v2500_v49  ;;  %3857 = vmatpush3.msra.mxu0 %v2614_v31  ;;  %v2805_v51 = vld [vmem:[#allocation24 + $0x18] sm:$0xff]  ;;  %v2803_v31 = vld [vmem:[#allocation24 + $0x8] sm:$0xff] }
 0xc32   :  { %3858 = vmatprep.subr.mxu0 %v2613_v50 }
 0xc33   :  { %3853 = vmatprep.mubr.msk.f32.mxu0 %vm1779_vm2, %v2499_v52  ;;  %2795 = vst.msk [vmem:[#allocation30 + $0x30] sm:$0xff] %vm1779_vm2, %v2499_v52  ;;  %3859 = vmatpush3.msra.mxu0 %v2613_v50 }
 0xc34   :  { %3854 = vmatmul.mubr.msk.f32.gmra.mxu0 %vm1779_vm2, %v2500_v49  ;;  %3860 = vmatprep.subr.mxu0 %v2612_v53 }
 0xc35   :  { %3861 = vmatpush3.msra.mxu0 %v2612_v53 }
 0xc36   :  { %3862 = vmatprep.subr.mxu0 %v2611_v55 }
 0xc37   :  { %3863 = vmatpush3.msra.mxu0 %v2611_v55 }
 0xc38   :  { %3864 = vmatprep.subr.mxu0 %v2610_v58 }
 0xc39   :  { %3865 = vmatpush3.msra.mxu0 %v2610_v58 }
 0xc3a   :  { %3866 = vmatprep.subr.mxu0 %v2609_v59 }
 0xc3b   :  { %3867 = vmatpush3.msra.mxu0 %v2609_v59 }
 0xc3c   :  { %3868 = vmatprep.subr.mxu0 %v2608_v57 }
 0xc3d   :  { %3869 = vmatpush3.msra.mxu0 %v2608_v57 }
 0xc3e   :  { %3870 = vmatprep.subr.mxu0 %v2607_v11 }
 0xc3f   :  { %3871 = vmatpush3.msra.mxu0 %v2607_v11 }
 0xc40   :  { %3872 = vmatprep.subr.mxu0 %v2606_v29 }
 0xc41   :  { %3873 = vmatpush3.msra.mxu0 %v2606_v29 }
 0xc42   :  { %3874 = vmatprep.subr.mxu0 %v2605_v60 }
 0xc43   :  { %3875 = vmatpush3.msra.mxu0 %v2605_v60 }
 0xc44   :  { %3876 = vmatprep.subr.mxu0 %v2604_v13 }
 0xc45   :  { %3877 = vmatpush3.msra.mxu0 %v2604_v13 }
 0xc46   :  { %3878 = vmatprep.subr.mxu0 %v2603_v62 }
 0xc47   :  { %3879 = vmatpush3.msra.mxu0 %v2603_v62 }
 0xc48   :  { %3880 = vmatprep.subr.mxu0 %v2602_v63 }
 0xc49   :  { %3881 = vmatpush3.msra.mxu0 %v2602_v63 }
 0xc4a   :  { %3882 = vmatprep.subr.mxu0 %v2601_v1 }
 0xc4b   :  { %3883 = vmatpush3.msra.mxu0 %v2601_v1 }
 0xc4c   :  { %3884 = vmatprep.subr.mxu0 %v2600_v2 }
 0xc4d   :  { %3885 = vmatpush3.msra.mxu0 %v2600_v2 }
 0xc4e   :  { %3886 = vmatprep.subr.mxu0 %v2599_v7 }
 0xc4f   :  { %3887 = vmatpush3.msra.mxu0 %v2599_v7 }
 0xc50   :  { %3929 = vmatprep.subr.mxu0 %v4515_v0 }
 0xcf0   :  { %v3852_v8 = vpop.f32.mrf.mxu0 }
 0xcf2   :  { %v2579_v10 = vpop.f32.mrf.mxu0 }
 0xcf3   :  { %3888 = vmatprep.mubr.f32.mxu0 %v2579_v10 }
 0xcf4   :  { %v3855_v4 = vpop.f32.mrf.mxu0  ;;  %3889 = vmatmul.mubr.f32.vlgmr.msra.gmra.mxu0 %v3852_v8 }
 0xcf6   :  { %v2589_v14 = vpop.f32.mrf.mxu0 }
 0xcf7   :  { %3891 = vmatprep.mubr.f32.mxu0 %v2589_v14 }
 0xcf8   :  { %3892 = vmatmul.mubr.f32.gmra.mxu0 %v3855_v4 }
 0xcf9   :  { %3961 = vmatprep.mubr.msk.f32.mxu0 %vm4516_vm0, %v4515_v0 }
 0xdb4   :  { %v3890_v16 = vpop.f32.mrf.mxu0 }
 0xdb5   :  { %v2695_v17 = vadd.f32 %v3890_v16, %v3149_v15 }
 0xdb6   :  { %v2689_v18 = vpop.f32.mrf.mxu0 }
 0xdb7   :  { %v5074_v20 = vadd.f32 %v2695_v17, %v5013_v25  ;;  %v2690_v22 = vadd.f32 %v3149_v15, %v2689_v18 }
 0xdb8   :  { %v3893_v23 = vpop.f32.mrf.mxu0 }
 0xdb9   :  { %v5077_v28 = vadd.f32 %v2690_v22, %v5007_v19  ;;  %2718 = vadd.xlane.f32.xlu1 %v5074_v20  ;;  %v2705_v32 = vadd.f32 %v3893_v23, %v3149_v15  ;;  %v2729_v25 = vmul.f32 %v5074_v20, %v5074_v20 }
 0xdba   :  { %v2699_v26 = vpop.f32.mrf.mxu0 }
 0xdbb   :  { %2716 = vadd.xlane.f32.xlu0 %v5077_v28  ;;  %v2728_v6 = vmul.f32 %v5077_v28, %v5077_v28  ;;  %v2700_v27 = vadd.f32 %v3149_v15, %v2699_v26  ;;  %v5086_v3 = vadd.f32 %v2705_v32, %v5024_v39  ;;  %v2816_v39 = vld [vmem:[#allocation24 + $0x70] sm:$0xff] }
 0xdbc   :  { %3897 = vmatpush3.msra.mxu1 %v2816_v39 }
 0xdbd   :  { %2732 = vadd.xlane.f32.xlu1 %v2728_v6  ;;  %v5089_v19 = vadd.f32 %v2700_v27, %v5019_v30  ;;  %v2731_v36 = vmul.f32 %v5086_v3, %v5086_v3  ;;  %3898 = vmatprep.subr.mxu1 %v4515_v0  ;;  %v2815_v30 = vld [vmem:[#allocation24 + $0x68] sm:$0xff] }
 0xdbe   :  { %3899 = vmatpush3.msra.mxu1 %v2815_v30  ;;  %v3152_v6 = vld [vmem:[%s5179_s10 + $0x1] ss:$0 sm:$0xff] }
 0xdbf   :  { %2734 = vadd.xlane.f32.xlu0 %v2729_v25  ;;  %v2730_v33 = vmul.f32 %v5089_v19, %v5089_v19  ;;  %3900 = vmatprep.subr.mxu1 %v4515_v0 }
 0xdc0   :  { %3901 = vmatpush3.msra.mxu1 %v2814_v35  ;;  %v3153_v35 = vld [vmem:[%s5180_s15 + $0x1] ss:$0 sm:$0xff] }
 0xdc1   :  { %2722 = vadd.xlane.f32.xlu1 %v5086_v3  ;;  %3902 = vmatprep.subr.mxu1 %v4515_v0 }
 0xdc2   :  { %3903 = vmatpush3.msra.mxu1 %v2813_v24 }
 0xdc3   :  { %2720 = vadd.xlane.f32.xlu0 %v5089_v19  ;;  %3904 = vmatprep.subr.mxu1 %v4515_v0 }
 0xdc4   :  { %3905 = vmatpush3.msra.mxu1 %v2812_v37 }
 0xdc5   :  { %2738 = vadd.xlane.f32.xlu1 %v2731_v36  ;;  %3906 = vmatprep.subr.mxu1 %v4515_v0 }
 0xdc6   :  { %3907 = vmatpush3.msra.mxu1 %v2811_v38 }
 0xdc7   :  { %2736 = vadd.xlane.f32.xlu0 %v2730_v33  ;;  %3908 = vmatprep.subr.mxu1 %v4515_v0 }
 0xdc8   :  { %3909 = vmatpush3.msra.mxu1 %v2810_v40 }
 0xdc9   :  { %3910 = vmatprep.subr.mxu1 %v4515_v0 }
 0xdca   :  { %3911 = vmatpush3.msra.mxu1 %v2809_v54 }
 0xdcb   :  { %3912 = vmatprep.subr.mxu1 %v4515_v0 }
 0xdcc   :  { %3913 = vmatpush3.msra.mxu1 %v2808_v41 }
 0xdcd   :  { %3914 = vmatprep.subr.mxu1 %v4515_v0 }
 0xdce   :  { %3915 = vmatpush3.msra.mxu1 %v2807_v42 }
 0xdcf   :  { %3916 = vmatprep.subr.mxu1 %v4515_v0 }
 0xdd0   :  { %3917 = vmatpush3.msra.mxu1 %v2806_v9 }
 0xdd1   :  { %3918 = vmatprep.subr.mxu1 %v4515_v0 }
 0xdd2   :  { %3919 = vmatpush3.msra.mxu1 %v2805_v51 }
 0xdd3   :  { %3920 = vmatprep.subr.mxu1 %v4515_v0 }
 0xdd4   :  { %3921 = vmatpush3.msra.mxu1 %v2804_v43 }
 0xdd5   :  { %3922 = vmatprep.subr.mxu1 %v4515_v0 }
 0xdd6   :  { %3923 = vmatpush3.msra.mxu1 %v2803_v31 }
 0xdd7   :  { %3924 = vmatprep.subr.mxu1 %v4515_v0 }
 0xdd8   :  { %3925 = vmatpush3.msra.mxu1 %v2802_v56 }
 0xe42   :  { %v2719_v44 = vpop.xlane.xlu1 %2718 }
 0xe43   :  { %v2725_v61 = vmul.f32 0.0078125, %v2719_v44 }
 0xe44   :  { %v2717_v45 = vpop.xlane.xlu0 %2716 }
 0xe45   :  { %v2724_v12 = vmul.f32 0.0078125, %v2717_v45  ;;  %v2745_v49 = vmul.f32 %v2725_v61, %v2725_v61  ;;  %v2757_v18 = vsub.f32 %v5074_v20, %v2725_v61  ;;  %v2940_v61 = vld [vmem:[#allocation26 + $0x70] sm:$0xff] }
 0xe46   :  { %v2733_v46 = vpop.xlane.xlu1 %2732 }
 0xe47   :  { %v2744_v47 = vmul.f32 %v2724_v12, %v2724_v12  ;;  %v2740_v5 = vmul.f32 0.0078125, %v2733_v46  ;;  %v2756_v23 = vsub.f32 %v5077_v28, %v2724_v12  ;;  %v2939_v12 = vld [vmem:[#allocation26 + $0x68] sm:$0xff]  ;;  %v2938_v46 = vld [vmem:[#allocation26 + $0x60] sm:$0xff] }
 0xe48   :  { %v2735_v48 = vpop.xlane.xlu0 %2734 }
 0xe49   :  { %v2748_v50 = vsub.f32 %v2740_v5, %v2744_v47  ;;  %v2741_v21 = vmul.f32 0.0078125, %v2735_v48  ;;  %v2937_v47 = vld [vmem:[#allocation26 + $0x58] sm:$0xff]  ;;  %v2936_v5 = vld [vmem:[#allocation26 + $0x50] sm:$0xff]  ;;  %v2935_v48 = vld [vmem:[#allocation26 + $0x48] sm:$0xff] }
 0xe4a   :  { %v2723_v52 = vpop.xlane.xlu1 %2722 }
 0xe4b   :  { %v2752_v53 = vmax.f32 %v2748_v50, 0.0  ;;  %v2749_v55 = vsub.f32 %v2741_v21, %v2745_v49  ;;  %v2727_v58 = vmul.f32 0.0078125, %v2723_v52  ;;  %v2934_v49 = vld [vmem:[#allocation26 + $0x40] sm:$0xff]  ;;  %v2933_v50 = vld [vmem:[#allocation26 + $0x38] sm:$0xff]  ;;  %v2932_v21 = vld [vmem:[#allocation26 + $0x30] sm:$0xff] }
 0xe4c   :  { %v2721_v59 = vpop.xlane.xlu0 %2720  ;;  %v2931_v52 = vld [vmem:[#allocation26 + $0x28] sm:$0xff] }
 0xe4d   :  { %v2760_v57 = vadd.f32 1e-05, %v2752_v53  ;;  %v2753_v11 = vmax.f32 %v2749_v55, 0.0  ;;  %v2726_v29 = vmul.f32 0.0078125, %v2721_v59  ;;  %v2747_v62 = vmul.f32 %v2727_v58, %v2727_v58  ;;  %v2930_v53 = vld [vmem:[#allocation26 + $0x20] sm:$0xff]  ;;  %v2929_v55 = vld [vmem:[#allocation26 + $0x18] sm:$0xff] }
 0xe4e   :  { %v2739_v60 = vpop.xlane.xlu1 %2738  ;;  %v2759_v25 = vsub.f32 %v5086_v3, %v2727_v58  ;;  %v2941_v3 = vld [vmem:[#allocation26 + $0x78] sm:$0xff]  ;;  %v2928_v58 = vld [vmem:[#allocation26 + $0x10] sm:$0xff]  ;;  %v2927_v59 = vld [vmem:[#allocation26 + $0x8] sm:$0xff] }
 0xe4f   :  { %v2761_v13 = vadd.f32 1e-05, %v2753_v11  ;;  %v2743_v63 = vmul.f32 0.0078125, %v2739_v60  ;;  %4075 = vrsqrt.f32 %v2760_v57  ;;  %v2746_v2 = vmul.f32 %v2726_v29, %v2726_v29  ;;  %3930 = vmatpush3.msra.mxu0 %v2941_v3  ;;  %v2926_v57 = vld [vmem:[#allocation26] sm:$0xff] }
 0xe50   :  { %v2737_v1 = vpop.xlane.xlu0 %2736  ;;  %v2758_v34 = vsub.f32 %v5089_v19, %v2726_v29  ;;  %3931 = vmatprep.subr.mxu0 %v4515_v0  ;;  %v3154_v19 = vld [vmem:[%s5181_s14] ss:$0 sm:$0xff] }
 0xe51   :  { %4077 = vrsqrt.f32 %v2761_v13  ;;  %v2751_v7 = vsub.f32 %v2743_v63, %v2747_v62  ;;  %v2742_v8 = vmul.f32 0.0078125, %v2737_v1  ;;  %3932 = vmatpush3.msra.mxu0 %v2940_v61 }
 0xe52   :  { %3933 = vmatprep.subr.mxu0 %v4515_v0 }
 0xe53   :  { %v2755_v10 = vmax.f32 %v2751_v7, 0.0  ;;  %v2750_v4 = vsub.f32 %v2742_v8, %v2746_v2  ;;  %3934 = vmatpush3.msra.mxu0 %v2939_v12 }
 0xe54   :  { %3935 = vmatprep.subr.mxu0 %v4515_v0 }
 0xe55   :  { %v2763_v14 = vadd.f32 1e-05, %v2755_v10  ;;  %v2754_v15 = vmax.f32 %v2750_v4, 0.0  ;;  %3936 = vmatpush3.msra.mxu0 %v2938_v46  ;;  %v3155_v10 = vld [vmem:[%s5182_s5] ss:$0 sm:$0xff] }
 0xe56   :  { %3937 = vmatprep.subr.mxu0 %v4515_v0 }
 0xe57   :  { %4079 = vrsqrt.f32 %v2763_v14  ;;  %v2762_v16 = vadd.f32 1e-05, %v2754_v15  ;;  %3938 = vmatpush3.msra.mxu0 %v2937_v47  ;;  %v3156_v14 = vld [vmem:[%s5183_s16] ss:$0 sm:$0xff] }
 0xe58   :  { %3939 = vmatprep.subr.mxu0 %v4515_v0 }
 0xe59   :  { %4081 = vrsqrt.f32 %v2762_v16  ;;  %3940 = vmatpush3.msra.mxu0 %v2936_v5 }
 0xe5a   :  { %3941 = vmatprep.subr.mxu0 %v4515_v0 }
 0xe5b   :  { %3942 = vmatpush3.msra.mxu0 %v2935_v48 }
 0xe5c   :  { %v4076_v17 = vpop.eup %4075  ;;  %3943 = vmatprep.subr.mxu0 %v4515_v0 }
 0xe5d   :  { %v2768_v32 = vmul.f32 %v4076_v17, %v2756_v23  ;;  %3944 = vmatpush3.msra.mxu0 %v2934_v49 }
 0xe5e   :  { %v4078_v22 = vpop.eup %4077  ;;  %3945 = vmatprep.subr.mxu0 %v4515_v0 }
 0xe5f   :  { %v2769_v26 = vmul.f32 %v4078_v22, %v2757_v18  ;;  %v2778_v33 = vmul.f32 %v3152_v6, %v2768_v32  ;;  %3946 = vmatpush3.msra.mxu0 %v2933_v50 }
 0xe60   :  { %3947 = vmatprep.subr.mxu0 %v4515_v0 }
 0xe61   :  { %v2779_v27 = vmul.f32 %v3152_v6, %v2769_v26  ;;  %v2788_v40 = vadd.f32 %v3153_v35, %v2778_v33  ;;  %3948 = vmatpush3.msra.mxu0 %v2932_v21 }
 0xe62   :  { %3949 = vmatprep.subr.mxu0 %v4515_v0 }
 0xe63   :  { %v2789_v37 = vadd.f32 %v3153_v35, %v2779_v27  ;;  %3950 = vmatpush3.msra.mxu0 %v2931_v52 }
 0xe64   :  { %v4080_v36 = vpop.eup %4079  ;;  %3951 = vmatprep.subr.mxu0 %v4515_v0 }
 0xe65   :  { %v2771_v39 = vmul.f32 %v4080_v36, %v2759_v25  ;;  %v2797_v54 = vadd.f32 %v2789_v37, %v2788_v40  ;;  %3952 = vmatpush3.msra.mxu0 %v2930_v53 }
 0xe66   :  { %v4082_v30 = vpop.eup %4081  ;;  %3953 = vmatprep.subr.mxu0 %v4515_v0 }
 0xe67   :  { %v2770_v24 = vmul.f32 %v4082_v30, %v2758_v34  ;;  %v2781_v38 = vmul.f32 %v3152_v6, %v2771_v39  ;;  %3954 = vmatpush3.msra.mxu0 %v2929_v55 }
 0xe68   :  { %3955 = vmatprep.subr.mxu0 %v4515_v0 }
 0xe69   :  { %v2780_v20 = vmul.f32 %v3152_v6, %v2770_v24  ;;  %v2791_v41 = vadd.f32 %v3153_v35, %v2781_v38  ;;  %3956 = vmatpush3.msra.mxu0 %v2928_v58 }
 0xe6a   :  { %3957 = vmatprep.subr.mxu0 %v4515_v0 }
 0xe6b   :  { %v2790_v28 = vadd.f32 %v3153_v35, %v2780_v20  ;;  %3958 = vmatpush3.msra.mxu0 %v2927_v59 }
 0xe6c   :  { %3959 = vmatprep.subr.mxu0 %v4515_v0 }
 0xe6d   :  { %v2798_v42 = vadd.f32 %v2797_v54, %v2790_v28  ;;  %3960 = vmatpush3.msra.mxu0 %v2926_v57 }
 0xe6f   :  { %v2799_v9 = vadd.f32 %v2798_v42, %v2791_v41 }
 0xe71   :  { %v2800_v51 = vmul.f32 0.25, %v2799_v9 }
 0xe73   :  { %3927 = vmatmul.mubr.f32.vlgmr.msra.gmra.mxu1 %v2800_v51  ;;  %2801 = vst [vmem:[#allocation27] sm:$0xff] %v2800_v51 }
 0xf33   :  { %v2891_v43 = vpop.f32.mrf.mxu1 }
 0xf34   :  { %v2892_v31 = vadd.f32 %v3154_v19, %v2891_v43 }
 0xf35   :  { %v3928_v56 = vpop.f32.mrf.mxu1 }
 0xf36   :  { %v2895_v44 = vmax.f32 %v2892_v31, 0.0 }
 0xf38   :  { %2898 = vadd.xlane.f32.xlu0 %v2895_v44  ;;  %v2901_v45 = vmul.f32 %v2895_v44, %v2895_v44 }
 0xf3a   :  { %2902 = vadd.xlane.f32.xlu1 %v2901_v45 }
 0xfc1   :  { %v2899_v11 = vpop.xlane.xlu0 %2898 }
 0xfc2   :  { %v2900_v29 = vmul.f32 0.0078125, %v2899_v11 }
 0xfc3   :  { %v2903_v60 = vpop.xlane.xlu1 %2902 }
 0xfc4   :  { %v2905_v13 = vmul.f32 %v2900_v29, %v2900_v29  ;;  %v2904_v62 = vmul.f32 0.0078125, %v2903_v60  ;;  %v2908_v7 = vsub.f32 %v2895_v44, %v2900_v29 }
 0xfc6   :  { %v2906_v63 = vsub.f32 %v2904_v62, %v2905_v13 }
 0xfc8   :  { %v2907_v1 = vmax.f32 %v2906_v63, 0.0 }
 0xfca   :  { %v2909_v2 = vadd.f32 1e-05, %v2907_v1 }
 0xfcc   :  { %4083 = vrsqrt.f32 %v2909_v2 }
 0xfd9   :  { %v4084_v8 = vpop.eup %4083 }
 0xfda   :  { %v2911_v4 = vmul.f32 %v4084_v8, %v2908_v7 }
 0xfdc   :  { %v2918_v15 = vmul.f32 %v3155_v10, %v2911_v4 }
 0xfde   :  { %v2925_v16 = vadd.f32 %v3156_v14, %v2918_v15 }
 0xfe0   :  { %3962 = vmatmul.mubr.f32.vlgmr.msra.gmra.mxu0 %v2925_v16 }
 0xfe1   :  { %4396 = shalt.err (!%p4393_p9)
}
 0xfe2   :  { %3029 = dma.vmem_to_hbm [thread:$0]  %s3027_s0, 128, %s4663_s19, [#allocation5]   ;;  %v3157_v0 = vld [vmem:[%s4658_s6] ss:$0 sm:$0xff] }
 0xfe3   :  { %s4518_s13 = smov [#allocation28]   ;;  %s4519_s22 = smov [#allocation30]  }
 0xfe4   :  { %s3036_s21 = sshll.u32 %s4518_s13, 4  ;;  %s3045_s23 = sshll.u32 %s4519_s22, 4  ;;  %s3037_s21 = int_to_ptr.vmem [resolvable:$true] %s3036_s21  ;;  %s3046_s23 = int_to_ptr.vmem [resolvable:$true] %s3045_s23 }
 0xfe5   :  { %s4405_s26 = scalar_lea.vmem %s3037_s21, 128  ;;  %p4410_p11 = scmp.lt.s32.totalorder %s3037_s21, %s3037_s21 }
 0xfe6   :  { %p4406_p10 = scmp.ne.s32.totalorder %s3037_s21, %s4405_s26  ;;  %p4411_p12 = scmp.lt.s32.totalorder %s4405_s26, %s4405_s26 }
 0xfe8   :  { %p4412_p13 = por %p4411_p12, %p4410_p11 }
 0xfea   :  { %p4413_p0 = pnand %p4412_p13, %p4406_p10 }
0x10a0   :  { %v3015_v17 = vpop.f32.mrf.mxu0 }
0x10a1   :  { %v3016_v18 = vadd.f32 %v3157_v0, %v3015_v17 }
0x10a2   :  { %v3963_v22 = vpop.f32.mrf.mxu0 }
0x10a3   :  { %3019 = vst [vmem:[#allocation28] sm:$0xff] %v3016_v18 }
0x10a4   :  { %4416 = shalt.err (!%p4413_p0)
}
0x10a5   :  { %3039 = dma.vmem_to_hbm [thread:$0]  %s3037_s21, 128, %s4668_s27, [#allocation29]  }
0x10a6   :  { %s4425_s19 = scalar_lea.vmem %s3046_s23, 1024  ;;  %p4430_p2 = scmp.lt.s32.totalorder %s3046_s23, %s3046_s23 }
0x10a7   :  { %p4426_p1 = scmp.ne.s32.totalorder %s3046_s23, %s4425_s19  ;;  %p4431_p3 = scmp.lt.s32.totalorder %s4425_s19, %s4425_s19 }
0x10a9   :  { %p4432_p4 = por %p4431_p3, %p4430_p2 }
0x10ab   :  { %p4433_p5 = pnand %p4432_p4, %p4426_p1 }
0x10ad   :  { %4436 = shalt.err (!%p4433_p5)
}
0x10ae   :  { %3051 = dma.vmem_to_hbm [thread:$0]  %s3046_s23, 1024, %s4673_s8, [#allocation29], %s4498_s9, %s4498_s9, %s4499_s1  }
0x10af   :  { %4461 = dma.done.wait [#allocation5], 128  }
0x10b0   :  { %4462 = vsyncadd [#allocation5], 4294967168 }
0x10b1   :  { %4463 = dma.done.wait [#allocation29], 1152  }
0x10b2   :  { %4464 = vsyncadd [#allocation29], 4294966144 }
0x10b3   :  { %3061 = vsyncpa [#allocation4], 1 }
0x10b4   :  { %3062 = vsyncpa [#allocation7], 1 }
0x10b5   :  { %3063 = vsyncpa [#allocation10], 1 }
0x10b6   :  { %3064 = vsyncpa [#allocation13], 1 }
0x10b7   :  { %3065 = vsyncpa [#allocation16], 1 }
0x10b8   :  { %3066 = vsyncpa [#allocation19], 1 }
0x10b9   :  { %3067 = vsyncpa [#allocation22], 1 }
0x10ba   :  { %3068 = vsyncpa [#allocation25], 1 }
0x10bb   :  { %3069 = vsyncpa [#allocation5], 1 }
0x10bc   :  { %3070 = vsyncpa [#allocation29], 1 }

</bundles_post_ra>
